<compile_context>
chip_gen: v5e
topology: v5e:2x2
jax: 0.10.0
libtpu: 0.0.40
codegen_flags: <defaults>
</compile_context>

<pallas_src>
import functools
import math

import jax
import jax.numpy as jnp
from jax.experimental import pallas as pl
from jax.experimental.pallas import tpu as pltpu

N_TOKENS_PER_CONCEPT = 2  # global constant referenced by the PyTorch forward


def _attention_kernel(xt_ref, xc_ref, bias_ref,
                      wt_ref, bt_ref, wc_ref, bc_ref, wp_ref, bp_ref,
                      out_ref,
                      kv_scratch, xtnew_scratch,
                      *, rows_t, rows_c, D, Dc, n_head):
    """One grid step: Bt batched examples, fully fused attention block.

    kv_scratch column layout : [ K (Dc) | V (D) | Q (Dc, token rows only) ]
    kv_scratch row layout    : [ token rows (rows_t) ; concept rows (rows_c) ]
    """
    hd_c = Dc // n_head
    hd_t = D // n_head
    scale = 1.0 / math.sqrt(hd_c)
    cdt = kv_scratch.dtype           # compute dtype for MXU operands
    q_off = Dc + D

    # ---- fused input projections (M = rows_t / rows_c, one matmul each) ----
    tok = jnp.dot(xt_ref[...], wt_ref[...], preferred_element_type=jnp.float32)
    kv_scratch[:rows_t, :] = (tok + bt_ref[...]).astype(cdt)

    con = jnp.dot(xc_ref[...], wc_ref[...], preferred_element_type=jnp.float32)
    kv_scratch[rows_t:, :Dc + D] = (con + bc_ref[...]).astype(cdt)

    def softmax(s):
        m = jnp.max(s, axis=-1, keepdims=True)
        e = jnp.exp(s - m)
        return e * pl.reciprocal(jnp.sum(e, axis=-1, keepdims=True), approx=True)

    # contract last dim of both operands (q @ k^T) without explicit transpose
    qk_dims = (((1,), (1,)), ((), ()))

    for h in range(n_head):  # static unroll; n_head is small
        q_h = kv_scratch[:rows_t, q_off + h * hd_c:q_off + (h + 1) * hd_c]
        # combined token + concept keys for this head (shared column offset)
        k_h = kv_scratch[:, h * hd_c:(h + 1) * hd_c]          # (rows_t+rows_c, hd_c)

        s = jax.lax.dot_general(q_h, k_h, qk_dims,
                                preferred_element_type=jnp.float32)
        s = s * scale + bias_ref[...]                          # additive 0/-1e30 bias

        # two independent softmaxes (token->token and token->concept)
        p_tt = softmax(s[:, :rows_t]).astype(cdt)              # (rows_t, rows_t)
        p_tc = softmax(s[:, rows_t:]).astype(cdt)              # (rows_t, rows_c)

        v_t = kv_scratch[:rows_t, Dc + h * hd_t:Dc + (h + 1) * hd_t]
        v_c = kv_scratch[rows_t:, Dc + h * hd_t:Dc + (h + 1) * hd_t]
        y = (jnp.dot(p_tt, v_t, preferred_element_type=jnp.float32) +
             jnp.dot(p_tc, v_c, preferred_element_type=jnp.float32))
        xtnew_scratch[:, h * hd_t:(h + 1) * hd_t] = y.astype(cdt)

    # ---- output projection (t_proj), one matmul + one store per step ----
    out = jnp.dot(xtnew_scratch[...], wp_ref[...],
                  preferred_element_type=jnp.float32) + bp_ref[...]
    out_ref[...] = out.astype(out_ref.dtype)


def _choose_block_batch(B, T, max_rows=256):
    """Largest divisor of B keeping >=2 grid steps (v7x megacore) and a bounded tile."""
    best = 1
    for cand in range(1, B + 1):
        if B % cand != 0 or cand * T > max_rows:
            continue
        if B // cand >= 2 or B == 1:
            best = cand
    return best


def _build_bias(Bt, T, C, npc):
    """Additive attention bias (Bt*T, Bt*T + Bt*C): 0 where allowed, -1e30 elsewhere.

    Block-diagonal across the Bt batched examples; causal for token keys,
    j < i // npc + 1 for concept keys.
    """
    r = jnp.arange(Bt * T)
    b_q, i = r // T, r % T
    ck = jnp.arange(Bt * T)
    b_k, j = ck // T, ck % T
    tt_ok = (b_q[:, None] == b_k[None, :]) & (j[None, :] <= i[:, None])

    cc = jnp.arange(Bt * C)
    b_c, jc = cc // C, cc % C
    tc_ok = (b_q[:, None] == b_c[None, :]) & (jc[None, :] < (i[:, None] // npc + 1))

    ok = jnp.concatenate([tt_ok, tc_ok], axis=1)
    return jnp.where(ok, 0.0, -1e30).astype(jnp.float32)


def minimal_causal_concept_attention(xt, xc, params, *, n_head,
                                     n_tokens_per_concept=N_TOKENS_PER_CONCEPT,
                                     block_batch=None,
                                     compute_dtype=jnp.float32):
    B, T, D = xt.shape
    Bc, C, Dc = xc.shape
    assert B == Bc
    wt, bt, wc, bc, wp, bp = (params[k] for k in ("wt", "bt", "wc", "bc", "wp", "bp"))

    if block_batch is None:
        block_batch = _choose_block_batch(B, T)
    Bt = block_batch
    assert B % Bt == 0, "block_batch must divide the batch size"
    rows_t, rows_c = Bt * T, Bt * C

    # One-time column reorder of the token projection: [Q | K | V] -> [K | V | Q]
    # so token K/V align with concept K/V ([K | V] already) in one KV scratch.
    wt_r = jnp.concatenate([wt[:, Dc:2 * Dc], wt[:, 2 * Dc:], wt[:, :Dc]], axis=1)
    bt_r = jnp.concatenate([bt[:, Dc:2 * Dc], bt[:, 2 * Dc:], bt[:, :Dc]], axis=1)

    bias = _build_bias(Bt, T, C, n_tokens_per_concept)

    # Flatten batch into the matmul M dimension; cast MXU operands.
    xt2 = xt.reshape(B * T, D).astype(compute_dtype)
    xc2 = xc.reshape(B * C, Dc).astype(compute_dtype)
    wt_c = wt_r.astype(compute_dtype)
    wc_c = wc.astype(compute_dtype)
    wp_c = wp.astype(compute_dtype)
    bt_f = bt_r.astype(jnp.float32)
    bc_f = bc.astype(jnp.float32)
    bp_f = bp.astype(jnp.float32)

    kernel = functools.partial(_attention_kernel, rows_t=rows_t, rows_c=rows_c,
                               D=D, Dc=Dc, n_head=n_head)

    # For large T/D on v7x (64 MiB VMEM) the (rows_t, rows_t+rows_c) scores
    # would need flash-style tiling; at these sizes VMEM use is trivial.
    out2 = pl.pallas_call(
        kernel,
        out_shape=jax.ShapeDtypeStruct((B * T, D), xt.dtype),
        grid_spec=pltpu.PrefetchScalarGridSpec(
            num_scalar_prefetch=0,
            grid=(B // Bt,),
            in_specs=[
                pl.BlockSpec((rows_t, D), lambda b: (b, 0)),
                pl.BlockSpec((rows_c, Dc), lambda b: (b, 0)),
                pl.BlockSpec(bias.shape, lambda b: (0, 0)),
                pl.BlockSpec(wt_c.shape, lambda b: (0, 0)),
                pl.BlockSpec(bt_f.shape, lambda b: (0, 0)),
                pl.BlockSpec(wc_c.shape, lambda b: (0, 0)),
                pl.BlockSpec(bc_f.shape, lambda b: (0, 0)),
                pl.BlockSpec(wp_c.shape, lambda b: (0, 0)),
                pl.BlockSpec(bp_f.shape, lambda b: (0, 0)),
            ],
            out_specs=pl.BlockSpec((rows_t, D), lambda b: (b, 0)),
            scratch_shapes=[
                pltpu.VMEM((rows_t + rows_c, Dc + D + Dc), compute_dtype),  # KV(+Q)
                pltpu.VMEM((rows_t, D), compute_dtype),                     # xt_new
            ],
        ),
        compiler_params=pltpu.CompilerParams(dimension_semantics=("parallel",)),
    )(xt2, xc2, bias, wt_c, bt_f, wc_c, bc_f, wp_c, bp_f)

    return out2.reshape(B, T, D), xc  # xc returned unchanged, as in the module


def _reference(xt, xc, params, *, n_head, n_tokens_per_concept):
    """Pure-JAX reference mirroring the PyTorch forward."""
    B, T, D = xt.shape
    _, C, Dc = xc.shape
    hd_c, hd_t = Dc // n_head, D // n_head
    tok = xt @ params["wt"] + params["bt"][0]
    con = xc @ params["wc"] + params["bc"][0]
    qct, kct, vtt = tok[..., :Dc], tok[..., Dc:2 * Dc], tok[..., 2 * Dc:]
    kcc, vtc = con[..., :Dc], con[..., Dc:]

    def heads(x, hd):
        return x.reshape(B, -1, n_head, hd).transpose(0, 2, 1, 3)

    q, kt, vt = heads(qct, hd_c), heads(kct, hd_c), heads(vtt, hd_t)
    kc, vc = heads(kcc, hd_c), heads(vtc, hd_t)
    scale = 1.0 / math.sqrt(hd_c)

    causal = jnp.tril(jnp.ones((T, T), dtype=bool))
    i = jnp.arange(T)[:, None]
    j = jnp.arange(C)[None, :]
    concept = j < (i // n_tokens_per_concept + 1)

    s_tt = jnp.einsum("bhqd,bhkd->bhqk", q, kt) * scale
    s_tt = jnp.where(causal, s_tt, -jnp.inf)
    xtt = jnp.einsum("bhqk,bhkd->bhqd", jax.nn.softmax(s_tt, axis=-1), vt)

    s_tc = jnp.einsum("bhqd,bhcd->bhqc", q, kc) * scale
    s_tc = jnp.where(concept, s_tc, -jnp.inf)
    xtc = jnp.einsum("bhqc,bhcd->bhqd", jax.nn.softmax(s_tc, axis=-1), vc)

    xt_new = (xtt + xtc).transpose(0, 2, 1, 3).reshape(B, T, D)
    return xt_new @ params["wp"] + params["bp"][0], xc


def init_params(key, D, Dc):
    """Deterministic parameter init (shapes from the module's __init__)."""
    ks = jax.random.split(key, 6)

    def lin(kw, kb, fan_in, fan_out):
        bound = 1.0 / math.sqrt(fan_in)
        w = jax.random.uniform(kw, (fan_in, fan_out), jnp.float32, -bound, bound)
        b = jax.random.uniform(kb, (1, fan_out), jnp.float32, -bound, bound)
        return w, b

    wt, bt = lin(ks[0], ks[1], D, D + 2 * Dc)   # general_token_attention
    wc, bc = lin(ks[2], ks[3], Dc, D + Dc)      # general_concept_attention
    wp, bp = lin(ks[4], ks[5], D, D)            # t_proj
    # c_proj exists in __init__ but is never used in forward -> omitted.
    return {"wt": wt, "bt": bt, "wc": wc, "bc": bc, "wp": wp, "bp": bp}


if __name__ == "__main__":
    # config: n_embd=32, concept_embedding_dim=16, n_head=4
    B, T, D = 8, 16, 32
    Dc = 16
    n_head = 4
    C = T // N_TOKENS_PER_CONCEPT  # 8 concepts

    key = jax.random.PRNGKey(0)
    kxt, kxc, kp = jax.random.split(key, 3)
    xt = jax.random.normal(kxt, (B, T, D), jnp.float32)
    xc = jax.random.normal(kxc, (B, C, Dc), jnp.float32)
    params = init_params(kp, D, Dc)

    ref_t, ref_c = _reference(xt, xc, params, n_head=n_head,
                              n_tokens_per_concept=N_TOKENS_PER_CONCEPT)

    # f32 MXU operands (strict check; only approx-reciprocal differs from ref)
    out_t, out_c = minimal_causal_concept_attention(
        xt, xc, params, n_head=n_head, compute_dtype=jnp.float32)
    out_t = jax.block_until_ready(out_t)
    out_c = jax.block_until_ready(out_c)
    assert out_t.shape == (B, T, D) and out_c.shape == (B, C, Dc)
    assert jnp.allclose(out_t, ref_t, atol=5e-3, rtol=5e-3)
    assert jnp.array_equal(out_c, xc)

    # bf16 MXU operands with f32 accumulation (v5e/v6e/v7x MXU peak path)
    out_bf, _ = minimal_causal_concept_attention(
        xt, xc, params, n_head=n_head, compute_dtype=jnp.bfloat16)
    out_bf = jax.block_until_ready(out_bf)
    assert jnp.allclose(out_bf, ref_t, atol=5e-2, rtol=5e-2)

    print("KERNEL_OK")
</pallas_src>

<mosaic_0001>
module attributes {stable_mosaic.version = 11 : i64} {
  func.func @_attention_kernel(%arg0: i32, %arg1: memref<64x32xf32, #tpu.memory_space<vmem>>, %arg2: memref<32x16xf32, #tpu.memory_space<vmem>>, %arg3: memref<64x96xf32, #tpu.memory_space<vmem>>, %arg4: memref<32x64xf32, #tpu.memory_space<vmem>>, %arg5: memref<1x64xf32, #tpu.memory_space<vmem>>, %arg6: memref<16x48xf32, #tpu.memory_space<vmem>>, %arg7: memref<1x48xf32, #tpu.memory_space<vmem>>, %arg8: memref<32x32xf32, #tpu.memory_space<vmem>>, %arg9: memref<1x32xf32, #tpu.memory_space<vmem>>, %arg10: memref<64x32xf32, #tpu.memory_space<vmem>>, %arg11: memref<96x64xf32, #tpu.memory_space<vmem>>, %arg12: memref<64x32xf32, #tpu.memory_space<vmem>>) attributes {dimension_semantics = [#tpu.dimension_semantics<parallel>], iteration_bounds = array<i64: 2>, scalar_prefetch = 0 : i64, scratch_operands = 2 : i64, tpu.core_type = #tpu.core_type<tc>, window_params = [{transform_indices = @transform_0, window_bounds = array<i64: 64, 32>}, {transform_indices = @transform_1, window_bounds = array<i64: 32, 16>}, {pipeline_mode = #tpu.pipeline_mode<synchronous>, transform_indices = @transform_2, window_bounds = array<i64: 64, 96>}, {pipeline_mode = #tpu.pipeline_mode<synchronous>, transform_indices = @transform_3, window_bounds = array<i64: 32, 64>}, {pipeline_mode = #tpu.pipeline_mode<synchronous>, transform_indices = @transform_4, window_bounds = array<i64: 1, 64>}, {pipeline_mode = #tpu.pipeline_mode<synchronous>, transform_indices = @transform_5, window_bounds = array<i64: 16, 48>}, {pipeline_mode = #tpu.pipeline_mode<synchronous>, transform_indices = @transform_6, window_bounds = array<i64: 1, 48>}, {pipeline_mode = #tpu.pipeline_mode<synchronous>, transform_indices = @transform_7, window_bounds = array<i64: 32, 32>}, {pipeline_mode = #tpu.pipeline_mode<synchronous>, transform_indices = @transform_8, window_bounds = array<i64: 1, 32>}, {transform_indices = @transform_9, window_bounds = array<i64: 64, 32>}]} {
    %c0 = arith.constant 0 : index
    %c0_0 = arith.constant 0 : index
    %0 = vector.load %arg1[%c0, %c0_0] : memref<64x32xf32, #tpu.memory_space<vmem>>, vector<64x32xf32>
    %c0_1 = arith.constant 0 : index
    %c0_2 = arith.constant 0 : index
    %1 = vector.load %arg4[%c0_1, %c0_2] : memref<32x64xf32, #tpu.memory_space<vmem>>, vector<32x64xf32>
    %cst = arith.constant dense<0.000000e+00> : vector<64x64xf32>
    %2 = tpu.matmul %0, %1, %cst {dimension_numbers = #tpu.dot_dimension_numbers<[1], [0], [0], [1], [0, 0, 1, 1], [], []>} : vector<64x32xf32>, vector<32x64xf32>, vector<64x64xf32> -> vector<64x64xf32>
    %c0_3 = arith.constant 0 : index
    %c0_4 = arith.constant 0 : index
    %3 = vector.load %arg5[%c0_3, %c0_4] : memref<1x64xf32, #tpu.memory_space<vmem>>, vector<1x64xf32>
    %4 = vector.broadcast %3 : vector<1x64xf32> to vector<64x64xf32>
    %5 = arith.addf %2, %4 : vector<64x64xf32>
    %c0_5 = arith.constant 0 : index
    %c0_6 = arith.constant 0 : index
    %6 = vector.load %arg11[%c0_5, %c0_6] : memref<96x64xf32, #tpu.memory_space<vmem>>, vector<64x64xf32>
    tpu.vector_store %arg11[%c0_5, %c0_6], %5 {strides = array<i32>} : memref<96x64xf32, #tpu.memory_space<vmem>>, vector<64x64xf32>,
    %c0_7 = arith.constant 0 : index
    %c0_8 = arith.constant 0 : index
    %7 = vector.load %arg2[%c0_7, %c0_8] : memref<32x16xf32, #tpu.memory_space<vmem>>, vector<32x16xf32>
    %c0_9 = arith.constant 0 : index
    %c0_10 = arith.constant 0 : index
    %8 = vector.load %arg6[%c0_9, %c0_10] : memref<16x48xf32, #tpu.memory_space<vmem>>, vector<16x48xf32>
    %cst_11 = arith.constant dense<0.000000e+00> : vector<32x48xf32>
    %9 = tpu.matmul %7, %8, %cst_11 {dimension_numbers = #tpu.dot_dimension_numbers<[1], [0], [0], [1], [0, 0, 1, 1], [], []>} : vector<32x16xf32>, vector<16x48xf32>, vector<32x48xf32> -> vector<32x48xf32>
    %c0_12 = arith.constant 0 : index
    %c0_13 = arith.constant 0 : index
    %10 = vector.load %arg7[%c0_12, %c0_13] : memref<1x48xf32, #tpu.memory_space<vmem>>, vector<1x48xf32>
    %11 = vector.broadcast %10 : vector<1x48xf32> to vector<32x48xf32>
    %12 = arith.addf %9, %11 : vector<32x48xf32>
    %c64 = arith.constant 64 : index
    %c0_14 = arith.constant 0 : index
    %13 = vector.load %arg11[%c64, %c0_14] : memref<96x64xf32, #tpu.memory_space<vmem>>, vector<32x48xf32>
    tpu.vector_store %arg11[%c64, %c0_14], %12 {strides = array<i32>} : memref<96x64xf32, #tpu.memory_space<vmem>>, vector<32x48xf32>,
    %c0_15 = arith.constant 0 : index
    %c48 = arith.constant 48 : index
    %14 = vector.load %arg11[%c0_15, %c48] : memref<96x64xf32, #tpu.memory_space<vmem>>, vector<64x4xf32>
    %c0_16 = arith.constant 0 : index
    %c0_17 = arith.constant 0 : index
    %15 = vector.load %arg11[%c0_16, %c0_17] : memref<96x64xf32, #tpu.memory_space<vmem>>, vector<96x4xf32>
    %cst_18 = arith.constant dense<0.000000e+00> : vector<64x96xf32>
    %16 = tpu.matmul %14, %15, %cst_18 {dimension_numbers = #tpu.dot_dimension_numbers<[1], [1], [0], [0], [0, 0, 1, 0], [], []>} : vector<64x4xf32>, vector<96x4xf32>, vector<64x96xf32> -> vector<64x96xf32>
    %cst_19 = arith.constant 5.000000e-01 : f32
    %17 = vector.broadcast %cst_19 : f32 to vector<64x96xf32>
    %18 = arith.mulf %16, %17 : vector<64x96xf32>
    %c0_20 = arith.constant 0 : index
    %c0_21 = arith.constant 0 : index
    %19 = vector.load %arg3[%c0_20, %c0_21] : memref<64x96xf32, #tpu.memory_space<vmem>>, vector<64x96xf32>
    %20 = arith.addf %18, %19 : vector<64x96xf32>
    %21 = vector.extract_strided_slice %20 {offsets = [0, 0], sizes = [64, 64], strides = [1, 1]} : vector<64x96xf32> to vector<64x64xf32>
    %cst_22 = arith.constant dense<0xFF800000> : vector<64xf32>
    %22 = vector.multi_reduction <maximumf>, %21, %cst_22 [1] : vector<64x64xf32> to vector<64xf32>
    %23 = vector.shape_cast %22 : vector<64xf32> to vector<64x1xf32>
    %24 = vector.broadcast %23 : vector<64x1xf32> to vector<64x64xf32>
    %25 = arith.subf %21, %24 : vector<64x64xf32>
    %26 = math.exp %25 : vector<64x64xf32>
    %cst_23 = arith.constant dense<0.000000e+00> : vector<64xf32>
    %27 = vector.multi_reduction <add>, %26, %cst_23 [1] : vector<64x64xf32> to vector<64xf32>
    %28 = vector.shape_cast %27 : vector<64xf32> to vector<64x1xf32>
    %29 = tpu.reciprocal %28 {approx = true} : vector<64x1xf32> -> vector<64x1xf32>
    %30 = vector.broadcast %29 : vector<64x1xf32> to vector<64x64xf32>
    %31 = arith.mulf %26, %30 : vector<64x64xf32>
    %32 = vector.extract_strided_slice %20 {offsets = [0, 64], sizes = [64, 32], strides = [1, 1]} : vector<64x96xf32> to vector<64x32xf32>
    %cst_24 = arith.constant dense<0xFF800000> : vector<64xf32>
    %33 = vector.multi_reduction <maximumf>, %32, %cst_24 [1] : vector<64x32xf32> to vector<64xf32>
    %34 = vector.shape_cast %33 : vector<64xf32> to vector<64x1xf32>
    %35 = vector.broadcast %34 : vector<64x1xf32> to vector<64x32xf32>
    %36 = arith.subf %32, %35 : vector<64x32xf32>
    %37 = math.exp %36 : vector<64x32xf32>
    %cst_25 = arith.constant dense<0.000000e+00> : vector<64xf32>
    %38 = vector.multi_reduction <add>, %37, %cst_25 [1] : vector<64x32xf32> to vector<64xf32>
    %39 = vector.shape_cast %38 : vector<64xf32> to vector<64x1xf32>
    %40 = tpu.reciprocal %39 {approx = true} : vector<64x1xf32> -> vector<64x1xf32>
    %41 = vector.broadcast %40 : vector<64x1xf32> to vector<64x32xf32>
    %42 = arith.mulf %37, %41 : vector<64x32xf32>
    %c0_26 = arith.constant 0 : index
    %c16 = arith.constant 16 : index
    %43 = vector.load %arg11[%c0_26, %c16] : memref<96x64xf32, #tpu.memory_space<vmem>>, vector<64x8xf32>
    %c64_27 = arith.constant 64 : index
    %c16_28 = arith.constant 16 : index
    %44 = vector.load %arg11[%c64_27, %c16_28] : memref<96x64xf32, #tpu.memory_space<vmem>>, vector<32x8xf32>
    %cst_29 = arith.constant dense<0.000000e+00> : vector<64x8xf32>
    %45 = tpu.matmul %31, %43, %cst_29 {dimension_numbers = #tpu.dot_dimension_numbers<[1], [0], [0], [1], [0, 0, 1, 1], [], []>} : vector<64x64xf32>, vector<64x8xf32>, vector<64x8xf32> -> vector<64x8xf32>
    %cst_30 = arith.constant dense<0.000000e+00> : vector<64x8xf32>
    %46 = tpu.matmul %42, %44, %cst_30 {dimension_numbers = #tpu.dot_dimension_numbers<[1], [0], [0], [1], [0, 0, 1, 1], [], []>} : vector<64x32xf32>, vector<32x8xf32>, vector<64x8xf32> -> vector<64x8xf32>
    %47 = arith.addf %45, %46 : vector<64x8xf32>
    %c0_31 = arith.constant 0 : index
    %c0_32 = arith.constant 0 : index
    %48 = vector.load %arg12[%c0_31, %c0_32] : memref<64x32xf32, #tpu.memory_space<vmem>>, vector<64x8xf32>
    tpu.vector_store %arg12[%c0_31, %c0_32], %47 {strides = array<i32>} : memref<64x32xf32, #tpu.memory_space<vmem>>, vector<64x8xf32>,
    %c0_33 = arith.constant 0 : index
    %c52 = arith.constant 52 : index
    %49 = vector.load %arg11[%c0_33, %c52] : memref<96x64xf32, #tpu.memory_space<vmem>>, vector<64x4xf32>
    %c0_34 = arith.constant 0 : index
    %c4 = arith.constant 4 : index
    %50 = vector.load %arg11[%c0_34, %c4] : memref<96x64xf32, #tpu.memory_space<vmem>>, vector<96x4xf32>
    %cst_35 = arith.constant dense<0.000000e+00> : vector<64x96xf32>
    %51 = tpu.matmul %49, %50, %cst_35 {dimension_numbers = #tpu.dot_dimension_numbers<[1], [1], [0], [0], [0, 0, 1, 0], [], []>} : vector<64x4xf32>, vector<96x4xf32>, vector<64x96xf32> -> vector<64x96xf32>
    %cst_36 = arith.constant 5.000000e-01 : f32
    %52 = vector.broadcast %cst_36 : f32 to vector<64x96xf32>
    %53 = arith.mulf %51, %52 : vector<64x96xf32>
    %c0_37 = arith.constant 0 : index
    %c0_38 = arith.constant 0 : index
    %54 = vector.load %arg3[%c0_37, %c0_38] : memref<64x96xf32, #tpu.memory_space<vmem>>, vector<64x96xf32>
    %55 = arith.addf %53, %54 : vector<64x96xf32>
    %56 = vector.extract_strided_slice %55 {offsets = [0, 0], sizes = [64, 64], strides = [1, 1]} : vector<64x96xf32> to vector<64x64xf32>
    %cst_39 = arith.constant dense<0xFF800000> : vector<64xf32>
    %57 = vector.multi_reduction <maximumf>, %56, %cst_39 [1] : vector<64x64xf32> to vector<64xf32>
    %58 = vector.shape_cast %57 : vector<64xf32> to vector<64x1xf32>
    %59 = vector.broadcast %58 : vector<64x1xf32> to vector<64x64xf32>
    %60 = arith.subf %56, %59 : vector<64x64xf32>
    %61 = math.exp %60 : vector<64x64xf32>
    %cst_40 = arith.constant dense<0.000000e+00> : vector<64xf32>
    %62 = vector.multi_reduction <add>, %61, %cst_40 [1] : vector<64x64xf32> to vector<64xf32>
    %63 = vector.shape_cast %62 : vector<64xf32> to vector<64x1xf32>
    %64 = tpu.reciprocal %63 {approx = true} : vector<64x1xf32> -> vector<64x1xf32>
    %65 = vector.broadcast %64 : vector<64x1xf32> to vector<64x64xf32>
    %66 = arith.mulf %61, %65 : vector<64x64xf32>
    %67 = vector.extract_strided_slice %55 {offsets = [0, 64], sizes = [64, 32], strides = [1, 1]} : vector<64x96xf32> to vector<64x32xf32>
    %cst_41 = arith.constant dense<0xFF800000> : vector<64xf32>
    %68 = vector.multi_reduction <maximumf>, %67, %cst_41 [1] : vector<64x32xf32> to vector<64xf32>
    %69 = vector.shape_cast %68 : vector<64xf32> to vector<64x1xf32>
    %70 = vector.broadcast %69 : vector<64x1xf32> to vector<64x32xf32>
    %71 = arith.subf %67, %70 : vector<64x32xf32>
    %72 = math.exp %71 : vector<64x32xf32>
    %cst_42 = arith.constant dense<0.000000e+00> : vector<64xf32>
    %73 = vector.multi_reduction <add>, %72, %cst_42 [1] : vector<64x32xf32> to vector<64xf32>
    %74 = vector.shape_cast %73 : vector<64xf32> to vector<64x1xf32>
    %75 = tpu.reciprocal %74 {approx = true} : vector<64x1xf32> -> vector<64x1xf32>
    %76 = vector.broadcast %75 : vector<64x1xf32> to vector<64x32xf32>
    %77 = arith.mulf %72, %76 : vector<64x32xf32>
    %c0_43 = arith.constant 0 : index
    %c24 = arith.constant 24 : index
    %78 = vector.load %arg11[%c0_43, %c24] : memref<96x64xf32, #tpu.memory_space<vmem>>, vector<64x8xf32>
    %c64_44 = arith.constant 64 : index
    %c24_45 = arith.constant 24 : index
    %79 = vector.load %arg11[%c64_44, %c24_45] : memref<96x64xf32, #tpu.memory_space<vmem>>, vector<32x8xf32>
    %cst_46 = arith.constant dense<0.000000e+00> : vector<64x8xf32>
    %80 = tpu.matmul %66, %78, %cst_46 {dimension_numbers = #tpu.dot_dimension_numbers<[1], [0], [0], [1], [0, 0, 1, 1], [], []>} : vector<64x64xf32>, vector<64x8xf32>, vector<64x8xf32> -> vector<64x8xf32>
    %cst_47 = arith.constant dense<0.000000e+00> : vector<64x8xf32>
    %81 = tpu.matmul %77, %79, %cst_47 {dimension_numbers = #tpu.dot_dimension_numbers<[1], [0], [0], [1], [0, 0, 1, 1], [], []>} : vector<64x32xf32>, vector<32x8xf32>, vector<64x8xf32> -> vector<64x8xf32>
    %82 = arith.addf %80, %81 : vector<64x8xf32>
    %c0_48 = arith.constant 0 : index
    %c8 = arith.constant 8 : index
    %83 = vector.load %arg12[%c0_48, %c8] : memref<64x32xf32, #tpu.memory_space<vmem>>, vector<64x8xf32>
    tpu.vector_store %arg12[%c0_48, %c8], %82 {strides = array<i32>} : memref<64x32xf32, #tpu.memory_space<vmem>>, vector<64x8xf32>,
    %c0_49 = arith.constant 0 : index
    %c56 = arith.constant 56 : index
    %84 = vector.load %arg11[%c0_49, %c56] : memref<96x64xf32, #tpu.memory_space<vmem>>, vector<64x4xf32>
    %c0_50 = arith.constant 0 : index
    %c8_51 = arith.constant 8 : index
    %85 = vector.load %arg11[%c0_50, %c8_51] : memref<96x64xf32, #tpu.memory_space<vmem>>, vector<96x4xf32>
    %cst_52 = arith.constant dense<0.000000e+00> : vector<64x96xf32>
    %86 = tpu.matmul %84, %85, %cst_52 {dimension_numbers = #tpu.dot_dimension_numbers<[1], [1], [0], [0], [0, 0, 1, 0], [], []>} : vector<64x4xf32>, vector<96x4xf32>, vector<64x96xf32> -> vector<64x96xf32>
    %cst_53 = arith.constant 5.000000e-01 : f32
    %87 = vector.broadcast %cst_53 : f32 to vector<64x96xf32>
    %88 = arith.mulf %86, %87 : vector<64x96xf32>
    %c0_54 = arith.constant 0 : index
    %c0_55 = arith.constant 0 : index
    %89 = vector.load %arg3[%c0_54, %c0_55] : memref<64x96xf32, #tpu.memory_space<vmem>>, vector<64x96xf32>
    %90 = arith.addf %88, %89 : vector<64x96xf32>
    %91 = vector.extract_strided_slice %90 {offsets = [0, 0], sizes = [64, 64], strides = [1, 1]} : vector<64x96xf32> to vector<64x64xf32>
    %cst_56 = arith.constant dense<0xFF800000> : vector<64xf32>
    %92 = vector.multi_reduction <maximumf>, %91, %cst_56 [1] : vector<64x64xf32> to vector<64xf32>
    %93 = vector.shape_cast %92 : vector<64xf32> to vector<64x1xf32>
    %94 = vector.broadcast %93 : vector<64x1xf32> to vector<64x64xf32>
    %95 = arith.subf %91, %94 : vector<64x64xf32>
    %96 = math.exp %95 : vector<64x64xf32>
    %cst_57 = arith.constant dense<0.000000e+00> : vector<64xf32>
    %97 = vector.multi_reduction <add>, %96, %cst_57 [1] : vector<64x64xf32> to vector<64xf32>
    %98 = vector.shape_cast %97 : vector<64xf32> to vector<64x1xf32>
    %99 = tpu.reciprocal %98 {approx = true} : vector<64x1xf32> -> vector<64x1xf32>
    %100 = vector.broadcast %99 : vector<64x1xf32> to vector<64x64xf32>
    %101 = arith.mulf %96, %100 : vector<64x64xf32>
    %102 = vector.extract_strided_slice %90 {offsets = [0, 64], sizes = [64, 32], strides = [1, 1]} : vector<64x96xf32> to vector<64x32xf32>
    %cst_58 = arith.constant dense<0xFF800000> : vector<64xf32>
    %103 = vector.multi_reduction <maximumf>, %102, %cst_58 [1] : vector<64x32xf32> to vector<64xf32>
    %104 = vector.shape_cast %103 : vector<64xf32> to vector<64x1xf32>
    %105 = vector.broadcast %104 : vector<64x1xf32> to vector<64x32xf32>
    %106 = arith.subf %102, %105 : vector<64x32xf32>
    %107 = math.exp %106 : vector<64x32xf32>
    %cst_59 = arith.constant dense<0.000000e+00> : vector<64xf32>
    %108 = vector.multi_reduction <add>, %107, %cst_59 [1] : vector<64x32xf32> to vector<64xf32>
    %109 = vector.shape_cast %108 : vector<64xf32> to vector<64x1xf32>
    %110 = tpu.reciprocal %109 {approx = true} : vector<64x1xf32> -> vector<64x1xf32>
    %111 = vector.broadcast %110 : vector<64x1xf32> to vector<64x32xf32>
    %112 = arith.mulf %107, %111 : vector<64x32xf32>
    %c0_60 = arith.constant 0 : index
    %c32 = arith.constant 32 : index
    %113 = vector.load %arg11[%c0_60, %c32] : memref<96x64xf32, #tpu.memory_space<vmem>>, vector<64x8xf32>
    %c64_61 = arith.constant 64 : index
    %c32_62 = arith.constant 32 : index
    %114 = vector.load %arg11[%c64_61, %c32_62] : memref<96x64xf32, #tpu.memory_space<vmem>>, vector<32x8xf32>
    %cst_63 = arith.constant dense<0.000000e+00> : vector<64x8xf32>
    %115 = tpu.matmul %101, %113, %cst_63 {dimension_numbers = #tpu.dot_dimension_numbers<[1], [0], [0], [1], [0, 0, 1, 1], [], []>} : vector<64x64xf32>, vector<64x8xf32>, vector<64x8xf32> -> vector<64x8xf32>
    %cst_64 = arith.constant dense<0.000000e+00> : vector<64x8xf32>
    %116 = tpu.matmul %112, %114, %cst_64 {dimension_numbers = #tpu.dot_dimension_numbers<[1], [0], [0], [1], [0, 0, 1, 1], [], []>} : vector<64x32xf32>, vector<32x8xf32>, vector<64x8xf32> -> vector<64x8xf32>
    %117 = arith.addf %115, %116 : vector<64x8xf32>
    %c0_65 = arith.constant 0 : index
    %c16_66 = arith.constant 16 : index
    %118 = vector.load %arg12[%c0_65, %c16_66] : memref<64x32xf32, #tpu.memory_space<vmem>>, vector<64x8xf32>
    tpu.vector_store %arg12[%c0_65, %c16_66], %117 {strides = array<i32>} : memref<64x32xf32, #tpu.memory_space<vmem>>, vector<64x8xf32>,
    %c0_67 = arith.constant 0 : index
    %c60 = arith.constant 60 : index
    %119 = vector.load %arg11[%c0_67, %c60] : memref<96x64xf32, #tpu.memory_space<vmem>>, vector<64x4xf32>
    %c0_68 = arith.constant 0 : index
    %c12 = arith.constant 12 : index
    %120 = vector.load %arg11[%c0_68, %c12] : memref<96x64xf32, #tpu.memory_space<vmem>>, vector<96x4xf32>
    %cst_69 = arith.constant dense<0.000000e+00> : vector<64x96xf32>
    %121 = tpu.matmul %119, %120, %cst_69 {dimension_numbers = #tpu.dot_dimension_numbers<[1], [1], [0], [0], [0, 0, 1, 0], [], []>} : vector<64x4xf32>, vector<96x4xf32>, vector<64x96xf32> -> vector<64x96xf32>
    %cst_70 = arith.constant 5.000000e-01 : f32
    %122 = vector.broadcast %cst_70 : f32 to vector<64x96xf32>
    %123 = arith.mulf %121, %122 : vector<64x96xf32>
    %c0_71 = arith.constant 0 : index
    %c0_72 = arith.constant 0 : index
    %124 = vector.load %arg3[%c0_71, %c0_72] : memref<64x96xf32, #tpu.memory_space<vmem>>, vector<64x96xf32>
    %125 = arith.addf %123, %124 : vector<64x96xf32>
    %126 = vector.extract_strided_slice %125 {offsets = [0, 0], sizes = [64, 64], strides = [1, 1]} : vector<64x96xf32> to vector<64x64xf32>
    %cst_73 = arith.constant dense<0xFF800000> : vector<64xf32>
    %127 = vector.multi_reduction <maximumf>, %126, %cst_73 [1] : vector<64x64xf32> to vector<64xf32>
    %128 = vector.shape_cast %127 : vector<64xf32> to vector<64x1xf32>
    %129 = vector.broadcast %128 : vector<64x1xf32> to vector<64x64xf32>
    %130 = arith.subf %126, %129 : vector<64x64xf32>
    %131 = math.exp %130 : vector<64x64xf32>
    %cst_74 = arith.constant dense<0.000000e+00> : vector<64xf32>
    %132 = vector.multi_reduction <add>, %131, %cst_74 [1] : vector<64x64xf32> to vector<64xf32>
    %133 = vector.shape_cast %132 : vector<64xf32> to vector<64x1xf32>
    %134 = tpu.reciprocal %133 {approx = true} : vector<64x1xf32> -> vector<64x1xf32>
    %135 = vector.broadcast %134 : vector<64x1xf32> to vector<64x64xf32>
    %136 = arith.mulf %131, %135 : vector<64x64xf32>
    %137 = vector.extract_strided_slice %125 {offsets = [0, 64], sizes = [64, 32], strides = [1, 1]} : vector<64x96xf32> to vector<64x32xf32>
    %cst_75 = arith.constant dense<0xFF800000> : vector<64xf32>
    %138 = vector.multi_reduction <maximumf>, %137, %cst_75 [1] : vector<64x32xf32> to vector<64xf32>
    %139 = vector.shape_cast %138 : vector<64xf32> to vector<64x1xf32>
    %140 = vector.broadcast %139 : vector<64x1xf32> to vector<64x32xf32>
    %141 = arith.subf %137, %140 : vector<64x32xf32>
    %142 = math.exp %141 : vector<64x32xf32>
    %cst_76 = arith.constant dense<0.000000e+00> : vector<64xf32>
    %143 = vector.multi_reduction <add>, %142, %cst_76 [1] : vector<64x32xf32> to vector<64xf32>
    %144 = vector.shape_cast %143 : vector<64xf32> to vector<64x1xf32>
    %145 = tpu.reciprocal %144 {approx = true} : vector<64x1xf32> -> vector<64x1xf32>
    %146 = vector.broadcast %145 : vector<64x1xf32> to vector<64x32xf32>
    %147 = arith.mulf %142, %146 : vector<64x32xf32>
    %c0_77 = arith.constant 0 : index
    %c40 = arith.constant 40 : index
    %148 = vector.load %arg11[%c0_77, %c40] : memref<96x64xf32, #tpu.memory_space<vmem>>, vector<64x8xf32>
    %c64_78 = arith.constant 64 : index
    %c40_79 = arith.constant 40 : index
    %149 = vector.load %arg11[%c64_78, %c40_79] : memref<96x64xf32, #tpu.memory_space<vmem>>, vector<32x8xf32>
    %cst_80 = arith.constant dense<0.000000e+00> : vector<64x8xf32>
    %150 = tpu.matmul %136, %148, %cst_80 {dimension_numbers = #tpu.dot_dimension_numbers<[1], [0], [0], [1], [0, 0, 1, 1], [], []>} : vector<64x64xf32>, vector<64x8xf32>, vector<64x8xf32> -> vector<64x8xf32>
    %cst_81 = arith.constant dense<0.000000e+00> : vector<64x8xf32>
    %151 = tpu.matmul %147, %149, %cst_81 {dimension_numbers = #tpu.dot_dimension_numbers<[1], [0], [0], [1], [0, 0, 1, 1], [], []>} : vector<64x32xf32>, vector<32x8xf32>, vector<64x8xf32> -> vector<64x8xf32>
    %152 = arith.addf %150, %151 : vector<64x8xf32>
    %c0_82 = arith.constant 0 : index
    %c24_83 = arith.constant 24 : index
    %153 = vector.load %arg12[%c0_82, %c24_83] : memref<64x32xf32, #tpu.memory_space<vmem>>, vector<64x8xf32>
    tpu.vector_store %arg12[%c0_82, %c24_83], %152 {strides = array<i32>} : memref<64x32xf32, #tpu.memory_space<vmem>>, vector<64x8xf32>,
    %c0_84 = arith.constant 0 : index
    %c0_85 = arith.constant 0 : index
    %154 = vector.load %arg12[%c0_84, %c0_85] : memref<64x32xf32, #tpu.memory_space<vmem>>, vector<64x32xf32>
    %c0_86 = arith.constant 0 : index
    %c0_87 = arith.constant 0 : index
    %155 = vector.load %arg8[%c0_86, %c0_87] : memref<32x32xf32, #tpu.memory_space<vmem>>, vector<32x32xf32>
    %cst_88 = arith.constant dense<0.000000e+00> : vector<64x32xf32>
    %156 = tpu.matmul %154, %155, %cst_88 {dimension_numbers = #tpu.dot_dimension_numbers<[1], [0], [0], [1], [0, 0, 1, 1], [], []>} : vector<64x32xf32>, vector<32x32xf32>, vector<64x32xf32> -> vector<64x32xf32>
    %c0_89 = arith.constant 0 : index
    %c0_90 = arith.constant 0 : index
    %157 = vector.load %arg9[%c0_89, %c0_90] : memref<1x32xf32, #tpu.memory_space<vmem>>, vector<1x32xf32>
    %158 = vector.broadcast %157 : vector<1x32xf32> to vector<64x32xf32>
    %159 = arith.addf %156, %158 : vector<64x32xf32>
    %c0_91 = arith.constant 0 : index
    %c0_92 = arith.constant 0 : index
    %160 = vector.load %arg10[%c0_91, %c0_92] : memref<64x32xf32, #tpu.memory_space<vmem>>, vector<64x32xf32>
    tpu.vector_store %arg10[%c0_91, %c0_92], %159 {strides = array<i32>} : memref<64x32xf32, #tpu.memory_space<vmem>>, vector<64x32xf32>,
    return
  }
  func.func @transform_0(%arg0: i32) -> (i32, i32) {
    %c0_i32 = arith.constant 0 : i32
    %c0_i32_0 = arith.constant 0 : i32
    return %arg0, %c0_i32 : i32, i32
  }
  func.func @transform_1(%arg0: i32) -> (i32, i32) {
    %c0_i32 = arith.constant 0 : i32
    %c0_i32_0 = arith.constant 0 : i32
    return %arg0, %c0_i32 : i32, i32
  }
  func.func @transform_2(%arg0: i32) -> (i32, i32) {
    %c0_i32 = arith.constant 0 : i32
    %c0_i32_0 = arith.constant 0 : i32
    %c0_i32_1 = arith.constant 0 : i32
    return %c0_i32, %c0_i32_0 : i32, i32
  }
  func.func @transform_3(%arg0: i32) -> (i32, i32) {
    %c0_i32 = arith.constant 0 : i32
    %c0_i32_0 = arith.constant 0 : i32
    %c0_i32_1 = arith.constant 0 : i32
    return %c0_i32, %c0_i32_0 : i32, i32
  }
  func.func @transform_4(%arg0: i32) -> (i32, i32) {
    %c0_i32 = arith.constant 0 : i32
    %c0_i32_0 = arith.constant 0 : i32
    %c0_i32_1 = arith.constant 0 : i32
    return %c0_i32, %c0_i32_0 : i32, i32
  }
  func.func @transform_5(%arg0: i32) -> (i32, i32) {
    %c0_i32 = arith.constant 0 : i32
    %c0_i32_0 = arith.constant 0 : i32
    %c0_i32_1 = arith.constant 0 : i32
    return %c0_i32, %c0_i32_0 : i32, i32
  }
  func.func @transform_6(%arg0: i32) -> (i32, i32) {
    %c0_i32 = arith.constant 0 : i32
    %c0_i32_0 = arith.constant 0 : i32
    %c0_i32_1 = arith.constant 0 : i32
    return %c0_i32, %c0_i32_0 : i32, i32
  }
  func.func @transform_7(%arg0: i32) -> (i32, i32) {
    %c0_i32 = arith.constant 0 : i32
    %c0_i32_0 = arith.constant 0 : i32
    %c0_i32_1 = arith.constant 0 : i32
    return %c0_i32, %c0_i32_0 : i32, i32
  }
  func.func @transform_8(%arg0: i32) -> (i32, i32) {
    %c0_i32 = arith.constant 0 : i32
    %c0_i32_0 = arith.constant 0 : i32
    %c0_i32_1 = arith.constant 0 : i32
    return %c0_i32, %c0_i32_0 : i32, i32
  }
  func.func @transform_9(%arg0: i32) -> (i32, i32) {
    %c0_i32 = arith.constant 0 : i32
    %c0_i32_0 = arith.constant 0 : i32
    return %arg0, %c0_i32 : i32, i32
  }
}

</mosaic_0001>

<bundles_post_ra>
// kernel: tpu_custom_call.1
= control target key start
LH: loop header
LB: loop body
LE: loop exit
PB: predicated region body
PF: predicated region fallthrough
CT: control target
= control target key end

     0   :  { %s3685_s30 = smov 0   ;;  %s5331_s0 = inlined_call_operand.vmem [shape: f32[128,32], index: 0, kind: input, shape index: {}]   ;;  %s5332_s1 = inlined_call_operand.vmem [shape: f32[64,16], index: 1, kind: input, shape index: {}]   ;;  %s5333_s2 = inlined_call_operand.vmem [shape: f32[64,96], index: 2, kind: input, shape index: {}]   ;;  %s5334_s3 = inlined_call_operand.vmem [shape: f32[32,64], index: 3, kind: input, shape index: {}]   ;;  %s5335_s4 = inlined_call_operand.vmem [shape: f32[1,64], index: 4, kind: input, shape index: {}]   ;;  %s5336_s5 = inlined_call_operand.vmem [shape: f32[16,48], index: 5, kind: input, shape index: {}]   ;;  %s5337_s6 = inlined_call_operand.vmem [shape: f32[1,48], index: 6, kind: input, shape index: {}]   ;;  %s5338_s7 = inlined_call_operand.vmem [shape: f32[32,32], index: 7, kind: input, shape index: {}]   ;;  %s5339_s8 = inlined_call_operand.vmem [shape: f32[1,32], index: 8, kind: input, shape index: {}]   ;;  %s5340_s9 = inlined_call_operand.vmem [shape: f32[128,32], index: 9, kind: output, shape index: {}]  }
   0x1 LB: > { %s3009_s10 = sadd.s32 4294967295, %s3618_s30   ;;  %p3013_p0 = scmp.ge.s32.totalorder %s3618_s30, 1  ;;  %s3618_s30 = sphi %s3685_s30, %s19_s30  }
   0x2   : > { %p299_p1 = scmp.lt.s32.totalorder %s3618_s30, 3 }
   0x4   : > { %p300_p2 = pnand %p3013_p0, %p299_p1 }
   0x6   : > { %303 = sbr.rel (%p300_p2) target bundleno = 2473 (0x9a9), region = 56 }
   0xb   : > { %v369_v0 = vld [vmem:[%s5334_s3 + $0x18] sm:$0xff]  ;;  %v368_v1 = vld [vmem:[%s5334_s3 + $0x10] sm:$0xff]  ;;  %s3014_s15 = sshll.u32 %s3009_s10, 3  ;;  %v367_v2 = vld [vmem:[%s5334_s3 + $0x8] sm:$0xff]  ;;  %s3016_s20 = sshll.u32 %s3009_s10, 2  ;;  %vm374_vm0 = vcmask 261120  }
   0xc   : > { %411 = vmatpush.msra.mxu0 %v369_v0  ;;  %3186 = vmatpush.msra.mxu1 %v369_v0  ;;  %p341_p3 = scmp.lt.s32.totalorder %s3014_s15, 15  ;;  %v366_v3 = vld [vmem:[%s5334_s3] sm:$0xff]  ;;  %v454_v4 = vld [vmem:[%s5336_s5 + $0x8] sm:$0xff]  ;;  %p347_p4 = scmp.lt.s32.totalorder %s3016_s20, 7  ;;  %vm459_vm1 = vcmask 130048   ;;  %vm440_vm2 = vcmask 523264  }
   0xd   : > { %v453_v7 = vld [vmem:[%s5336_s5] sm:$0xff]  ;;  %s3620_s16 = smov 80   ;;  %s3621_s17 = smov 124   ;;  %vm501_vm3 = vcmask 392192   ;;  %vm542_vm4 = vcmask 31744   ;;  %vm740_vm5 = vcmask 785920  }
   0xe   : > { %412 = vmatpush.msra.mxu0 %v368_v1  ;;  %3187 = vmatpush.msra.mxu1 %v368_v1  ;;  %s5375_s15 = smov (!%p341_p3, %s3014_s15), 15  ;;  %s5377_s20 = smov (!%p347_p4, %s3016_s20), 7  ;;  %v3341_v18 = vld [vmem:[%s5335_s4] ss:$0 sm:$0xff]  ;;  %vm1043_vm6 = vcmask 64512   ;;  %vm1643_vm7 = vcmask 130112  }
   0xf   : > { %s3015_s21 = sshll.u32 %s5375_s15, 3  ;;  %s3017_s29 = sshll.u32 %s5377_s20, 3  ;;  %v3342_v29 = vld [vmem:[%s5337_s6] ss:$0 sm:$0xff]  ;;  %vm2243_vm8 = vcmask 195712   ;;  %vm2843_vm9 = vcmask 261312  }
  0x10   : > { %413 = vmatpush.msra.mxu0 %v367_v2  ;;  %3188 = vmatpush.msra.mxu1 %v367_v2  ;;  %s3713_s24 = scalar_lea.vmem %s5331_s0, %s3015_s21  ;;  %s350_s12 = scalar_lea.vmem %s5332_s1, %s3017_s29 }
  0x11   : > { %v358_v5 = vld [vmem:[%s3713_s24] sm:$0xff]  ;;  %v364_v6 = vld [vmem:[%s3713_s24 + $0x30] sm:$0xff]  ;;  %v359_v8 = vld [vmem:[%s3713_s24 + $0x8] sm:$0xff]  ;;  %s3622_s20 = smov 76   ;;  %s3623_s22 = smov 120  }
  0x12   : > { %414 = vmatpush.msra.mxu0 %v366_v3  ;;  %3189 = vmatpush.msra.mxu1 %v366_v3  ;;  %v365_v9 = vld [vmem:[%s3713_s24 + $0x38] sm:$0xff]  ;;  %v360_v10 = vld [vmem:[%s3713_s24 + $0x10] sm:$0xff]  ;;  %v449_v11 = vld [vmem:[%s350_s12] sm:$0xff]  ;;  %s3624_s23 = smov 112   ;;  %s3626_s25 = smov 116  }
  0x13   : > { %3020 = vmatmul.msk.f32.vlgmr.msra.gmra.mxu0 %vm374_vm0, %v358_v5  ;;  %3026 = vmatmul.msk.f32.vlgmr.msra.gmra.mxu1 %vm374_vm0, %v364_v6  ;;  %v361_v12 = vld [vmem:[%s3713_s24 + $0x18] sm:$0xff]  ;;  %v450_v13 = vld [vmem:[%s350_s12 + $0x8] sm:$0xff]  ;;  %v362_v14 = vld [vmem:[%s3713_s24 + $0x20] sm:$0xff]  ;;  %s3627_s26 = smov 72   ;;  %s3628_s27 = smov 68  }
  0x14   : > { %486 = vmatpush.msrb.mxu1 %v454_v4  ;;  %v451_v15 = vld [vmem:[%s350_s12 + $0x10] sm:$0xff]  ;;  %v452_v16 = vld [vmem:[%s350_s12 + $0x18] sm:$0xff]  ;;  %v363_v17 = vld [vmem:[%s3713_s24 + $0x28] sm:$0xff]  ;;  %s3625_s24 = smov 104   ;;  %s3629_s29 = smov 64  }
  0x15   : > { %s3634_s10 = smov 24   ;;  %s5305_s28 = scalar_lea.vmem %s5340_s9, %s3015_s21 }
  0x16   : > { %487 = vmatpush.msrb.mxu1 %v453_v7 }
  0x1b   : > { %3021 = vmatmul.msk.f32.gmra.mxu0 %vm374_vm0, %v359_v8  ;;  %3027 = vmatmul.msk.f32.gmra.mxu1 %vm374_vm0, %v365_v9 }
  0x23   : > { %3022 = vmatmul.msk.f32.gmra.mxu0 %vm374_vm0, %v360_v10  ;;  %3028 = vmatmul.msk.f32.vlgmr.msrb.gmra.mxu1 %vm459_vm1, %v449_v11 }
  0x2b   : > { %3023 = vmatmul.msk.f32.gmra.mxu0 %vm374_vm0, %v361_v12  ;;  %3029 = vmatmul.msk.f32.gmra.mxu1 %vm459_vm1, %v450_v13 }
  0x33   : > { %3024 = vmatmul.msk.f32.gmra.mxu0 %vm374_vm0, %v362_v14  ;;  %3030 = vmatmul.msk.f32.gmra.mxu1 %vm459_vm1, %v451_v15 }
  0x3b   : > { %3031 = vmatmul.msk.f32.gmra.mxu1 %vm459_vm1, %v452_v16  ;;  %3025 = vmatmul.msk.f32.gmra.mxu0 %vm374_vm0, %v363_v17 }
  0x90   : > { %v416_v19 = vpop.f32.mrf.mxu0  ;;  %v434_v20 = vpop.f32.mrf.mxu1 }
  0x91   : > { %v417_v21 = vadd.f32 %v3341_v18, %v416_v19  ;;  %v435_v22 = vadd.f32 %v3341_v18, %v434_v20 }
  0x93   : > { %441 = vst.msk [vmem:[#allocation2] sm:$0xff] %vm440_vm2, %v417_v21 }
  0x94   : > { %447 = vst.msk [vmem:[#allocation2 + $0x30] sm:$0xff] %vm440_vm2, %v435_v22 }
  0x98   : > { %v419_v23 = vpop.f32.mrf.mxu0  ;;  %v437_v24 = vpop.f32.mrf.mxu1 }
  0x99   : > { %v420_v25 = vadd.f32 %v3341_v18, %v419_v23  ;;  %v438_v26 = vadd.f32 %v3341_v18, %v437_v24 }
  0x9a   : > { %v3745_v27 = vld [vmem:[#allocation2] sm:$0xff] }
  0x9b   : > { %442 = vst.msk [vmem:[#allocation2 + $0x8] sm:$0xff] %vm440_vm2, %v420_v25  ;;  %v3748_v28 = vld [vmem:[#allocation2 + $0x30] sm:$0xff]  ;;  %526 = vrot.lane.b32.xlu0 %v3745_v27, %s3620_s16 }
  0x9c   : > { %448 = vst.msk [vmem:[#allocation2 + $0x38] sm:$0xff] %vm440_vm2, %v438_v26  ;;  %1104 = vrot.lane.b32.xlu1 %v3748_v28, %s3621_s17 }
  0xa0   : > { %v422_v30 = vpop.f32.mrf.mxu0  ;;  %v489_v31 = vpop.f32.mrf.mxu1 }
  0xa1   : > { %v423_v32 = vadd.f32 %v3341_v18, %v422_v30  ;;  %v490_v33 = vadd.f32 %v3342_v29, %v489_v31 }
  0xa2   : > { %v3773_v43 = vld [vmem:[#allocation2 + $0x8] sm:$0xff] }
  0xa3   : > { %443 = vst.msk [vmem:[#allocation2 + $0x10] sm:$0xff] %vm440_vm2, %v423_v32  ;;  %538 = vrot.lane.b32.xlu0 %v3748_v28, %s3620_s16  ;;  %v3765_v38 = vld [vmem:[#allocation2 + $0x38] sm:$0xff]  ;;  %v3798_v52 = vpack.i.bf16 %v3745_v27, %v3773_v43 }
  0xa4   : > { %502 = vst.msk [vmem:[#allocation2 + $0x40] sm:$0xff] %vm501_vm3, %v490_v33  ;;  %1092 = vrot.lane.b32.xlu1 %v3745_v27, %s3621_s17  ;;  %v3784_v49 = vpack.i.bf16 %v3748_v28, %v3765_v38 }
  0xa5   : > { %5349 = vst [vmem:[#allocation5_spill] sm:$0xff] %v3798_v52 }
  0xa6   : > { %5348 = vst [vmem:[#allocation4_spill] sm:$0xff] %v3784_v49 }
  0xa8   : > { %v425_v34 = vpop.f32.mrf.mxu0  ;;  %v492_v35 = vpop.f32.mrf.mxu1 }
  0xa9   : > { %v426_v36 = vadd.f32 %v3341_v18, %v425_v34  ;;  %v493_v37 = vadd.f32 %v3342_v29, %v492_v35 }
  0xaa   : > { %v3810_v54 = vld [vmem:[#allocation2 + $0x10] sm:$0xff] }
  0xab   : > { %444 = vst.msk [vmem:[#allocation2 + $0x18] sm:$0xff] %vm440_vm2, %v426_v36  ;;  %1072 = vrot.lane.b32.xlu0 %v3745_v27, %s3622_s20  ;;  %v514_v55 = vld [vmem:[#allocation2 + $0x40] sm:$0xff] }
  0xac   : > { %503 = vst.msk [vmem:[#allocation2 + $0x48] sm:$0xff] %vm501_vm3, %v493_v37  ;;  %540 = vrot.lane.b32.xlu1 %v3765_v38, %s3620_s16 }
  0xb0   : > { %v428_v39 = vpop.f32.mrf.mxu0  ;;  %v495_v40 = vpop.f32.mrf.mxu1 }
  0xb1   : > { %v429_v41 = vadd.f32 %v3341_v18, %v428_v39  ;;  %v496_v42 = vadd.f32 %v3342_v29, %v495_v40 }
  0xb2   : > { %v3845_v58 = vld [vmem:[#allocation2 + $0x18] sm:$0xff] }
  0xb3   : > { %445 = vst.msk [vmem:[#allocation2 + $0x20] sm:$0xff] %vm440_vm2, %v429_v41  ;;  %1084 = vrot.lane.b32.xlu0 %v3748_v28, %s3622_s20  ;;  %v3808_v53 = vld [vmem:[#allocation2 + $0x48] sm:$0xff]  ;;  %v3885_v59 = vpack.i.bf16 %v3810_v54, %v3845_v58 }
  0xb4   : > { %504 = vst.msk [vmem:[#allocation2 + $0x50] sm:$0xff] %vm501_vm3, %v496_v42  ;;  %1074 = vrot.lane.b32.xlu1 %v3773_v43, %s3622_s20 }
  0xb5   : > { %5351 = vst [vmem:[#allocation7_spill] sm:$0xff] %v3885_v59 }
  0xb8   : > { %v498_v44 = vpop.f32.mrf.mxu1  ;;  %v431_v45 = vpop.f32.mrf.mxu0 }
  0xb9   : > { %v499_v46 = vadd.f32 %v3342_v29, %v498_v44  ;;  %v432_v47 = vadd.f32 %v3341_v18, %v431_v45 }
  0xba   : > { %v3780_v48 = vld [vmem:[#allocation2 + $0x20] sm:$0xff] }
  0xbb   : > { %505 = vst.msk [vmem:[#allocation2 + $0x58] sm:$0xff] %vm501_vm3, %v499_v46  ;;  %534 = vrot.lane.b32.xlu2 %v3780_v48, %s3620_s16  ;;  %1704 = vrot.lane.b32.xlu0 %v3748_v28, %s3623_s22  ;;  %v516_v50 = vld [vmem:[#allocation2 + $0x50] sm:$0xff] }
  0xbc   : > { %3222 = vrot.lane.b32.xlu1 %v3784_v49, %s3624_s23  ;;  %446 = vst.msk [vmem:[#allocation2 + $0x28] sm:$0xff] %vm440_vm2, %v432_v47  ;;  %v4014_v47 = vld [vmem:[%s5333_s2] sm:$0xff] }
  0xc2   : > { %v3794_v51 = vld [vmem:[#allocation2 + $0x58] sm:$0xff] }
  0xc3   : > { %3032 = vmatpush.xpose.msk.msra.mxu2 %vm542_vm4, %v3794_v51  ;;  %1112 = vrot.lane.b32.xlu2 %v516_v50, %s3621_s17  ;;  %v3820_v56 = vld [vmem:[#allocation2 + $0x28] sm:$0xff] }
  0xc4   : > { %3227 = vrot.lane.b32.xlu1 %v3798_v52, %s3624_s23  ;;  %528 = vrot.lane.b32.xlu0 %v3773_v43, %s3620_s16  ;;  %v3843_v57 = vpack.i.bf16 %v3780_v48, %v3820_v56 }
  0xc6   : > { %5350 = vst [vmem:[#allocation6_spill] sm:$0xff] %v3843_v57 }
  0xc7   : > { %3033 = vmatpush.xpose.msk.msra.mxu2 %vm542_vm4, %v516_v50 }
  0xcb   : > { %3034 = vmatpush.xpose.msk.msra.mxu2 %vm542_vm4, %v3808_v53  ;;  %1712 = vrot.lane.b32.xlu2 %v516_v50, %s3623_s22 }
  0xcc   : > { %530 = vrot.lane.b32.xlu1 %v3810_v54, %s3620_s16  ;;  %1106 = vrot.lane.b32.xlu0 %v3765_v38, %s3621_s17 }
  0xcf   : > { %3035 = vmatpush.xpose.msk.msra.mxu2 %vm542_vm4, %v514_v55 }
  0xd3   : > { %3036 = vmatpush.xpose.msk.msra.mxu2 %vm542_vm4, %v3765_v38  ;;  %536 = vrot.lane.b32.xlu2 %v3820_v56, %s3620_s16 }
  0xd4   : > { %1108 = vrot.lane.b32.xlu1 %v514_v55, %s3621_s17  ;;  %1094 = vrot.lane.b32.xlu0 %v3773_v43, %s3621_s17 }
  0xd7   : > { %3037 = vmatpush.xpose.msk.msra.mxu2 %vm542_vm4, %v3748_v28 }
  0xdb   : > { %3038 = vmatpush.xpose.msk.msra.mxu2 %vm542_vm4, %v3820_v56  ;;  %1082 = vrot.lane.b32.xlu2 %v3820_v56, %s3622_s20 }
  0xdc   : > { %1096 = vrot.lane.b32.xlu1 %v3810_v54, %s3621_s17  ;;  %1086 = vrot.lane.b32.xlu0 %v3765_v38, %s3622_s20 }
  0xdf   : > { %3039 = vmatpush.xpose.msk.msra.mxu2 %vm542_vm4, %v3780_v48 }
  0xe3   : > { %3242 = vrot.lane.b32.xlu2 %v3843_v57, %s3624_s23  ;;  %3040 = vmatpush.xpose.msk.msra.mxu2 %vm542_vm4, %v3845_v58 }
  0xe4   : > { %1708 = vrot.lane.b32.xlu1 %v514_v55, %s3623_s22  ;;  %1706 = vrot.lane.b32.xlu0 %v3765_v38, %s3623_s22 }
  0xe7   : > { %3041 = vmatpush.xpose.msk.msra.mxu2 %vm542_vm4, %v3810_v54 }
  0xeb   : > { %1696 = vrot.lane.b32.xlu2 %v3810_v54, %s3623_s22  ;;  %3042 = vmatpush.xpose.msk.msra.mxu2 %vm542_vm4, %v3773_v43 }
  0xec   : > { %532 = vrot.lane.b32.xlu1 %v3845_v58, %s3620_s16  ;;  %3232 = vrot.lane.b32.xlu0 %v3784_v49, %s3625_s24 }
  0xef   : > { %3043 = vmatpush.xpose.msk.msra.mxu2 %vm542_vm4, %v3745_v27 }
  0xf3   : > { %1694 = vrot.lane.b32.xlu2 %v3773_v43, %s3623_s22 }
  0xf4   : > { %1078 = vrot.lane.b32.xlu1 %v3845_v58, %s3622_s20  ;;  %1076 = vrot.lane.b32.xlu0 %v3810_v54, %s3622_s20 }
  0xfb   : > { %2312 = vrot.lane.b32.xlu2 %v516_v50, %s3626_s25 }
  0xfc   : > { %1100 = vrot.lane.b32.xlu1 %v3780_v48, %s3621_s17  ;;  %1110 = vrot.lane.b32.xlu0 %v3808_v53, %s3621_s17 }
 0x103   : > { %1678 = vrot.lane.b32.xlu2 %v3845_v58, %s3627_s26 }
 0x104   : > { %1114 = vrot.lane.b32.xlu1 %v3794_v51, %s3621_s17  ;;  %1098 = vrot.lane.b32.xlu0 %v3845_v58, %s3621_s17 }
 0x10b   : > { %2308 = vrot.lane.b32.xlu2 %v514_v55, %s3626_s25 }
 0x10c   : > { %1714 = vrot.lane.b32.xlu1 %v3794_v51, %s3623_s22  ;;  %3237 = vrot.lane.b32.xlu0 %v3885_v59, %s3624_s23 }
 0x10d   : > { %v527_v60 = vpop.permute.xlu0 %526 }
 0x10e   : > { %v3892_v61 = vpop.permute.xlu1 %1104  ;;  %3044 = vmatmul.msk.f32.vlgmr.msra.gmra.mxu2 %vm542_vm4, %v527_v60 }
 0x113   : > { %1680 = vrot.lane.b32.xlu2 %v3780_v48, %s3627_s26 }
 0x114   : > { %3252 = vrot.lane.b32.xlu1 %v3885_v59, %s3625_s24  ;;  %1710 = vrot.lane.b32.xlu0 %v3808_v53, %s3623_s22 }
 0x115   : > { %v3901_v62 = vpop.permute.xlu2 %534  ;;  %v3903_v63 = vpop.permute.xlu0 %538 }
 0x116   : > { %v3905_v0 = vpop.permute.xlu1 %1092 }
 0x11b   : > { %2304 = vrot.lane.b32.xlu2 %v3748_v28, %s3626_s25 }
 0x11c   : > { %3257 = vrot.lane.b32.xlu1 %v3798_v52, %s3625_s24  ;;  %1698 = vrot.lane.b32.xlu0 %v3845_v58, %s3623_s22 }
 0x11d   : > { %v3913_v1 = vpop.permute.xlu2 %1112  ;;  %v3915_v2 = vpop.permute.xlu0 %1072 }
 0x11e   : > { %v3917_v3 = vpop.permute.xlu1 %540 }
 0x123   : > { %1684 = vrot.lane.b32.xlu2 %v3748_v28, %s3627_s26 }
 0x124   : > { %2314 = vrot.lane.b32.xlu1 %v3794_v51, %s3626_s25  ;;  %1080 = vrot.lane.b32.xlu0 %v3780_v48, %s3622_s20 }
 0x125   : > { %v3925_v4 = vpop.permute.xlu2 %1712  ;;  %v3927_v5 = vpop.permute.xlu0 %1084 }
 0x126   : > { %v3929_v6 = vpop.permute.xlu1 %1074 }
 0x12b   : > { %2294 = vrot.lane.b32.xlu2 %v3773_v43, %s3626_s25 }
 0x12c   : > { %2310 = vrot.lane.b32.xlu1 %v3808_v53, %s3626_s25  ;;  %1700 = vrot.lane.b32.xlu0 %v3780_v48, %s3623_s22 }
 0x12d   : > { %v537_v7 = vpop.permute.xlu2 %536  ;;  %v3937_v8 = vpop.permute.xlu0 %1704 }
 0x12e   : > { %v3223_v9 = vpop.permute.xlu1 %3222 }
 0x12f   : > { %v3224_v10 = vunpack.i.l.bf16 %v3223_v9  ;;  %v3225_v11 = vunpack.i.h.bf16 %v3223_v9 }
 0x131   : > { %1010 = vmatpush.msra.mxu1 %v3224_v10  ;;  %v4040_v10 = vld [vmem:[%s5333_s2 + $0x8] sm:$0xff] }
 0x133   : > { %1011 = vmatpush.msra.mxu1 %v3225_v11  ;;  %2274 = vrot.lane.b32.xlu2 %v3773_v43, %s3628_s27 }
 0x134   : > { %2300 = vrot.lane.b32.xlu1 %v3780_v48, %s3626_s25  ;;  %1102 = vrot.lane.b32.xlu0 %v3820_v56, %s3621_s17 }
 0x135   : > { %v3945_v12 = vpop.permute.xlu2 %1082 }
 0x136   : > { %v3228_v13 = vpop.permute.xlu1 %3227  ;;  %v529_v14 = vpop.permute.xlu0 %528 }
 0x137   : > { %3045 = vmatmul.msk.f32.gmra.mxu2 %vm542_vm4, %v529_v14  ;;  %v3229_v41 = vunpack.i.l.bf16 %v3228_v13  ;;  %v3230_v42 = vunpack.i.h.bf16 %v3228_v13 }
 0x13c   : > { %2298 = vrot.lane.b32.xlu1 %v3845_v58, %s3626_s25  ;;  %1702 = vrot.lane.b32.xlu0 %v3820_v56, %s3623_s22 }
 0x13d   : > { %v3243_v15 = vpop.permute.xlu2 %3242 }
 0x13e   : > { %v3245_v16 = vunpack.i.h.bf16 %v3243_v15  ;;  %v3244_v17 = vunpack.i.l.bf16 %v3243_v15  ;;  %v531_v18 = vpop.permute.xlu1 %530  ;;  %v1107_v19 = vpop.permute.xlu0 %1106 }
 0x13f   : > { %3046 = vmatmul.msk.f32.gmra.mxu2 %vm542_vm4, %v531_v18 }
 0x140   : > { %1012 = vmatpush.msra.mxu1 %v3244_v17 }
 0x142   : > { %1013 = vmatpush.msra.mxu1 %v3245_v16 }
 0x144   : > { %2296 = vrot.lane.b32.xlu1 %v3810_v54, %s3626_s25  ;;  %3247 = vrot.lane.b32.xlu0 %v3843_v57, %s3625_s24 }
 0x146   : > { %v1109_v20 = vpop.permute.xlu1 %1108  ;;  %v3957_v21 = vpop.permute.xlu0 %1094 }
 0x14c   : > { %1686 = vrot.lane.b32.xlu1 %v3765_v38, %s3627_s26  ;;  %1692 = vrot.lane.b32.xlu0 %v3745_v27, %s3623_s22 }
 0x14e   : > { %v3963_v22 = vpop.permute.xlu1 %1096  ;;  %v3965_v23 = vpop.permute.xlu0 %1086 }
 0x154   : > { %2272 = vrot.lane.b32.xlu1 %v3745_v27, %s3628_s27  ;;  %1672 = vrot.lane.b32.xlu0 %v3745_v27, %s3627_s26 }
 0x156   : > { %v1709_v24 = vpop.permute.xlu1 %1708  ;;  %v1707_v25 = vpop.permute.xlu0 %1706 }
 0x15c   : > { %2276 = vrot.lane.b32.xlu1 %v3810_v54, %s3628_s27  ;;  %1674 = vrot.lane.b32.xlu0 %v3773_v43, %s3627_s26 }
 0x15e   : > { %v533_v26 = vpop.permute.xlu1 %532  ;;  %v3233_v29 = vpop.permute.xlu0 %3232 }
 0x15f   : > { %3047 = vmatmul.msk.f32.gmra.mxu2 %vm542_vm4, %v533_v26  ;;  %v3234_v43 = vunpack.i.l.bf16 %v3233_v29  ;;  %v3235_v45 = vunpack.i.h.bf16 %v3233_v29 }
 0x164   : > { %1676 = vrot.lane.b32.xlu0 %v3810_v54, %s3627_s26 }
 0x166   : > { %v3978_v30 = vpop.permute.xlu1 %1078  ;;  %v3980_v31 = vpop.permute.xlu0 %1076 }
 0x167   : > { %3048 = vmatmul.msk.f32.gmra.mxu2 %vm542_vm4, %v3901_v62 }
 0x16c   : > { %2306 = vrot.lane.b32.xlu0 %v3765_v38, %s3626_s25 }
 0x16e   : > { %v1101_v32 = vpop.permute.xlu1 %1100  ;;  %v1111_v33 = vpop.permute.xlu0 %1110 }
 0x16f   : > { %3049 = vmatmul.msk.f32.gmra.mxu2 %vm542_vm4, %v537_v7 }
 0x174   : > { %1682 = vrot.lane.b32.xlu0 %v3820_v56, %s3627_s26 }
 0x176   : > { %v1115_v34 = vpop.permute.xlu1 %1114  ;;  %v1099_v35 = vpop.permute.xlu0 %1098 }
 0x177   : > { %3050 = vmatmul.msk.f32.gmra.mxu2 %vm542_vm4, %v3903_v63  ;;  %3068 = vmatpush.xpose.msk.msrb.mxu0 %vm542_vm4, %v1115_v34  ;;  %v1697_v63 = vpop.permute.xlu2 %1696 }
 0x17b   : > { %3069 = vmatpush.xpose.msk.msrb.mxu0 %vm542_vm4, %v3913_v1 }
 0x17c   : > { %2302 = vrot.lane.b32.xlu0 %v3820_v56, %s3626_s25 }
 0x17e   : > { %v1715_v36 = vpop.permute.xlu1 %1714  ;;  %v3238_v37 = vpop.permute.xlu0 %3237 }
 0x17f   : > { %v3239_v39 = vunpack.i.l.bf16 %v3238_v37  ;;  %3051 = vmatmul.msk.f32.gmra.mxu2 %vm542_vm4, %v3917_v3  ;;  %3070 = vmatpush.xpose.msk.msrb.mxu0 %vm542_vm4, %v1111_v33  ;;  %v3240_v40 = vunpack.i.h.bf16 %v3238_v37 }
 0x180   : > { %3104 = vmatpush.xpose.msk.msrb.mxu2 %vm542_vm4, %v1715_v36 }
 0x181   : > { %1014 = vmatpush.msra.mxu1 %v3239_v39 }
 0x183   : > { %1015 = vmatpush.msra.mxu1 %v3240_v40  ;;  %3071 = vmatpush.xpose.msk.msrb.mxu0 %vm542_vm4, %v1109_v20 }
 0x184   : > { %3105 = vmatpush.xpose.msk.msrb.mxu2 %vm542_vm4, %v3925_v4  ;;  %2292 = vrot.lane.b32.xlu0 %v3745_v27, %s3626_s25 }
 0x185   : > { %1016 = vmatpush.msra.mxu1 %v3229_v41  ;;  %v4093_v41 = vld [vmem:[%s5333_s2 + $0x18] sm:$0xff] }
 0x186   : > { %v1711_v44 = vpop.permute.xlu0 %1710  ;;  %v3253_v1 = vpop.permute.xlu1 %3252 }
 0x187   : > { %1017 = vmatpush.msra.mxu1 %v3230_v42  ;;  %3072 = vmatpush.xpose.msk.msrb.mxu0 %vm542_vm4, %v1107_v19  ;;  %v3254_v11 = vunpack.i.l.bf16 %v3253_v1  ;;  %v3255_v15 = vunpack.i.h.bf16 %v3253_v1 }
 0x188   : > { %3106 = vmatpush.xpose.msk.msrb.mxu2 %vm542_vm4, %v1711_v44 }
 0x189   : > { %1578 = vmatpush.msrb.mxu1 %v3234_v43 }
 0x18b   : > { %1579 = vmatpush.msrb.mxu1 %v3235_v45  ;;  %3073 = vmatpush.xpose.msk.msrb.mxu0 %vm542_vm4, %v3892_v61 }
 0x18c   : > { %3107 = vmatpush.xpose.msk.msrb.mxu2 %vm542_vm4, %v1709_v24 }
 0x18e   : > { %v1699_v46 = vpop.permute.xlu0 %1698  ;;  %v3258_v14 = vpop.permute.xlu1 %3257 }
 0x18f   : > { %v3259_v18 = vunpack.i.l.bf16 %v3258_v14 }
 0x190   : > { %3108 = vmatpush.xpose.msk.msrb.mxu2 %vm542_vm4, %v1707_v25 }
 0x191   : > { %v604_v27 = vpop.f32.mrf.mxu2 }
 0x192   : > { %v628_v50 = vmul.f32 0.5, %v604_v27 }
 0x194   : > { %v4017_v51 = vadd.f32 %v4014_v47, %v628_v50  ;;  %3109 = vmatpush.xpose.msk.msrb.mxu2 %vm542_vm4, %v3937_v8  ;;  %v1695_v8 = vpop.permute.xlu2 %1694  ;;  %v4112_v50 = vld [vmem:[%s5333_s2 + $0x20] sm:$0xff] }
 0x196   : > { %v4021_v53 = vpop.permute.xlu0 %1080  ;;  %v741_v54 = vsel %vm740_vm5, %v4017_v51, -inf  ;;  %v652_v55 = vsel %vm440_vm2, %v4017_v51, -inf  ;;  %v4073_v33 = vpop.permute.xlu1 %2314 }
 0x197   : > { %742 = vmax.xlane.f32.xlu1 %v741_v54  ;;  %653 = vmax.xlane.f32.xlu2 %v652_v55 }
 0x19e   : > { %v1701_v60 = vpop.permute.xlu0 %1700 }
 0x1a6   : > { %v1103_v61 = vpop.permute.xlu0 %1102 }
 0x1a7   : > { %3074 = vmatpush.xpose.msk.msrb.mxu0 %vm542_vm4, %v1103_v61 }
 0x1ab   : > { %3075 = vmatpush.xpose.msk.msrb.mxu0 %vm542_vm4, %v1101_v32 }
 0x1ae   : > { %v1703_v62 = vpop.permute.xlu0 %1702 }
 0x1af   : > { %3076 = vmatpush.xpose.msk.msrb.mxu0 %vm542_vm4, %v1099_v35  ;;  %3110 = vmatpush.xpose.msk.msrb.mxu2 %vm542_vm4, %v1703_v62  ;;  %v4078_v35 = vpop.permute.xlu1 %2310 }
 0x1b3   : > { %3077 = vmatpush.xpose.msk.msrb.mxu0 %vm542_vm4, %v3963_v22  ;;  %3111 = vmatpush.xpose.msk.msrb.mxu2 %vm542_vm4, %v1701_v60 }
 0x1b6   : > { %v3248_v3 = vpop.permute.xlu0 %3247 }
 0x1b7   : > { %v3249_v4 = vunpack.i.l.bf16 %v3248_v3  ;;  %3078 = vmatpush.xpose.msk.msrb.mxu0 %vm542_vm4, %v3957_v21  ;;  %3112 = vmatpush.xpose.msk.msrb.mxu2 %vm542_vm4, %v1699_v46  ;;  %v3250_v7 = vunpack.i.h.bf16 %v3248_v3  ;;  %v4056_v21 = vld [vmem:[%s5333_s2 + $0x10] sm:$0xff]  ;;  %v4088_v39 = vpop.permute.xlu1 %2300 }
 0x1b9   : > { %1580 = vmatpush.msrb.mxu1 %v3249_v4 }
 0x1ba   : > { %v607_v9 = vpop.f32.mrf.mxu2 }
 0x1bb   : > { %v629_v13 = vmul.f32 0.5, %v607_v9  ;;  %3079 = vmatpush.xpose.msk.msrb.mxu0 %vm542_vm4, %v3905_v0  ;;  %1581 = vmatpush.msrb.mxu1 %v3250_v7  ;;  %v3260_v0 = vunpack.i.h.bf16 %v3258_v14 }
 0x1bc   : > { %3113 = vmatpush.xpose.msk.msrb.mxu2 %vm542_vm4, %v1697_v63  ;;  %v4129_v63 = vld [vmem:[%s5333_s2 + $0x28] sm:$0xff] }
 0x1bd   : > { %v4046_v16 = vadd.f32 %v4040_v10, %v629_v13  ;;  %1582 = vmatpush.msrb.mxu1 %v3254_v11  ;;  %v4146_v11 = vld [vmem:[%s5333_s2 + $0x30] sm:$0xff] }
 0x1be   : > { %3080 = vmatmul.msk.f32.vlgmr.msrb.gmra.mxu0 %vm542_vm4, %v3915_v2  ;;  %v1693_v17 = vpop.permute.xlu0 %1692  ;;  %v4058_v2 = vpop.permute.xlu2 %2312 }
 0x1bf   : > { %1583 = vmatpush.msrb.mxu1 %v3255_v15  ;;  %v655_v19 = vsel %vm440_vm2, %v4046_v16, -inf  ;;  %v744_v26 = vsel %vm740_vm5, %v4046_v16, -inf  ;;  %v4107_v46 = vpop.permute.xlu1 %2298 }
 0x1c0   : > { %3114 = vmatpush.xpose.msk.msrb.mxu2 %vm542_vm4, %v1695_v8  ;;  %656 = vmax.xlane.f32.xlu0 %v655_v19  ;;  %v4159_v19 = vld [vmem:[%s5333_s2 + $0x38] sm:$0xff] }
 0x1c1   : > { %1584 = vmatpush.msrb.mxu1 %v3259_v18 }
 0x1c2   : > { %v610_v20 = vpop.f32.mrf.mxu2 }
 0x1c3   : > { %v630_v22 = vmul.f32 0.5, %v610_v20  ;;  %1585 = vmatpush.msrb.mxu1 %v3260_v0 }
 0x1c4   : > { %3115 = vmatpush.xpose.msk.msrb.mxu2 %vm542_vm4, %v1693_v17 }
 0x1c5   : > { %v4062_v24 = vadd.f32 %v4056_v21, %v630_v22 }
 0x1c6   : > { %3081 = vmatmul.msk.f32.gmra.mxu0 %vm542_vm4, %v3929_v6  ;;  %v1673_v25 = vpop.permute.xlu0 %1672  ;;  %v1679_v34 = vpop.permute.xlu2 %1678 }
 0x1c7   : > { %3116 = vmatmul.msk.f32.vlgmr.msrb.gmra.mxu2 %vm542_vm4, %v1673_v25  ;;  %v747_v29 = vsel %vm740_vm5, %v4062_v24, -inf  ;;  %v658_v32 = vsel %vm440_vm2, %v4062_v24, -inf  ;;  %v4131_v3 = vpop.permute.xlu1 %2296 }
 0x1c8   : > { %745 = vmax.xlane.f32.xlu0 %v744_v26  ;;  %748 = vmax.xlane.f32.xlu2 %v747_v29 }
 0x1c9   : > { %659 = vmax.xlane.f32.xlu1 %v658_v32 }
 0x1ce   : > { %3082 = vmatmul.msk.f32.gmra.mxu0 %vm542_vm4, %v3980_v31  ;;  %v1675_v6 = vpop.permute.xlu0 %1674  ;;  %v4083_v37 = vpop.permute.xlu2 %2308 }
 0x1cf   : > { %3117 = vmatmul.msk.f32.gmra.mxu2 %vm542_vm4, %v1675_v6 }
 0x1d6   : > { %3083 = vmatmul.msk.f32.gmra.mxu0 %vm542_vm4, %v3978_v30  ;;  %v1677_v36 = vpop.permute.xlu0 %1676  ;;  %v1681_v31 = vpop.permute.xlu2 %1680 }
 0x1d7   : > { %3118 = vmatmul.msk.f32.gmra.mxu2 %vm542_vm4, %v1677_v36 }
 0x1de   : > { %3084 = vmatmul.msk.f32.gmra.mxu0 %vm542_vm4, %v4021_v53  ;;  %v4095_v42 = vpop.permute.xlu0 %2306 }
 0x1df   : > { %3119 = vmatmul.msk.f32.gmra.mxu2 %vm542_vm4, %v1679_v34 }
 0x1e2   : > { %v613_v40 = vpop.f32.mrf.mxu2 }
 0x1e3   : > { %v631_v30 = vmul.f32 0.5, %v613_v40 }
 0x1e5   : > { %v4098_v43 = vadd.f32 %v4093_v41, %v631_v30 }
 0x1e6   : > { %3085 = vmatmul.msk.f32.gmra.mxu0 %vm542_vm4, %v3945_v12  ;;  %v4114_v12 = vpop.permute.xlu2 %2304  ;;  %v1683_v55 = vpop.permute.xlu0 %1682 }
 0x1e7   : > { %3120 = vmatmul.msk.f32.gmra.mxu2 %vm542_vm4, %v1681_v31  ;;  %v750_v44 = vsel %vm740_vm5, %v4098_v43, -inf  ;;  %v661_v45 = vsel %vm440_vm2, %v4098_v43, -inf }
 0x1e8   : > { %751 = vmax.xlane.f32.xlu1 %v750_v44  ;;  %662 = vmax.xlane.f32.xlu2 %v661_v45 }
 0x1ea   : > { %v616_v27 = vpop.f32.mrf.mxu2 }
 0x1eb   : > { %v632_v53 = vmul.f32 0.5, %v616_v27 }
 0x1ed   : > { %v4117_v54 = vadd.f32 %v4112_v50, %v632_v53 }
 0x1ee   : > { %3086 = vmatmul.msk.f32.gmra.mxu0 %vm542_vm4, %v3927_v5  ;;  %v1685_v4 = vpop.permute.xlu2 %1684  ;;  %v4168_v26 = vpop.permute.xlu0 %2302 }
 0x1ef   : > { %3121 = vmatmul.msk.f32.gmra.mxu2 %vm542_vm4, %v1683_v55  ;;  %v753_v60 = vsel %vm740_vm5, %v4117_v54, -inf  ;;  %v664_v61 = vsel %vm440_vm2, %v4117_v54, -inf }
 0x1f0   : > { %754 = vmax.xlane.f32.xlu0 %v753_v60  ;;  %665 = vmax.xlane.f32.xlu2 %v664_v61 }
 0x1f2   : > { %v619_v62 = vpop.f32.mrf.mxu2 }
 0x1f3   : > { %v633_v1 = vmul.f32 0.5, %v619_v62 }
 0x1f5   : > { %v4134_v5 = vadd.f32 %v4129_v63, %v633_v1 }
 0x1f6   : > { %3087 = vmatmul.msk.f32.gmra.mxu0 %vm542_vm4, %v3965_v23  ;;  %v1687_v23 = vpop.permute.xlu1 %1686  ;;  %v4170_v29 = vpop.permute.xlu0 %2292 }
 0x1f7   : > { %3122 = vmatmul.msk.f32.gmra.mxu2 %vm542_vm4, %v1685_v4  ;;  %v756_v7 = vsel %vm740_vm5, %v4134_v5, -inf  ;;  %v667_v8 = vsel %vm440_vm2, %v4134_v5, -inf  ;;  %v4172_v32 = vpop.permute.xlu2 %2294 }
 0x1f8   : > { %757 = vmax.xlane.f32.xlu2 %v756_v7  ;;  %668 = vmax.xlane.f32.xlu0 %v667_v8 }
 0x1fa   : > { %v622_v9 = vpop.f32.mrf.mxu2 }
 0x1fb   : > { %v634_v13 = vmul.f32 0.5, %v622_v9 }
 0x1fd   : > { %v4149_v14 = vadd.f32 %v4146_v11, %v634_v13 }
 0x1ff   : > { %3123 = vmatmul.msk.f32.gmra.mxu2 %vm542_vm4, %v1687_v23  ;;  %v759_v15 = vsel %vm740_vm5, %v4149_v14, -inf  ;;  %v670_v17 = vsel %vm440_vm2, %v4149_v14, -inf  ;;  %v4180_v44 = vpop.permute.xlu2 %2274 }
 0x200   : > { %760 = vmax.xlane.f32.xlu1 %v759_v15  ;;  %671 = vmax.xlane.f32.xlu2 %v670_v17  ;;  %v4196_v17 = vpop.permute.xlu1 %2272 }
 0x202   : > { %v625_v18 = vpop.f32.mrf.mxu2 }
 0x203   : > { %v635_v0 = vmul.f32 0.5, %v625_v18 }
 0x205   : > { %v4162_v20 = vadd.f32 %v4159_v19, %v635_v0 }
 0x207   : > { %v762_v22 = vsel %vm740_vm5, %v4162_v20, -inf  ;;  %v673_v25 = vsel %vm440_vm2, %v4162_v20, -inf }
 0x208   : > { %763 = vmax.xlane.f32.xlu0 %v762_v22  ;;  %674 = vmax.xlane.f32.xlu2 %v673_v25 }
 0x20a   : > { %v654_v61 = vpop.xlane.xlu2 %653 }
 0x233   : > { %v657_v6 = vpop.xlane.xlu0 %656 }
 0x234   : > { %v677_v40 = vsub.f32 %v4046_v16, %v657_v6 }
 0x236   : > { %v686_v45 = vmul.f32 1.442695, %v677_v40 }
 0x238   : > { %3344 = vpow2.f32 %v686_v45  ;;  %v676_v45 = vsub.f32 %v4017_v51, %v654_v61 }
 0x23b   : > { %v1173_v34 = vpop.f32.mrf.mxu0  ;;  %v749_v13 = vpop.xlane.xlu2 %748 }
 0x23c   : > { %v1197_v36 = vmul.f32 0.5, %v1173_v34  ;;  %v767_v18 = vsub.f32 %v4062_v24, %v749_v13  ;;  %v746_v34 = vpop.xlane.xlu0 %745 }
 0x23e   : > { %v4175_v31 = vadd.f32 %v1197_v36, %v4014_v47  ;;  %v4187_v4 = vpop.eup %3344  ;;  %v777_v25 = vmul.f32 1.442695, %v767_v18 }
 0x23f   : > { %v703_v9 = vsel %vm440_vm2, %v4187_v4, 0.0 }
 0x240   : > { %v1221_v30 = vsel %vm440_vm2, %v4175_v31, -inf  ;;  %3346 = vpow2.f32 %v777_v25 }
 0x241   : > { %1222 = vmax.xlane.f32.xlu2 %v1221_v30  ;;  %v4207_v30 = vpop.permute.xlu1 %2276 }
 0x243   : > { %v1176_v27 = vpop.f32.mrf.mxu0 }
 0x244   : > { %v1198_v53 = vmul.f32 0.5, %v1176_v27 }
 0x246   : > { %v4183_v55 = vadd.f32 %v1198_v53, %v4040_v10  ;;  %v684_v53 = vmul.f32 1.442695, %v676_v45 }
 0x248   : > { %v1224_v60 = vsel %vm440_vm2, %v4183_v55, -inf  ;;  %3348 = vpow2.f32 %v684_v53 }
 0x249   : > { %1225 = vmax.xlane.f32.xlu0 %v1224_v60  ;;  %v743_v61 = vpop.xlane.xlu1 %742 }
 0x24b   : > { %v1179_v62 = vpop.f32.mrf.mxu0 }
 0x24c   : > { %v1199_v1 = vmul.f32 0.5, %v1179_v62 }
 0x24e   : > { %v4190_v7 = vadd.f32 %v1199_v1, %v4056_v21  ;;  %v4212_v1 = vpop.eup %3346 }
 0x24f   : > { %v4223_v25 = vpop.eup %3348 }
 0x250   : > { %v1227_v8 = vsel %vm440_vm2, %v4190_v7, -inf }
 0x251   : > { %1228 = vmax.xlane.f32.xlu1 %v1227_v8  ;;  %704 = vadd.xlane.f32.xlu0 %v703_v9 }
 0x253   : > { %v1182_v23 = vpop.f32.mrf.mxu0 }
 0x254   : > { %v1200_v15 = vmul.f32 0.5, %v1182_v23 }
 0x256   : > { %v4200_v0 = vadd.f32 %v1200_v15, %v4093_v41  ;;  %v765_v15 = vsub.f32 %v4017_v51, %v743_v61 }
 0x258   : > { %v1230_v22 = vsel %vm440_vm2, %v4200_v0, -inf }
 0x259   : > { %1231 = vmax.xlane.f32.xlu1 %v1230_v22 }
 0x25b   : > { %v1185_v6 = vpop.f32.mrf.mxu0  ;;  %v663_v22 = vpop.xlane.xlu2 %662 }
 0x25c   : > { %v1201_v36 = vmul.f32 0.5, %v1185_v6  ;;  %v773_v6 = vmul.f32 1.442695, %v765_v15 }
 0x25e   : > { %v4205_v40 = vadd.f32 %v1201_v36, %v4112_v50  ;;  %v700_v36 = vsel %vm440_vm2, %v4223_v25, 0.0 }
 0x260   : > { %v1233_v27 = vsel %vm440_vm2, %v4205_v40, -inf }
 0x261   : > { %1234 = vmax.xlane.f32.xlu2 %v1233_v27 }
 0x263   : > { %v1188_v60 = vpop.f32.mrf.mxu0  ;;  %v755_v62 = vpop.xlane.xlu0 %754 }
 0x264   : > { %v1202_v8 = vmul.f32 0.5, %v1188_v60  ;;  %v769_v13 = vsub.f32 %v4117_v54, %v755_v62  ;;  %v666_v51 = vpop.xlane.xlu2 %665 }
 0x265   : > { %801 = vrot.lane.b32.xlu0 %v4212_v1, %s3629_s29 }
 0x266   : > { %v4217_v9 = vadd.f32 %v1202_v8, %v4129_v63  ;;  %v781_v18 = vmul.f32 1.442695, %v769_v13 }
 0x268   : > { %v1236_v23 = vsel %vm440_vm2, %v4217_v9, -inf  ;;  %3350 = vpow2.f32 %v781_v18  ;;  %v660_v18 = vpop.xlane.xlu1 %659 }
 0x269   : > { %1237 = vmax.xlane.f32.xlu1 %v1236_v23  ;;  %3352 = vpow2.f32 %v773_v6 }
 0x26b   : > { %v1191_v23 = vpop.f32.mrf.mxu0 }
 0x26c   : > { %v4238_v60 = vpop.xlane.xlu2 %757  ;;  %v1203_v15 = vmul.f32 0.5, %v1191_v23 }
 0x26d   : > { %2282 = vrot.lane.b32.xlu0 %v3820_v56, %s3628_s27  ;;  %v766_v56 = vsub.f32 %v4046_v16, %v746_v34  ;;  %v4247_v16 = vpop.xlane.xlu0 %668 }
 0x26e   : > { %v4229_v45 = vpop.eup %3350  ;;  %v4254_v6 = vadd.f32 %v1203_v15, %v4146_v11 }
 0x26f   : > { %v4233_v27 = vpop.eup %3352  ;;  %v775_v53 = vmul.f32 1.442695, %v766_v56 }
 0x271   : > { %701 = vadd.xlane.f32.xlu1 %v700_v36  ;;  %3354 = vpow2.f32 %v775_v53 }
 0x273   : > { %v1194_v36 = vpop.f32.mrf.mxu0 }
 0x274   : > { %v672_v8 = vpop.xlane.xlu2 %671  ;;  %v1204_v53 = vmul.f32 0.5, %v1194_v36 }
 0x275   : > { %805 = vrot.lane.b32.xlu0 %v4229_v45, %s3629_s29  ;;  %v682_v13 = vsub.f32 %v4149_v14, %v672_v8 }
 0x276   : > { %v4263_v23 = vadd.f32 %v1204_v53, %v4159_v19  ;;  %v752_v53 = vpop.xlane.xlu1 %751 }
 0x277   : > { %v4240_v62 = vpop.eup %3354  ;;  %v696_v61 = vmul.f32 1.442695, %v682_v13  ;;  %v1239_v13 = vsel %vm440_vm2, %v4254_v6, -inf }
 0x278   : > { %v1242_v52 = vsel %vm440_vm2, %v4263_v23, -inf }
 0x279   : > { %797 = vrot.lane.b32.xlu2 %v4233_v27, %s3629_s29  ;;  %3356 = vpow2.f32 %v696_v61 }
 0x27b   : > { %v764_v8 = vpop.xlane.xlu0 %763 }
 0x27c   : > { %v772_v61 = vsub.f32 %v4162_v20, %v764_v8  ;;  %v680_v8 = vsub.f32 %v4117_v54, %v666_v51 }
 0x27e   : > { %v787_v15 = vmul.f32 1.442695, %v772_v61  ;;  %v761_v59 = vpop.xlane.xlu1 %760 }
 0x27f   : > { %v4251_v34 = vpop.eup %3356 }
 0x280   : > { %v718_v56 = vsel %vm440_vm2, %v4251_v34, 0.0 }
 0x28a   : > { %799 = vrot.lane.b32.xlu1 %v4240_v62, %s3629_s29 }
 0x292   : > { %2280 = vrot.lane.b32.xlu1 %v3780_v48, %s3628_s27  ;;  %v678_v48 = vsub.f32 %v4062_v24, %v660_v18 }
 0x29a   : > { %2286 = vrot.lane.b32.xlu1 %v3765_v38, %s3628_s27  ;;  %v688_v38 = vmul.f32 1.442695, %v678_v48 }
 0x29c   : > { %3358 = vpow2.f32 %v688_v38 }
 0x29d   : > { %3360 = vpow2.f32 %v787_v15  ;;  %v675_v15 = vpop.xlane.xlu2 %674 }
 0x29f   : > { %719 = vadd.xlane.f32.xlu0 %v718_v56  ;;  %v679_v56 = vsub.f32 %v4098_v43, %v663_v22 }
 0x2a1   : > { %v690_v48 = vmul.f32 1.442695, %v679_v56 }
 0x2a2   : > { %1240 = vmax.xlane.f32.xlu2 %v1239_v13  ;;  %v4267_v24 = vpop.eup %3358  ;;  %v692_v13 = vmul.f32 1.442695, %v680_v8  ;;  %v771_v8 = vsub.f32 %v4149_v14, %v761_v59 }
 0x2a3   : > { %v706_v18 = vsel %vm440_vm2, %v4267_v24, 0.0  ;;  %v4271_v36 = vpop.eup %3360  ;;  %3362 = vpow2.f32 %v690_v48 }
 0x2a4   : > { %5352 = vst [vmem:[#allocation8_spill] sm:$0xff] %v4271_v36  ;;  %3364 = vpow2.f32 %v692_v13  ;;  %v785_v49 = vmul.f32 1.442695, %v771_v8 }
 0x2a9   : > { %v4278_v61 = vpop.eup %3362 }
 0x2aa   : > { %1243 = vmax.xlane.f32.xlu2 %v1242_v52  ;;  %v768_v52 = vsub.f32 %v4098_v43, %v752_v53  ;;  %v709_v22 = vsel %vm440_vm2, %v4278_v61, 0.0 }
 0x2ac   : > { %v779_v38 = vmul.f32 1.442695, %v768_v52 }
 0x2ae   : > { %3366 = vpow2.f32 %v779_v38 }
 0x2b2   : > { %707 = vadd.xlane.f32.xlu2 %v706_v18  ;;  %v4282_v18 = vpop.eup %3364 }
 0x2b3   : > { %811 = vrot.lane.b32.xlu0 %v4271_v36, %s3629_s29  ;;  %v712_v51 = vsel %vm440_vm2, %v4282_v18, 0.0 }
 0x2b4   : > { %v1223_v56 = vpop.xlane.xlu2 %1222  ;;  %v4284_v48 = vpop.eup %3366 }
 0x2b5   : > { %v1245_v43 = vsub.f32 %v4175_v31, %v1223_v56 }
 0x2b7   : > { %v1253_v53 = vmul.f32 1.442695, %v1245_v43 }
 0x2b9   : > { %3368 = vpow2.f32 %v1253_v53 }
 0x2ba   : > { %3370 = vpow2.f32 %v785_v49 }
 0x2bc   : > { %v1226_v14 = vpop.xlane.xlu0 %1225 }
 0x2bf   : > { %v4297_v57 = vpop.eup %3368 }
 0x2c0   : > { %v4303_v43 = vpop.eup %3370 }
 0x2c4   : > { %710 = vadd.xlane.f32.xlu1 %v709_v22  ;;  %v1229_v54 = vpop.xlane.xlu1 %1228  ;;  %v770_v22 = vsub.f32 %v4134_v5, %v4238_v60 }
 0x2c6   : > { %v783_v36 = vmul.f32 1.442695, %v770_v22  ;;  %v683_v22 = vsub.f32 %v4162_v20, %v675_v15 }
 0x2ca   : > { %803 = vrot.lane.b32.xlu2 %v4284_v48, %s3629_s29 }
 0x2cc   : > { %713 = vadd.xlane.f32.xlu1 %v712_v51  ;;  %v1232_v52 = vpop.xlane.xlu1 %1231 }
 0x2d2   : > { %2278 = vrot.lane.b32.xlu2 %v3845_v58, %s3628_s27  ;;  %v1269_v58 = vsel %vm440_vm2, %v4297_v57, 0.0 }
 0x2d4   : > { %v1235_v13 = vpop.xlane.xlu2 %1234 }
 0x2d5   : > { %v1249_v38 = vsub.f32 %v4205_v40, %v1235_v13 }
 0x2d7   : > { %v1261_v56 = vmul.f32 1.442695, %v1249_v38 }
 0x2d9   : > { %3372 = vpow2.f32 %v1261_v56 }
 0x2da   : > { %2284 = vrot.lane.b32.xlu2 %v3748_v28, %s3628_s27  ;;  %3374 = vpow2.f32 %v783_v36  ;;  %v705_v36 = vpop.xlane.xlu0 %704  ;;  %s3632_s27 = smov 16  }
 0x2dc   : > { %v1238_v59 = vpop.xlane.xlu1 %1237  ;;  %v4348_v56 = vpop.permute.xlu2 %797 }
 0x2dd   : > { %1270 = vadd.xlane.f32.xlu0 %v1269_v58 }
 0x2df   : > { %v4305_v60 = vpop.eup %3372 }
 0x2e0   : > { %v4309_v51 = vpop.eup %3374  ;;  %v1281_v28 = vsel %vm440_vm2, %v4305_v60, 0.0 }
 0x2e2   : > { %809 = vrot.lane.b32.xlu2 %v4303_v43, %s3629_s29 }
 0x2e4   : > { %v702_v49 = vpop.xlane.xlu1 %701 }
 0x2e5   : > { %3376 = vrcp.f32 %v702_v49  ;;  %807 = vrot.lane.b32.xlu1 %v4309_v51, %s3629_s29  ;;  %1282 = vadd.xlane.f32.xlu0 %v1281_v28 }
 0x2e6   : > { %3378 = vrcp.f32 %v705_v36 }
 0x2eb   : > { %v3377_v53 = vpop.eup %3376 }
 0x2ec   : > { %v732_v8 = vmul.f32 %v3377_v53, %v4223_v25  ;;  %v3379_v13 = vpop.eup %3378  ;;  %v681_v25 = vsub.f32 %v4134_v5, %v4247_v16 }
 0x2ed   : > { %v733_v38 = vmul.f32 %v3379_v13, %v4187_v4  ;;  %v1247_v4 = vsub.f32 %v4190_v7, %v1229_v54  ;;  %v1250_v54 = vsub.f32 %v4217_v9, %v1238_v59 }
 0x2ee   : > { %3060 = vmatmul.msk.f32.vlgmr.msra.gmra.mxu1 %vm440_vm2, %v732_v8 }
 0x2ef   : > { %3140 = vmatpush.xpose.msk.msra.mxu1 %vm542_vm4, %v4073_v33  ;;  %v698_v33 = vmul.f32 1.442695, %v683_v22  ;;  %v1257_v20 = vmul.f32 1.442695, %v1247_v4 }
 0x2f1   : > { %3380 = vpow2.f32 %v698_v33 }
 0x2f3   : > { %3141 = vmatpush.xpose.msk.msra.mxu1 %vm542_vm4, %v4058_v2  ;;  %v694_v2 = vmul.f32 1.442695, %v681_v25 }
 0x2f5   : > { %3382 = vpow2.f32 %v694_v2 }
 0x2f6   : > { %3061 = vmatmul.msk.f32.gmra.mxu1 %vm440_vm2, %v733_v38  ;;  %3384 = vpow2.f32 %v1257_v20 }
 0x2f7   : > { %3142 = vmatpush.xpose.msk.msra.mxu1 %vm542_vm4, %v4078_v35  ;;  %v1246_v35 = vsub.f32 %v4183_v55, %v1226_v14  ;;  %v4336_v15 = vpop.eup %3380  ;;  %v1263_v14 = vmul.f32 1.442695, %v1250_v54 }
 0x2f8   : > { %v721_v5 = vsel %vm440_vm2, %v4336_v15, 0.0 }
 0x2fb   : > { %3143 = vmatpush.xpose.msk.msra.mxu1 %vm542_vm4, %v4083_v37  ;;  %v1255_v37 = vmul.f32 1.442695, %v1246_v35  ;;  %v4343_v16 = vpop.eup %3382 }
 0x2fc   : > { %v4352_v58 = vpop.eup %3384  ;;  %v800_v38 = vpop.permute.xlu1 %799 }
 0x2fd   : > { %3386 = vpow2.f32 %v1255_v37 }
 0x2ff   : > { %3144 = vmatpush.xpose.msk.msra.mxu1 %vm542_vm4, %v4095_v42  ;;  %v1248_v42 = vsub.f32 %v4200_v0, %v1232_v52  ;;  %v1773_v52 = vpop.f32.mrf.mxu2 }
 0x300   : > { %v1797_v54 = vmul.f32 0.5, %v1773_v52  ;;  %v1315_v52 = vsel %vm740_vm5, %v4190_v7, -inf }
 0x303   : > { %3145 = vmatpush.xpose.msk.msra.mxu1 %vm542_vm4, %v4114_v12  ;;  %v1259_v12 = vmul.f32 1.442695, %v1248_v42  ;;  %v4358_v49 = vpop.eup %3386 }
 0x305   : > { %3388 = vpow2.f32 %v1259_v12 }
 0x306   : > { %3390 = vpow2.f32 %v1263_v14 }
 0x307   : > { %3146 = vmatpush.xpose.msk.msra.mxu1 %vm542_vm4, %v4168_v26  ;;  %v715_v26 = vsel %vm440_vm2, %v4343_v16, 0.0  ;;  %v1776_v13 = vpop.f32.mrf.mxu2 }
 0x308   : > { %v1798_v25 = vmul.f32 0.5, %v1776_v13 }
 0x30a   : > { %v4383_v20 = vadd.f32 %v1798_v25, %v4040_v10  ;;  %v1309_v10 = vsel %vm740_vm5, %v4175_v31, -inf  ;;  %v1312_v25 = vsel %vm740_vm5, %v4183_v55, -inf }
 0x30b   : > { %3147 = vmatpush.xpose.msk.msra.mxu1 %vm542_vm4, %v4088_v39  ;;  %722 = vadd.xlane.f32.xlu2 %v721_v5  ;;  %v1275_v39 = vsel %vm440_vm2, %v4352_v58, 0.0  ;;  %v4365_v36 = vpop.eup %3388 }
 0x30c   : > { %v1278_v8 = vsel %vm440_vm2, %v4365_v36, 0.0  ;;  %v1912_v5 = vsel %vm740_vm5, %v4383_v20, -inf }
 0x30f   : > { %3148 = vmatpush.xpose.msk.msra.mxu1 %vm542_vm4, %v4107_v46  ;;  %716 = vadd.xlane.f32.xlu1 %v715_v26  ;;  %v1272_v46 = vsel %vm440_vm2, %v4358_v49, 0.0  ;;  %v1779_v42 = vpop.f32.mrf.mxu2 }
 0x310   : > { %v1799_v14 = vmul.f32 0.5, %v1779_v42 }
 0x313   : > { %3149 = vmatpush.xpose.msk.msra.mxu1 %vm542_vm4, %v4131_v3  ;;  %1276 = vadd.xlane.f32.xlu2 %v1275_v39  ;;  %v4371_v3 = vpop.eup %3390 }
 0x315   : > { %v1241_v59 = vpop.xlane.xlu2 %1240 }
 0x316   : > { %v1251_v28 = vsub.f32 %v4254_v6, %v1241_v59  ;;  %v4396_v59 = vadd.f32 %v1797_v54, %v4014_v47 }
 0x317   : > { %3150 = vmatpush.xpose.msk.msra.mxu1 %vm542_vm4, %v4172_v32  ;;  %1273 = vadd.xlane.f32.xlu1 %v1272_v46  ;;  %v1284_v32 = vsel %vm440_vm2, %v4371_v3, 0.0  ;;  %v4400_v46 = vadd.f32 %v1799_v14, %v4056_v21  ;;  %v821_v21 = vsel %vm374_vm0, %v4348_v56, 0.0 }
 0x318   : > { %v1265_v53 = vmul.f32 1.442695, %v1251_v28  ;;  %v1909_v13 = vsel %vm740_vm5, %v4396_v59, -inf }
 0x319   : > { %v1915_v47 = vsel %vm740_vm5, %v4400_v46, -inf }
 0x31a   : > { %3392 = vpow2.f32 %v1265_v53 }
 0x31b   : > { %3151 = vmatpush.xpose.msk.msra.mxu1 %vm542_vm4, %v4170_v29  ;;  %1279 = vadd.xlane.f32.xlu2 %v1278_v8  ;;  %v4385_v29 = vpop.permute.xlu1 %2280  ;;  %v1782_v8 = vpop.f32.mrf.mxu2 }
 0x31d   : > { %v1244_v22 = vpop.xlane.xlu2 %1243 }
 0x31e   : > { %v1252_v33 = vsub.f32 %v4263_v23, %v1244_v22  ;;  %v1800_v22 = vmul.f32 0.5, %v1782_v8  ;;  %v1324_v8 = vsel %vm740_vm5, %v4217_v9, -inf }
 0x31f   : > { %1285 = vadd.xlane.f32.xlu1 %v1284_v32  ;;  %v1318_v32 = vsel %vm740_vm5, %v4200_v0, -inf }
 0x320   : > { %v4378_v2 = vpop.eup %3392  ;;  %v1267_v4 = vmul.f32 1.442695, %v1252_v33 }
 0x321   : > { %v1287_v35 = vsel %vm440_vm2, %v4378_v2, 0.0 }
 0x322   : > { %3394 = vpow2.f32 %v1267_v4  ;;  %v4418_v4 = vadd.f32 %v1800_v22, %v4093_v41  ;;  %v802_v41 = vpop.permute.xlu0 %801 }
 0x323   : > { %1288 = vadd.xlane.f32.xlu2 %v1287_v35  ;;  %v4404_v53 = vpop.permute.xlu1 %2286  ;;  %v1785_v33 = vpop.f32.mrf.mxu2 }
 0x324   : > { %v1918_v54 = vsel %vm740_vm5, %v4418_v4, -inf }
 0x325   : > { %v708_v37 = vpop.xlane.xlu2 %707 }
 0x326   : > { %3396 = vrcp.f32 %v708_v37  ;;  %v824_v37 = vsel %vm374_vm0, %v800_v38, 0.0 }
 0x327   : > { %1913 = vmax.xlane.f32.xlu1 %v1912_v5  ;;  %v1801_v5 = vmul.f32 0.5, %v1785_v33 }
 0x328   : > { %v4389_v12 = vpop.eup %3394 }
 0x329   : > { %v1290_v26 = vsel %vm440_vm2, %v4389_v12, 0.0  ;;  %v4428_v38 = vadd.f32 %v1801_v5, %v4112_v50  ;;  %v1330_v5 = vsel %vm740_vm5, %v4263_v23, -inf }
 0x32a   : > { %1291 = vadd.xlane.f32.xlu0 %v1290_v26  ;;  %v1321_v26 = vsel %vm740_vm5, %v4205_v40, -inf }
 0x32b   : > { %1310 = vmax.xlane.f32.xlu2 %v1309_v10  ;;  %v1788_v14 = vpop.f32.mrf.mxu2 }
 0x32c   : > { %v3397_v39 = vpop.eup %3396 }
 0x32d   : > { %v734_v28 = vmul.f32 %v3397_v39, %v4267_v24  ;;  %v804_v22 = vpop.permute.xlu2 %803 }
 0x32f   : > { %1316 = vmax.xlane.f32.xlu1 %v1315_v52  ;;  %3062 = vmatmul.msk.f32.gmra.mxu1 %vm440_vm2, %v734_v28  ;;  %v1802_v28 = vmul.f32 0.5, %v1788_v14  ;;  %v1921_v52 = vsel %vm740_vm5, %v4428_v38, -inf }
 0x331   : > { %v4438_v50 = vadd.f32 %v1802_v28, %v4129_v63 }
 0x332   : > { %1910 = vmax.xlane.f32.xlu0 %v1909_v13 }
 0x333   : > { %1916 = vmax.xlane.f32.xlu2 %v1915_v47  ;;  %v1791_v13 = vpop.f32.mrf.mxu2 }
 0x334   : > { %v1803_v47 = vmul.f32 0.5, %v1791_v13 }
 0x337   : > { %v711_v24 = vpop.xlane.xlu1 %710  ;;  %822 = vadd.xlane.f32.xlu1 %v821_v21  ;;  %v1924_v21 = vsel %vm740_vm5, %v4438_v50, -inf }
 0x338   : > { %3398 = vrcp.f32 %v711_v24  ;;  %v4445_v24 = vadd.f32 %v1803_v47, %v4146_v11 }
 0x33a   : > { %1313 = vmax.xlane.f32.xlu0 %v1312_v25  ;;  %v1927_v25 = vsel %vm740_vm5, %v4445_v24, -inf }
 0x33b   : > { %1319 = vmax.xlane.f32.xlu2 %v1318_v32  ;;  %v1794_v63 = vpop.f32.mrf.mxu2  ;;  %v830_v32 = vsel %vm374_vm0, %v804_v22, 0.0 }
 0x33c   : > { %v1804_v33 = vmul.f32 0.5, %v1794_v63 }
 0x33e   : > { %v3399_v35 = vpop.eup %3398 }
 0x33f   : > { %v714_v56 = vpop.xlane.xlu1 %713  ;;  %825 = vadd.xlane.f32.xlu1 %v824_v37  ;;  %v735_v42 = vmul.f32 %v3399_v35, %v4278_v61  ;;  %v827_v61 = vsel %vm374_vm0, %v802_v41, 0.0  ;;  %v4450_v35 = vpop.permute.xlu2 %2278  ;;  %v4453_v37 = vadd.f32 %v1804_v33, %v4159_v19 }
 0x340   : > { %3400 = vrcp.f32 %v714_v56  ;;  %v4455_v56 = vpop.permute.xlu0 %2282 }
 0x341   : > { %3063 = vmatmul.msk.f32.gmra.mxu1 %vm440_vm2, %v735_v42  ;;  %v1930_v11 = vsel %vm740_vm5, %v4453_v37, -inf }
 0x342   : > { %1919 = vmax.xlane.f32.xlu0 %v1918_v54 }
 0x343   : > { %1322 = vmax.xlane.f32.xlu2 %v1321_v26 }
 0x346   : > { %v3401_v10 = vpop.eup %3400 }
 0x347   : > { %828 = vadd.xlane.f32.xlu1 %v827_v61  ;;  %v736_v39 = vmul.f32 %v3401_v10, %v4282_v18  ;;  %v1327_v18 = vsel %vm740_vm5, %v4254_v6, -inf  ;;  %v4459_v42 = vpop.permute.xlu2 %2284 }
 0x348   : > { %v4463_v54 = vpop.permute.xlu0 %805 }
 0x349   : > { %3064 = vmatmul.msk.f32.gmra.mxu1 %vm440_vm2, %v736_v39 }
 0x34a   : > { %1922 = vmax.xlane.f32.xlu0 %v1921_v52 }
 0x34b   : > { %1325 = vmax.xlane.f32.xlu2 %v1324_v8 }
 0x34f   : > { %v4465_v26 = vpop.permute.xlu2 %809 }
 0x350   : > { %v720_v19 = vpop.xlane.xlu0 %719 }
 0x352   : > { %1925 = vmax.xlane.f32.xlu0 %v1924_v21 }
 0x353   : > { %1328 = vmax.xlane.f32.xlu2 %v1327_v18 }
 0x357   : > { %v4467_v41 = vpop.permute.xlu1 %807 }
 0x358   : > { %v4469_v61 = vpop.permute.xlu0 %811 }
 0x35a   : > { %1928 = vmax.xlane.f32.xlu0 %v1927_v25 }
 0x360   : > { %v1271_v13 = vpop.xlane.xlu0 %1270 }
 0x362   : > { %831 = vadd.xlane.f32.xlu0 %v830_v32 }
 0x368   : > { %v1283_v25 = vpop.xlane.xlu0 %1282 }
 0x36a   : > { %1931 = vmax.xlane.f32.xlu0 %v1930_v11 }
 0x372   : > { %1331 = vmax.xlane.f32.xlu0 %v1330_v5 }
 0x37e   : > { %v723_v14 = vpop.xlane.xlu2 %722 }
 0x382   : > { %v717_v10 = vpop.xlane.xlu1 %716 }
 0x383   : > { %3402 = vrcp.f32 %v717_v10 }
 0x384   : > { %3404 = vrcp.f32 %v720_v19 }
 0x385   : > { %3406 = vrcp.f32 %v723_v14 }
 0x386   : > { %v1277_v39 = vpop.xlane.xlu2 %1276  ;;  %3408 = vrcp.f32 %v1271_v13 }
 0x389   : > { %v3403_v28 = vpop.eup %3402 }
 0x38a   : > { %v1274_v52 = vpop.xlane.xlu1 %1273  ;;  %v737_v8 = vmul.f32 %v3403_v28, %v4343_v16  ;;  %v3405_v21 = vpop.eup %3404 }
 0x38b   : > { %v738_v22 = vmul.f32 %v3405_v21, %v4251_v34  ;;  %v3407_v33 = vpop.eup %3406 }
 0x38c   : > { %3065 = vmatmul.msk.f32.gmra.mxu1 %vm440_vm2, %v737_v8  ;;  %v739_v16 = vmul.f32 %v3407_v33, %v4336_v15  ;;  %v3409_v10 = vpop.eup %3408 }
 0x38d   : > { %v1301_v8 = vmul.f32 %v3409_v10, %v4297_v57 }
 0x38e   : > { %v1280_v47 = vpop.xlane.xlu2 %1279 }
 0x392   : > { %v4473_v18 = vpop.xlane.xlu1 %1285 }
 0x394   : > { %3066 = vmatmul.msk.f32.gmra.mxu1 %vm440_vm2, %v738_v22 }
 0x396   : > { %v4477_v63 = vpop.xlane.xlu2 %1288 }
 0x39a   : > { %v1914_v32 = vpop.xlane.xlu1 %1913 }
 0x39b   : > { %v1934_v11 = vsub.f32 %v4383_v20, %v1914_v32 }
 0x39c   : > { %3067 = vmatmul.msk.f32.gmra.mxu1 %vm440_vm2, %v739_v16 }
 0x39d   : > { %v1943_v5 = vmul.f32 1.442695, %v1934_v11  ;;  %v4482_v19 = vpop.xlane.xlu0 %1291 }
 0x39e   : > { %v1311_v14 = vpop.xlane.xlu2 %1310 }
 0x39f   : > { %3410 = vpow2.f32 %v1943_v5  ;;  %v1333_v34 = vsub.f32 %v4175_v31, %v1311_v14 }
 0x3a0   : > { %3412 = vrcp.f32 %v1274_v52 }
 0x3a1   : > { %v1341_v28 = vmul.f32 1.442695, %v1333_v34 }
 0x3a2   : > { %v4500_v10 = vpop.xlane.xlu1 %1316 }
 0x3a3   : > { %3414 = vpow2.f32 %v1341_v28 }
 0x3a4   : > { %3096 = vmatmul.msk.f32.vlgmr.msrb.gmra.mxu1 %vm440_vm2, %v1301_v8  ;;  %3416 = vrcp.f32 %v1277_v39 }
 0x3a5   : > { %v4487_v15 = vpop.eup %3410  ;;  %v1911_v13 = vpop.xlane.xlu0 %1910 }
 0x3a6   : > { %v1933_v21 = vsub.f32 %v4396_v59, %v1911_v13  ;;  %1967 = vrot.lane.b32.xlu0 %v4487_v15, %s3629_s29  ;;  %v1917_v22 = vpop.xlane.xlu2 %1916  ;;  %v3413_v33 = vpop.eup %3412 }
 0x3a7   : > { %v1935_v31 = vsub.f32 %v4400_v46, %v1917_v22  ;;  %v1302_v57 = vmul.f32 %v3413_v33, %v4358_v49 }
 0x3a8   : > { %v1941_v32 = vmul.f32 1.442695, %v1933_v21 }
 0x3a9   : > { %v4492_v16 = vpop.eup %3414  ;;  %v1945_v52 = vmul.f32 1.442695, %v1935_v31 }
 0x3aa   : > { %3418 = vpow2.f32 %v1941_v32  ;;  %1365 = vrot.lane.b32.xlu2 %v4492_v16, %s3629_s29  ;;  %v3417_v14 = vpop.eup %3416 }
 0x3ab   : > { %3420 = vrcp.f32 %v1280_v47  ;;  %v1303_v49 = vmul.f32 %v3417_v14, %v4352_v58  ;;  %v823_v47 = vpop.xlane.xlu1 %822 }
 0x3ac   : > { %3097 = vmatmul.msk.f32.gmra.mxu1 %vm440_vm2, %v1302_v57  ;;  %3422 = vpow2.f32 %v1945_v52  ;;  %v3600_v52 = vld [vmem:[#allocation2 + $0x50] sm:$0xff] }
 0x3ad   : > { %v1314_v11 = vpop.xlane.xlu0 %1313 }
 0x3ae   : > { %v1334_v5 = vsub.f32 %v4183_v55, %v1314_v11  ;;  %v1320_v55 = vpop.xlane.xlu2 %1319 }
 0x3af   : > { %v1336_v22 = vsub.f32 %v4200_v0, %v1320_v55  ;;  %v3602_v0 = vld [vmem:[#allocation2 + $0x48] sm:$0xff] }
 0x3b0   : > { %v4502_v34 = vpop.eup %3418  ;;  %v1343_v39 = vmul.f32 1.442695, %v1334_v5  ;;  %v3603_v5 = vld [vmem:[#allocation2 + $0x40] sm:$0xff] }
 0x3b1   : > { %1965 = vrot.lane.b32.xlu1 %v4502_v34, %s3629_s29  ;;  %v3421_v8 = vpop.eup %3420  ;;  %v1347_v33 = vmul.f32 1.442695, %v1336_v22  ;;  %v4524_v14 = vpack.i.bf16 %v3603_v5, %v3602_v0 }
 0x3b2   : > { %3424 = vpow2.f32 %v1343_v39  ;;  %v4510_v13 = vpop.eup %3422  ;;  %v1304_v58 = vmul.f32 %v3421_v8, %v4365_v36 }
 0x3b3   : > { %3426 = vrcp.f32 %v1283_v25  ;;  %v3601_v25 = vld [vmem:[#allocation2 + $0x58] sm:$0xff] }
 0x3b4   : > { %3098 = vmatmul.msk.f32.gmra.mxu1 %vm440_vm2, %v1303_v49  ;;  %v4522_v11 = vpack.i.bf16 %v3600_v52, %v3601_v25  ;;  %3428 = vrcp.f32 %v4473_v18  ;;  %v826_v49 = vpop.xlane.xlu1 %825 }
 0x3b5   : > { %v4508_v28 = vpop.xlane.xlu0 %1919  ;;  %3430 = vpow2.f32 %v1347_v33 }
 0x3b8   : > { %v4512_v21 = vpop.eup %3424 }
 0x3b9   : > { %1367 = vrot.lane.b32.xlu0 %v4512_v21, %s3629_s29  ;;  %1969 = vrot.lane.b32.xlu1 %v4510_v13, %s3629_s29  ;;  %v3427_v57 = vpop.eup %3426 }
 0x3ba   : > { %v1305_v36 = vmul.f32 %v3427_v57, %v4305_v60  ;;  %v3429_v8 = vpop.eup %3428 }
 0x3bb   : > { %v4533_v55 = vpop.eup %3430 }
 0x3bc   : > { %3099 = vmatmul.msk.f32.gmra.mxu1 %vm440_vm2, %v1304_v58  ;;  %v1306_v58 = vmul.f32 %v3429_v8, %v4371_v3  ;;  %v833_v3 = vsel %vm374_vm0, %v4463_v54, 0.0  ;;  %v4562_v54 = vpop.f32.mrf.mxu1 }
 0x3bd   : > { %v1923_v32 = vpop.xlane.xlu0 %1922 }
 0x3be   : > { %v1937_v31 = vsub.f32 %v4428_v38, %v1923_v32 }
 0x3c0   : > { %v1949_v39 = vmul.f32 1.442695, %v1937_v31 }
 0x3c1   : > { %3267 = vrot.lane.b32.xlu0 %v4524_v14, %s3624_s23  ;;  %3262 = vrot.lane.b32.xlu1 %v4522_v11, %s3624_s23  ;;  %s3630_s23 = smov 96  }
 0x3c2   : > { %3432 = vpow2.f32 %v1949_v39  ;;  %v1323_v39 = vpop.xlane.xlu2 %1322 }
 0x3c3   : > { %3434 = vrcp.f32 %v823_v47 }
 0x3c4   : > { %3100 = vmatmul.msk.f32.gmra.mxu1 %vm440_vm2, %v1305_v36  ;;  %3436 = vrcp.f32 %v826_v49 }
 0x3c5   : > { %v1926_v18 = vpop.xlane.xlu0 %1925  ;;  %3438 = vrcp.f32 %v4477_v63 }
 0x3c6   : > { %v1938_v60 = vsub.f32 %v4438_v50, %v1926_v18  ;;  %3440 = vrcp.f32 %v4482_v19  ;;  %v4568_v19 = vpop.f32.mrf.mxu1 }
 0x3c8   : > { %v4535_v22 = vpop.eup %3432  ;;  %v1951_v32 = vmul.f32 1.442695, %v1938_v60 }
 0x3c9   : > { %1973 = vrot.lane.b32.xlu1 %v4535_v22, %s3629_s29  ;;  %1371 = vrot.lane.b32.xlu0 %v4533_v55, %s3629_s29  ;;  %v3435_v47 = vpop.eup %3434 }
 0x3ca   : > { %v3437_v33 = vpop.eup %3436  ;;  %v853_v63 = vmul.f32 %v3435_v47, %v4233_v27  ;;  %3442 = vpow2.f32 %v1951_v32  ;;  %v836_v27 = vsel %vm374_vm0, %v4467_v41, 0.0  ;;  %v1936_v41 = vsub.f32 %v4418_v4, %v4508_v28 }
 0x3cb   : > { %v3439_v31 = vpop.eup %3438  ;;  %v854_v57 = vmul.f32 %v3437_v33, %v4240_v62 }
 0x3cc   : > { %3101 = vmatmul.msk.f32.gmra.mxu1 %vm440_vm2, %v1306_v58  ;;  %v1307_v52 = vmul.f32 %v3439_v31, %v4378_v2  ;;  %v3441_v25 = vpop.eup %3440  ;;  %v1335_v2 = vsub.f32 %v4190_v7, %v4500_v10  ;;  %v1947_v36 = vmul.f32 1.442695, %v1936_v41  ;;  %v1326_v7 = vpop.xlane.xlu2 %1325 }
 0x3cd   : > { %v1308_v62 = vmul.f32 %v3441_v25, %v4389_v12  ;;  %v1929_v28 = vpop.xlane.xlu0 %1928 }
 0x3ce   : > { %v1345_v5 = vmul.f32 1.442695, %v1335_v2  ;;  %v4574_v12 = vpop.f32.mrf.mxu1 }
 0x3d0   : > { %v4554_v0 = vpop.eup %3442  ;;  %3444 = vpow2.f32 %v1345_v5 }
 0x3d1   : > { %871 = vrot.lane.b32.xlu1 %v854_v57, %s3629_s29  ;;  %869 = vrot.lane.b32.xlu0 %v853_v63, %s3629_s29  ;;  %3446 = vpow2.f32 %v1947_v36  ;;  %v839_v63 = vsel %vm374_vm0, %v4465_v26, 0.0  ;;  %v1337_v36 = vsub.f32 %v4205_v40, %v1323_v39  ;;  %v1338_v40 = vsub.f32 %v4217_v9, %v1326_v7 }
 0x3d3   : > { %834 = vadd.xlane.f32.xlu2 %v833_v3 }
 0x3d4   : > { %3102 = vmatmul.msk.f32.gmra.mxu1 %vm440_vm2, %v1307_v52 }
 0x3d5   : > { %v4597_v60 = vpop.xlane.xlu0 %831 }
 0x3d6   : > { %v4576_v49 = vpop.eup %3444 }
 0x3d7   : > { %v4584_v10 = vpop.eup %3446 }
 0x3d9   : > { %1975 = vrot.lane.b32.xlu1 %v4554_v0, %s3629_s29 }
 0x3db   : > { %837 = vadd.xlane.f32.xlu2 %v836_v27 }
 0x3dc   : > { %3103 = vmatmul.msk.f32.gmra.mxu1 %vm440_vm2, %v1308_v62  ;;  %v1939_v62 = vsub.f32 %v4445_v24, %v1929_v28 }
 0x3dd   : > { %v4603_v47 = vpop.xlane.xlu0 %1931 }
 0x3e4   : > { %3152 = vmatmul.msk.f32.vlgmr.msra.gmra.mxu1 %vm542_vm4, %v4196_v17  ;;  %v4582_v17 = vpop.f32.mrf.mxu1 }
 0x3e5   : > { %v4611_v32 = vpop.xlane.xlu0 %1331 }
 0x3ec   : > { %3153 = vmatmul.msk.f32.gmra.mxu1 %vm542_vm4, %v4180_v44  ;;  %v4588_v44 = vpop.xlane.xlu2 %1328  ;;  %v4592_v8 = vpop.f32.mrf.mxu1 }
 0x3f3   : > { %1369 = vrot.lane.b32.xlu2 %v4576_v49, %s3629_s29 }
 0x3f4   : > { %3154 = vmatmul.msk.f32.gmra.mxu1 %vm542_vm4, %v4207_v30 }
 0x3fb   : > { %1971 = vrot.lane.b32.xlu2 %v4584_v10, %s3629_s29 }
 0x3fc   : > { %3155 = vmatmul.msk.f32.gmra.mxu1 %vm542_vm4, %v4450_v35 }
 0x404   : > { %3156 = vmatmul.msk.f32.gmra.mxu1 %vm542_vm4, %v4385_v29  ;;  %v1366_v18 = vpop.permute.xlu2 %1365  ;;  %v829_v29 = vpop.xlane.xlu1 %828 }
 0x405   : > { %v1389_v30 = vsel %vm374_vm0, %v1366_v18, 0.0  ;;  %3448 = vrcp.f32 %v829_v29  ;;  %v1953_v18 = vmul.f32 1.442695, %v1939_v62 }
 0x406   : > { %1390 = vadd.xlane.f32.xlu1 %v1389_v30 }
 0x407   : > { %3450 = vpow2.f32 %v1953_v18 }
 0x409   : > { %v4599_v58 = vpop.f32.mrf.mxu1 }
 0x40b   : > { %v3449_v5 = vpop.eup %3448 }
 0x40c   : > { %3157 = vmatmul.msk.f32.gmra.mxu1 %vm542_vm4, %v4455_v56 }
 0x40d   : > { %v4639_v39 = vpop.eup %3450 }
 0x411   : > { %v4605_v35 = vpop.f32.mrf.mxu1 }
 0x414   : > { %3158 = vmatmul.msk.f32.gmra.mxu1 %vm542_vm4, %v4459_v42 }
 0x418   : > { %v4617_v57 = vpop.permute.xlu0 %1967 }
 0x419   : > { %v4609_v33 = vpop.f32.mrf.mxu1 }
 0x41c   : > { %3159 = vmatmul.msk.f32.gmra.mxu1 %vm542_vm4, %v4404_v53  ;;  %v842_v53 = vsel %vm374_vm0, %v4469_v61, 0.0  ;;  %v1349_v61 = vmul.f32 1.442695, %v1337_v36 }
 0x41e   : > { %3452 = vpow2.f32 %v1349_v61 }
 0x421   : > { %v4615_v31 = vpop.f32.mrf.mxu1 }
 0x422   : > { %5353 = vst [vmem:[#allocation9_spill] sm:$0xff] %v4615_v31 }
 0x423   : > { %v1966_v56 = vpop.permute.xlu1 %1965 }
 0x424   : > { %v1989_v3 = vsel %vm374_vm0, %v1966_v56, 0.0  ;;  %840 = vadd.xlane.f32.xlu2 %v839_v63  ;;  %v855_v56 = vmul.f32 %v3449_v5, %v4212_v1 }
 0x425   : > { %1990 = vadd.xlane.f32.xlu0 %v1989_v3 }
 0x429   : > { %v4622_v42 = vpop.f32.mrf.mxu1 }
 0x42a   : > { %5354 = vst [vmem:[#allocation10_spill] sm:$0xff] %v4622_v42 }
 0x42b   : > { %v1368_v52 = vpop.permute.xlu0 %1367  ;;  %v4624_v25 = vpop.permute.xlu1 %1969 }
 0x42c   : > { %843 = vadd.xlane.f32.xlu2 %v842_v53  ;;  %v1351_v53 = vmul.f32 1.442695, %v1338_v40  ;;  %v2406_v40 = vld [vmem:[%s5333_s2 + $0x8] sm:$0xff] }
 0x42e   : > { %3454 = vpow2.f32 %v1351_v53 }
 0x431   : > { %v4628_v27 = vpop.f32.mrf.mxu1 }
 0x432   : > { %5355 = vst [vmem:[#allocation11_spill] sm:$0xff] %v4628_v27 }
 0x433   : > { %v3268_v2 = vpop.permute.xlu0 %3267  ;;  %v3263_v26 = vpop.permute.xlu1 %3262 }
 0x434   : > { %v3264_v41 = vunpack.i.l.bf16 %v3263_v26  ;;  %v3265_v30 = vunpack.i.h.bf16 %v3263_v26  ;;  %v3269_v63 = vunpack.i.l.bf16 %v3268_v2  ;;  %v3270_v28 = vunpack.i.h.bf16 %v3268_v2  ;;  %v4647_v26 = vpop.eup %3452 }
 0x435   : > { %v4654_v7 = vpop.eup %3454 }
 0x436   : > { %925 = vmatpush.msra.mxu3 %v3264_v41 }
 0x438   : > { %926 = vmatpush.msra.mxu3 %v3265_v30  ;;  %v2405_v30 = vld [vmem:[%s5333_s2] sm:$0xff] }
 0x439   : > { %v4633_v3 = vpop.f32.mrf.mxu1  ;;  %873 = vrot.lane.b32.xlu0 %v855_v56, %s3629_s29 }
 0x43a   : > { %5356 = vst [vmem:[#allocation12_spill] sm:$0xff] %v4633_v3  ;;  %927 = vmatpush.msra.mxu3 %v3269_v63 }
 0x43b   : > { %v4636_v29 = vpop.permute.xlu0 %1371  ;;  %v4641_v1 = vpop.permute.xlu1 %1973 }
 0x43c   : > { %928 = vmatpush.msra.mxu3 %v3270_v28 }
 0x441   : > { %v4643_v62 = vpop.f32.mrf.mxu1  ;;  %1977 = vrot.lane.b32.xlu0 %v4639_v39, %s3629_s29 }
 0x442   : > { %5357 = vst [vmem:[#allocation13_spill] sm:$0xff] %v4643_v62 }
 0x443   : > { %v870_v5 = vpop.permute.xlu0 %869  ;;  %v872_v2 = vpop.permute.xlu1 %871 }
 0x444   : > { %3052 = vmatmul.msk.f32.vlgmr.msra.gmra.mxu3 %vm374_vm0, %v870_v5  ;;  %1373 = vrot.lane.b32.xlu2 %v4647_v26, %s3629_s29 }
 0x449   : > { %v4652_v9 = vpop.f32.mrf.mxu1 }
 0x44a   : > { %5358 = vst [vmem:[#allocation14_spill] sm:$0xff] %v4652_v9 }
 0x44c   : > { %3053 = vmatmul.msk.f32.gmra.mxu3 %vm374_vm0, %v872_v2  ;;  %1375 = vrot.lane.b32.xlu2 %v4654_v7, %s3629_s29 }
 0x451   : > { %v4659_v41 = vpop.f32.mrf.mxu1 }
 0x452   : > { %5359 = vst [vmem:[#allocation15_spill] sm:$0xff] %v4659_v41 }
 0x459   : > { %v4661_v36 = vpop.f32.mrf.mxu1 }
 0x45a   : > { %5360 = vst [vmem:[#allocation16_spill] sm:$0xff] %v4661_v36 }
 0x461   : > { %v2373_v18 = vpop.f32.mrf.mxu1 }
 0x462   : > { %v2397_v56 = vmul.f32 0.5, %v2373_v18  ;;  %v2407_v18 = vld [vmem:[%s5333_s2 + $0x10] sm:$0xff] }
 0x464   : > { %v4666_v63 = vadd.f32 %v2405_v30, %v2397_v56 }
 0x466   : > { %v2509_v61 = vsel %vm740_vm5, %v4666_v63, -inf }
 0x467   : > { %2510 = vmax.xlane.f32.xlu1 %v2509_v61  ;;  %v1392_v61 = vsel %vm374_vm0, %v1368_v52, 0.0  ;;  %v1339_v52 = vsub.f32 %v4254_v6, %v4588_v44 }
 0x469   : > { %v2376_v28 = vpop.f32.mrf.mxu1  ;;  %v1353_v9 = vmul.f32 1.442695, %v1339_v52 }
 0x46a   : > { %v2398_v53 = vmul.f32 0.5, %v2376_v28 }
 0x46b   : > { %3456 = vpow2.f32 %v1353_v9  ;;  %v1940_v9 = vsub.f32 %v4453_v37, %v4603_v47 }
 0x46c   : > { %v4673_v5 = vadd.f32 %v2406_v40, %v2398_v53  ;;  %v2408_v53 = vld [vmem:[%s5333_s2 + $0x18] sm:$0xff]  ;;  %3458 = vrcp.f32 %v4597_v60 }
 0x46e   : > { %v2512_v2 = vsel %vm740_vm5, %v4673_v5, -inf }
 0x46f   : > { %2513 = vmax.xlane.f32.xlu0 %v2512_v2 }
 0x471   : > { %v2379_v36 = vpop.f32.mrf.mxu1  ;;  %v4710_v52 = vpop.eup %3456 }
 0x472   : > { %v2399_v30 = vmul.f32 0.5, %v2379_v36 }
 0x474   : > { %v4680_v56 = vadd.f32 %v2407_v18, %v2399_v30  ;;  %v2409_v30 = vld [vmem:[%s5333_s2 + $0x20] sm:$0xff] }
 0x475   : > { %1393 = vadd.xlane.f32.xlu2 %v1392_v61 }
 0x476   : > { %v2515_v28 = vsel %vm740_vm5, %v4680_v56, -inf }
 0x477   : > { %2516 = vmax.xlane.f32.xlu1 %v2515_v28 }
 0x479   : > { %v2382_v40 = vpop.f32.mrf.mxu1 }
 0x47a   : > { %v2400_v2 = vmul.f32 0.5, %v2382_v40 }
 0x47c   : > { %v4688_v41 = vadd.f32 %v2408_v53, %v2400_v2  ;;  %v2410_v2 = vld [vmem:[%s5333_s2 + $0x28] sm:$0xff] }
 0x47e   : > { %v2518_v36 = vsel %vm740_vm5, %v4688_v41, -inf }
 0x47f   : > { %2519 = vmax.xlane.f32.xlu0 %v2518_v36  ;;  %v1992_v36 = vsel %vm374_vm0, %v4617_v57, 0.0  ;;  %v1340_v57 = vsub.f32 %v4263_v23, %v4611_v32  ;;  %v835_v32 = vpop.xlane.xlu2 %834 }
 0x481   : > { %v2385_v18 = vpop.f32.mrf.mxu1 }
 0x482   : > { %v2401_v61 = vmul.f32 0.5, %v2385_v18 }
 0x484   : > { %v4697_v28 = vadd.f32 %v2409_v30, %v2401_v61  ;;  %v1955_v30 = vmul.f32 1.442695, %v1940_v9  ;;  %v1355_v61 = vmul.f32 1.442695, %v1340_v57 }
 0x486   : > { %v2521_v40 = vsel %vm740_vm5, %v4697_v28, -inf  ;;  %3460 = vpow2.f32 %v1955_v30 }
 0x487   : > { %2522 = vmax.xlane.f32.xlu0 %v2521_v40  ;;  %v3459_v40 = vpop.eup %3458  ;;  %3462 = vpow2.f32 %v1355_v61 }
 0x488   : > { %3464 = vrcp.f32 %v835_v32 }
 0x489   : > { %v2388_v53 = vpop.f32.mrf.mxu1 }
 0x48a   : > { %v2402_v6 = vmul.f32 0.5, %v2388_v53 }
 0x48c   : > { %v4704_v44 = vadd.f32 %v2410_v2, %v2402_v6  ;;  %v4719_v53 = vpop.eup %3460  ;;  %v856_v6 = vmul.f32 %v3459_v40, %v4284_v48  ;;  %v838_v48 = vpop.xlane.xlu2 %837 }
 0x48d   : > { %v4727_v47 = vpop.eup %3462 }
 0x48e   : > { %v2524_v18 = vsel %vm740_vm5, %v4704_v44, -inf }
 0x48f   : > { %1993 = vadd.xlane.f32.xlu0 %v1992_v36  ;;  %2525 = vmax.xlane.f32.xlu2 %v2524_v18  ;;  %v2411_v18 = vld [vmem:[%s5333_s2 + $0x30] sm:$0xff] }
 0x490   : > { %1377 = vrot.lane.b32.xlu1 %v4710_v52, %s3629_s29 }
 0x491   : > { %v2391_v60 = vpop.f32.mrf.mxu1 }
 0x492   : > { %v2403_v36 = vmul.f32 0.5, %v2391_v60  ;;  %v3465_v60 = vpop.eup %3464 }
 0x494   : > { %v4735_v9 = vadd.f32 %v2411_v18, %v2403_v36  ;;  %v1370_v57 = vpop.permute.xlu2 %1369  ;;  %v1995_v36 = vsel %vm374_vm0, %v4624_v25, 0.0  ;;  %v1398_v25 = vsel %vm374_vm0, %v4636_v29, 0.0 }
 0x496   : > { %v2527_v30 = vsel %vm740_vm5, %v4735_v9, -inf }
 0x498   : > { %v4721_v2 = vpop.xlane.xlu0 %1990 }
 0x4a3   : > { %1979 = vrot.lane.b32.xlu0 %v4719_v53, %s3629_s29 }
 0x4a7   : > { %875 = vrot.lane.b32.xlu2 %v856_v6, %s3629_s29  ;;  %v4740_v6 = vpop.permute.xlu1 %1975 }
 0x4ab   : > { %1379 = vrot.lane.b32.xlu0 %v4727_v47, %s3629_s29  ;;  %v874_v23 = vpop.permute.xlu0 %873 }
 0x4ac   : > { %3054 = vmatmul.msk.f32.gmra.mxu3 %vm374_vm0, %v874_v23  ;;  %v1972_v23 = vpop.permute.xlu2 %1971 }
 0x4af   : > { %v4747_v3 = vpop.xlane.xlu1 %1390 }
 0x4b4   : > { %v841_v32 = vpop.xlane.xlu2 %840 }
 0x4ba   : > { %2528 = vmax.xlane.f32.xlu1 %v2527_v30  ;;  %v857_v30 = vmul.f32 %v3465_v60, %v4229_v45  ;;  %v4755_v45 = vpop.permute.xlu0 %1977 }
 0x4c7   : > { %v930_v61 = vpop.f32.mrf.mxu3 }
 0x4c8   : > { %v1020_v40 = vadd.f32 %v4562_v54, %v930_v61  ;;  %v1395_v54 = vsel %vm374_vm0, %v1370_v57, 0.0 }
 0x4ca   : > { %1044 = vst.msk [vmem:[#allocation3] sm:$0xff] %vm1043_vm6, %v1020_v40 }
 0x4cf   : > { %v933_v18 = vpop.f32.mrf.mxu3 }
 0x4d0   : > { %v1023_v62 = vadd.f32 %v4568_v19, %v933_v18  ;;  %1996 = vadd.xlane.f32.xlu2 %v1995_v36  ;;  %v844_v36 = vpop.xlane.xlu2 %843 }
 0x4d2   : > { %1045 = vst.msk [vmem:[#allocation3 + $0x8] sm:$0xff] %vm1043_vm6, %v1023_v62 }
 0x4d3   : > { %877 = vrot.lane.b32.xlu1 %v857_v30, %s3629_s29 }
 0x4d5   : > { %1396 = vadd.xlane.f32.xlu0 %v1395_v54 }
 0x4d8   : > { %v1374_v57 = vpop.permute.xlu2 %1373 }
 0x4d9   : > { %v1401_v42 = vsel %vm374_vm0, %v1374_v57, 0.0 }
 0x4da   : > { %v2511_v61 = vpop.xlane.xlu1 %2510 }
 0x4db   : > { %v2533_v40 = vsub.f32 %v4666_v63, %v2511_v61  ;;  %v2394_v61 = vpop.f32.mrf.mxu1 }
 0x4dd   : > { %v2541_v19 = vmul.f32 1.442695, %v2533_v40  ;;  %1399 = vadd.xlane.f32.xlu0 %v1398_v25  ;;  %v2404_v25 = vmul.f32 0.5, %v2394_v61 }
 0x4df   : > { %3466 = vpow2.f32 %v2541_v19 }
 0x4e0   : > { %3468 = vrcp.f32 %v838_v48  ;;  %v1376_v40 = vpop.permute.xlu2 %1375  ;;  %v2412_v48 = vld [vmem:[%s5333_s2 + $0x38] sm:$0xff] }
 0x4e1   : > { %v4769_v27 = vadd.f32 %v2412_v48, %v2404_v25 }
 0x4e2   : > { %v2514_v60 = vpop.xlane.xlu0 %2513 }
 0x4e3   : > { %v2534_v18 = vsub.f32 %v4673_v5, %v2514_v60 }
 0x4e5   : > { %v4757_v62 = vpop.eup %3466  ;;  %v2543_v54 = vmul.f32 1.442695, %v2534_v18 }
 0x4e6   : > { %v3469_v30 = vpop.eup %3468 }
 0x4e7   : > { %v858_v29 = vmul.f32 %v3469_v30, %v4309_v51  ;;  %3470 = vpow2.f32 %v2543_v54  ;;  %v2530_v51 = vsel %vm740_vm5, %v4769_v27, -inf  ;;  %v2001_v30 = vsel %vm374_vm0, %v4641_v1, 0.0 }
 0x4e8   : > { %2565 = vrot.lane.b32.xlu2 %v4757_v62, %s3629_s29  ;;  %v4773_v60 = vpop.xlane.xlu2 %1393  ;;  %3472 = vrcp.f32 %v841_v32 }
 0x4ea   : > { %v2517_v61 = vpop.xlane.xlu1 %2516 }
 0x4eb   : > { %v2535_v48 = vsub.f32 %v4680_v56, %v2517_v61 }
 0x4ed   : > { %v4767_v19 = vpop.eup %3470 }
 0x4ee   : > { %v3473_v25 = vpop.eup %3472 }
 0x4ef   : > { %v859_v31 = vmul.f32 %v3473_v25, %v4303_v43 }
 0x4f1   : > { %879 = vrot.lane.b32.xlu0 %v858_v29, %s3629_s29  ;;  %v1998_v29 = vsel %vm374_vm0, %v1972_v23, 0.0  ;;  %v1404_v23 = vsel %vm374_vm0, %v1376_v40, 0.0  ;;  %v2004_v40 = vsel %vm374_vm0, %v4740_v6, 0.0 }
 0x4f2   : > { %v2520_v1 = vpop.xlane.xlu0 %2519 }
 0x4f9   : > { %2567 = vrot.lane.b32.xlu0 %v4767_v19, %s3629_s29 }
 0x4fa   : > { %v2523_v32 = vpop.xlane.xlu0 %2522 }
 0x4fb   : > { %v2537_v6 = vsub.f32 %v4697_v28, %v2523_v32 }
 0x4fd   : > { %2531 = vmax.xlane.f32.xlu1 %v2530_v51  ;;  %v2545_v51 = vmul.f32 1.442695, %v2535_v48 }
 0x4ff   : > { %3474 = vpow2.f32 %v2545_v51 }
 0x500   : > { %3476 = vrcp.f32 %v844_v36 }
 0x501   : > { %3478 = vrcp.f32 %v4721_v2 }
 0x502   : > { %v4777_v18 = vpop.xlane.xlu2 %2525  ;;  %v1994_v57 = vpop.xlane.xlu0 %1993  ;;  %3480 = vrcp.f32 %v4747_v3 }
 0x505   : > { %2002 = vadd.xlane.f32.xlu1 %v2001_v30  ;;  %v4787_v30 = vpop.eup %3474 }
 0x50a   : > { %v876_v54 = vpop.permute.xlu2 %875 }
 0x50b   : > { %3055 = vmatmul.msk.f32.gmra.mxu3 %vm374_vm0, %v876_v54 }
 0x511   : > { %1999 = vadd.xlane.f32.xlu2 %v1998_v29  ;;  %v3477_v29 = vpop.eup %3476 }
 0x515   : > { %v1980_v48 = vpop.permute.xlu0 %1979 }
 0x51d   : > { %v1380_v36 = vpop.permute.xlu0 %1379 }
 0x51e   : > { %881 = vrot.lane.b32.xlu1 %v859_v31, %s3629_s29  ;;  %v1378_v31 = vpop.permute.xlu1 %1377 }
 0x523   : > { %1402 = vadd.xlane.f32.xlu0 %v1401_v42  ;;  %v5361_v42 = vld [vmem:[#allocation8_spill] sm:$0xff] }
 0x524   : > { %v860_v25 = vmul.f32 %v3477_v29, %v5361_v42 }
 0x529   : > { %2569 = vrot.lane.b32.xlu2 %v4787_v30, %s3629_s29 }
 0x52b   : > { %1405 = vadd.xlane.f32.xlu0 %v1404_v23 }
 0x52d   : > { %v4794_v61 = vpop.xlane.xlu1 %2528 }
 0x52f   : > { %v936_v54 = vpop.f32.mrf.mxu3 }
 0x530   : > { %v1026_v43 = vadd.f32 %v4574_v12, %v936_v54  ;;  %v1821_v12 = vsel %vm440_vm2, %v4396_v59, -inf  ;;  %v3479_v54 = vpop.eup %3478 }
 0x531   : > { %v2021_v42 = vmul.f32 %v3479_v54, %v4502_v34  ;;  %v3481_v2 = vpop.eup %3480 }
 0x532   : > { %1046 = vst.msk [vmem:[#allocation3 + $0x10] sm:$0xff] %vm1043_vm6, %v1026_v43  ;;  %v2536_v43 = vsub.f32 %v4688_v41, %v2520_v1  ;;  %v1421_v1 = vmul.f32 %v3481_v2, %v4492_v16 }
 0x53f   : > { %883 = vrot.lane.b32.xlu0 %v860_v25, %s3629_s29  ;;  %v2547_v25 = vmul.f32 1.442695, %v2536_v43  ;;  %v2007_v43 = vsel %vm374_vm0, %v4755_v45, 0.0 }
 0x541   : > { %3482 = vpow2.f32 %v2547_v25 }
 0x545   : > { %v878_v51 = vpop.permute.xlu1 %877 }
 0x546   : > { %3056 = vmatmul.msk.f32.gmra.mxu3 %vm374_vm0, %v878_v51  ;;  %v2549_v51 = vmul.f32 1.442695, %v2537_v6  ;;  %v2538_v6 = vsub.f32 %v4704_v44, %v4777_v18 }
 0x547   : > { %3277 = vrot.lane.b32.xlu0 %v4522_v11, %s3625_s24  ;;  %v4824_v34 = vpop.eup %3482 }
 0x548   : > { %1822 = vmax.xlane.f32.xlu1 %v1821_v12  ;;  %v4807_v23 = vpop.xlane.xlu0 %1396  ;;  %3484 = vpow2.f32 %v2549_v51  ;;  %v1407_v12 = vsel %vm374_vm0, %v1378_v31, 0.0  ;;  %v2421_v31 = vsel %vm440_vm2, %v4666_v63, -inf  ;;  %v2551_v45 = vmul.f32 1.442695, %v2538_v6 }
 0x549   : > { %3486 = vrcp.f32 %v1994_v57 }
 0x54a   : > { %3488 = vpow2.f32 %v2551_v45 }
 0x54b   : > { %3490 = vrcp.f32 %v4773_v60 }
 0x54e   : > { %v4828_v3 = vpop.eup %3484 }
 0x54f   : > { %3282 = vrot.lane.b32.xlu0 %v4524_v14, %s3630_s23 }
 0x550   : > { %v4813_v29 = vpop.xlane.xlu0 %1399 }
 0x552   : > { %2005 = vadd.xlane.f32.xlu2 %v2004_v40 }
 0x557   : > { %3287 = vrot.lane.b32.xlu0 %v4524_v14, %s3625_s24  ;;  %s3631_s24 = smov 88  }
 0x55f   : > { %2037 = vrot.lane.b32.xlu0 %v2021_v42, %s3629_s29  ;;  %v2010_v42 = vsel %vm374_vm0, %v1980_v48, 0.0  ;;  %v1410_v48 = vsel %vm374_vm0, %v1380_v36, 0.0 }
 0x561   : > { %3272 = vrot.lane.b32.xlu1 %v4522_v11, %s3630_s23 }
 0x563   : > { %v880_v14 = vpop.permute.xlu0 %879 }
 0x564   : > { %3057 = vmatmul.msk.f32.gmra.mxu3 %vm374_vm0, %v880_v14  ;;  %v3487_v14 = vpop.eup %3486 }
 0x567   : > { %1437 = vrot.lane.b32.xlu0 %v1421_v1, %s3629_s29  ;;  %v2022_v1 = vmul.f32 %v3487_v14, %v4487_v15 }
 0x56a   : > { %2571 = vrot.lane.b32.xlu2 %v4824_v34, %s3629_s29 }
 0x56b   : > { %v4843_v25 = vpop.permute.xlu0 %2567 }
 0x56f   : > { %2573 = vrot.lane.b32.xlu0 %v4828_v3, %s3629_s29 }
 0x570   : > { %v4832_v11 = vpop.xlane.xlu1 %2531 }
 0x578   : > { %v4834_v32 = vpop.xlane.xlu1 %2002 }
 0x58b   : > { %1408 = vadd.xlane.f32.xlu1 %v1407_v12  ;;  %v4857_v12 = vpop.eup %3488 }
 0x58c   : > { %v3491_v57 = vpop.eup %3490 }
 0x58e   : > { %v939_v16 = vpop.f32.mrf.mxu3 }
 0x58f   : > { %v1029_v40 = vadd.f32 %v4582_v17, %v939_v16  ;;  %v1824_v17 = vsel %vm440_vm2, %v4383_v20, -inf  ;;  %v1422_v16 = vmul.f32 %v3491_v57, %v4512_v21 }
 0x590   : > { %v882_v54 = vpop.permute.xlu1 %881 }
 0x591   : > { %3058 = vmatmul.msk.f32.gmra.mxu3 %vm374_vm0, %v882_v54  ;;  %1047 = vst.msk [vmem:[#allocation3 + $0x18] sm:$0xff] %vm1043_vm6, %v1029_v40 }
 0x593   : > { %2008 = vadd.xlane.f32.xlu2 %v2007_v43  ;;  %2011 = vadd.xlane.f32.xlu1 %v2010_v42  ;;  %v1997_v43 = vpop.xlane.xlu2 %1996 }
 0x596   : > { %v4851_v2 = vpop.xlane.xlu0 %1402 }
 0x599   : > { %2422 = vmax.xlane.f32.xlu0 %v2421_v31 }
 0x59b   : > { %1825 = vmax.xlane.f32.xlu2 %v1824_v17 }
 0x59e   : > { %v4854_v51 = vpop.xlane.xlu0 %1405 }
 0x5a3   : > { %1411 = vadd.xlane.f32.xlu2 %v1410_v48  ;;  %v2566_v48 = vpop.permute.xlu2 %2565 }
 0x5ac   : > { %2039 = vrot.lane.b32.xlu1 %v2022_v1, %s3629_s29 }
 0x5ad   : > { %2575 = vrot.lane.b32.xlu0 %v4857_v12, %s3629_s29 }
 0x5b1   : > { %v884_v18 = vpop.permute.xlu0 %883 }
 0x5b2   : > { %3059 = vmatmul.msk.f32.gmra.mxu3 %vm374_vm0, %v884_v18  ;;  %v2589_v18 = vsel %vm374_vm0, %v2566_v48, 0.0 }
 0x5b9   : > { %v3278_v36 = vpop.permute.xlu0 %3277 }
 0x5ba   : > { %v3279_v40 = vunpack.i.l.bf16 %v3278_v36  ;;  %v3280_v15 = vunpack.i.h.bf16 %v3278_v36 }
 0x5bb   : > { %1439 = vrot.lane.b32.xlu2 %v1422_v16, %s3629_s29  ;;  %v4867_v6 = vpop.xlane.xlu1 %1822 }
 0x5bc   : > { %1493 = vmatpush.msrb.mxu3 %v3279_v40 }
 0x5be   : > { %1494 = vmatpush.msrb.mxu3 %v3280_v15  ;;  %v2539_v15 = vsub.f32 %v4735_v9, %v4794_v61 }
 0x5c1   : > { %v3283_v54 = vpop.permute.xlu0 %3282 }
 0x5c2   : > { %v3284_v36 = vunpack.i.l.bf16 %v3283_v54  ;;  %v3285_v40 = vunpack.i.h.bf16 %v3283_v54 }
 0x5c9   : > { %v3288_v42 = vpop.permute.xlu0 %3287  ;;  %v942_v31 = vpop.f32.mrf.mxu3 }
 0x5ca   : > { %v1032_v17 = vadd.f32 %v4592_v8, %v942_v31  ;;  %v3289_v60 = vunpack.i.l.bf16 %v3288_v42  ;;  %v3290_v45 = vunpack.i.h.bf16 %v3288_v42  ;;  %v1827_v8 = vsel %vm440_vm2, %v4400_v46, -inf  ;;  %v2000_v31 = vpop.xlane.xlu2 %1999 }
 0x5cb   : > { %v2553_v42 = vmul.f32 1.442695, %v2539_v15  ;;  %v2540_v15 = vsub.f32 %v4769_v27, %v4832_v11 }
 0x5cc   : > { %1048 = vst.msk [vmem:[#allocation3 + $0x20] sm:$0xff] %vm1043_vm6, %v1032_v17  ;;  %1495 = vmatpush.msrb.mxu3 %v3289_v60  ;;  %v2424_v17 = vsel %vm440_vm2, %v4673_v5, -inf }
 0x5cd   : > { %3492 = vpow2.f32 %v2553_v42  ;;  %v2555_v42 = vmul.f32 1.442695, %v2540_v15 }
 0x5ce   : > { %1496 = vmatpush.msrb.mxu3 %v3290_v45  ;;  %3494 = vrcp.f32 %v1997_v43 }
 0x5cf   : > { %3496 = vrcp.f32 %v4807_v23 }
 0x5d0   : > { %3498 = vpow2.f32 %v2555_v42 }
 0x5d1   : > { %v2038_v21 = vpop.permute.xlu0 %2037  ;;  %3500 = vrcp.f32 %v2000_v31 }
 0x5d2   : > { %v2570_v61 = vpop.permute.xlu2 %2569  ;;  %3502 = vrcp.f32 %v4813_v29 }
 0x5d3   : > { %v3273_v14 = vpop.permute.xlu1 %3272  ;;  %v4880_v45 = vpop.eup %3492 }
 0x5d4   : > { %v3274_v1 = vunpack.i.l.bf16 %v3273_v14  ;;  %v3275_v57 = vunpack.i.h.bf16 %v3273_v14  ;;  %v3495_v48 = vpop.eup %3494 }
 0x5d5   : > { %v3497_v14 = vpop.eup %3496 }
 0x5d6   : > { %2093 = vmatpush.msra.mxu0 %v3274_v1  ;;  %2590 = vadd.xlane.f32.xlu1 %v2589_v18 }
 0x5d7   : > { %1828 = vmax.xlane.f32.xlu0 %v1827_v8 }
 0x5d8   : > { %2094 = vmatpush.msra.mxu0 %v3275_v57 }
 0x5d9   : > { %v1438_v16 = vpop.permute.xlu0 %1437 }
 0x5da   : > { %3088 = vmatmul.msk.f32.vlgmr.msrb.gmra.mxu3 %vm374_vm0, %v1438_v16  ;;  %2095 = vmatpush.msra.mxu0 %v3284_v36  ;;  %v4888_v43 = vpop.xlane.xlu2 %2005 }
 0x5dc   : > { %2096 = vmatpush.msra.mxu0 %v3285_v40 }
 0x5dd   : > { %3124 = vmatmul.msk.f32.vlgmr.msra.gmra.mxu0 %vm374_vm0, %v2038_v21  ;;  %v2023_v21 = vmul.f32 %v3495_v48, %v4510_v13  ;;  %v1830_v13 = vsel %vm440_vm2, %v4418_v4, -inf }
 0x5e2   : > { %v2572_v1 = vpop.permute.xlu2 %2571 }
 0x5e3   : > { %v2598_v29 = vsel %vm374_vm0, %v2572_v1, 0.0  ;;  %v2430_v1 = vsel %vm440_vm2, %v4688_v41, -inf }
 0x5e4   : > { %2425 = vmax.xlane.f32.xlu2 %v2424_v17 }
 0x5e7   : > { %v945_v60 = vpop.f32.mrf.mxu3 }
 0x5e8   : > { %v1035_v54 = vadd.f32 %v4599_v58, %v945_v60  ;;  %v1423_v58 = vmul.f32 %v3497_v14, %v4576_v49  ;;  %v2592_v49 = vsel %vm374_vm0, %v4843_v25, 0.0 }
 0x5ea   : > { %1049 = vst.msk [vmem:[#allocation3 + $0x28] sm:$0xff] %vm1043_vm6, %v1035_v54  ;;  %v4914_v54 = vpop.eup %3498 }
 0x5eb   : > { %2577 = vrot.lane.b32.xlu0 %v4880_v45, %s3629_s29  ;;  %v3501_v25 = vpop.eup %3500 }
 0x5ec   : > { %v2024_v11 = vmul.f32 %v3501_v25, %v4584_v10  ;;  %v3503_v14 = vpop.eup %3502 }
 0x5ed   : > { %v1424_v31 = vmul.f32 %v3503_v14, %v4533_v55  ;;  %v1845_v55 = vsub.f32 %v4396_v59, %v4867_v6 }
 0x5ef   : > { %2041 = vrot.lane.b32.xlu1 %v2023_v21, %s3629_s29  ;;  %v1853_v15 = vmul.f32 1.442695, %v1845_v55 }
 0x5f1   : > { %3504 = vpow2.f32 %v1853_v15 }
 0x5f2   : > { %3506 = vrcp.f32 %v4834_v32 }
 0x5f3   : > { %3508 = vrcp.f32 %v4851_v2 }
 0x5f4   : > { %3510 = vrcp.f32 %v4854_v51 }
 0x5f5   : > { %3512 = vrcp.f32 %v4888_v43  ;;  %v5365_v43 = vld [vmem:[#allocation5_spill] sm:$0xff] }
 0x5f7   : > { %v4944_v59 = vpop.eup %3504 }
 0x5f8   : > { %v3507_v6 = vpop.eup %3506  ;;  %v1869_v42 = vsel %vm440_vm2, %v4944_v59, 0.0 }
 0x5fc   : > { %1441 = vrot.lane.b32.xlu2 %v1423_v58, %s3629_s29  ;;  %v1833_v58 = vsel %vm440_vm2, %v4428_v38, -inf }
 0x5fe   : > { %v4894_v57 = vpop.xlane.xlu1 %1408 }
 0x606   : > { %v4892_v18 = vpop.xlane.xlu2 %2008  ;;  %v4901_v16 = vpop.xlane.xlu1 %2011 }
 0x607   : > { %3514 = vrcp.f32 %v4892_v18 }
 0x608   : > { %3516 = vrcp.f32 %v4894_v57  ;;  %v1839_v57 = vsel %vm440_vm2, %v4445_v24, -inf }
 0x609   : > { %3518 = vrcp.f32 %v4901_v16 }
 0x60e   : > { %v4896_v8 = vpop.xlane.xlu2 %1825 }
 0x614   : > { %v948_v36 = vpop.f32.mrf.mxu3 }
 0x615   : > { %v1038_v23 = vadd.f32 %v4605_v35, %v948_v36  ;;  %1831 = vmax.xlane.f32.xlu0 %v1830_v13  ;;  %v2427_v35 = vsel %vm440_vm2, %v4680_v56, -inf  ;;  %v2595_v13 = vsel %vm374_vm0, %v2570_v61, 0.0  ;;  %v1836_v61 = vsel %vm440_vm2, %v4438_v50, -inf }
 0x616   : > { %v4903_v40 = vpop.xlane.xlu2 %1411 }
 0x617   : > { %1050 = vst.msk [vmem:[#allocation3 + $0x30] sm:$0xff] %vm1043_vm6, %v1038_v23  ;;  %3520 = vrcp.f32 %v4903_v40 }
 0x619   : > { %2593 = vadd.xlane.f32.xlu1 %v2592_v49  ;;  %v2433_v49 = vsel %vm440_vm2, %v4697_v28, -inf }
 0x61e   : > { %v2040_v17 = vpop.permute.xlu1 %2039  ;;  %v1440_v60 = vpop.permute.xlu2 %1439 }
 0x61f   : > { %3125 = vmatmul.msk.f32.gmra.mxu0 %vm374_vm0, %v2040_v17  ;;  %3089 = vmatmul.msk.f32.gmra.mxu3 %vm374_vm0, %v1440_v60  ;;  %v2025_v17 = vmul.f32 %v3507_v6, %v4535_v22  ;;  %v2574_v60 = vpop.permute.xlu0 %2573  ;;  %v3605_v6 = vld [vmem:[#allocation2 + $0x58] sm:$0xff] }
 0x620   : > { %v2601_v32 = vsel %vm374_vm0, %v2574_v60, 0.0 }
 0x625   : > { %2428 = vmax.xlane.f32.xlu2 %v2427_v35  ;;  %v3509_v35 = vpop.eup %3508 }
 0x626   : > { %v1425_v25 = vmul.f32 %v3509_v35, %v4647_v26  ;;  %v3511_v2 = vpop.eup %3510  ;;  %v5364_v26 = vld [vmem:[#allocation7_spill] sm:$0xff]  ;;  %v3606_v35 = vld [vmem:[#allocation2 + $0x48] sm:$0xff] }
 0x627   : > { %v1426_v22 = vmul.f32 %v3511_v2, %v4654_v7  ;;  %v3513_v51 = vpop.eup %3512  ;;  %v4967_v14 = vpop.xlane.xlu0 %2422 }
 0x629   : > { %2579 = vrot.lane.b32.xlu0 %v4914_v54, %s3629_s29 }
 0x632   : > { %2043 = vrot.lane.b32.xlu1 %v2024_v11, %s3629_s29  ;;  %v5362_v11 = vld [vmem:[#allocation6_spill] sm:$0xff] }
 0x635   : > { %v951_v48 = vpop.f32.mrf.mxu3 }
 0x636   : > { %v1041_v21 = vadd.f32 %v4609_v33, %v951_v48  ;;  %v5363_v48 = vld [vmem:[#allocation4_spill] sm:$0xff] }
 0x638   : > { %1051 = vst.msk [vmem:[#allocation3 + $0x38] sm:$0xff] %vm1043_vm6, %v1041_v21  ;;  %v2026_v21 = vmul.f32 %v3513_v51, %v4554_v0  ;;  %v3608_v51 = vld [vmem:[#allocation2 + $0x30] sm:$0xff] }
 0x63d   : > { %1443 = vrot.lane.b32.xlu2 %v1424_v31, %s3629_s29  ;;  %v3515_v31 = vpop.eup %3514 }
 0x63e   : > { %v2027_v0 = vmul.f32 %v3515_v31, %v4639_v39  ;;  %v3517_v18 = vpop.eup %3516 }
 0x63f   : > { %v1427_v55 = vmul.f32 %v3517_v18, %v4710_v52  ;;  %v3604_v52 = vld [vmem:[#allocation2 + $0x38] sm:$0xff]  ;;  %v3611_v18 = vld [vmem:[#allocation2 + $0x40] sm:$0xff] }
 0x649   : > { %v4929_v10 = vpop.xlane.xlu1 %2590 }
 0x653   : > { %1834 = vmax.xlane.f32.xlu0 %v1833_v58 }
 0x657   : > { %v4927_v36 = vpop.xlane.xlu2 %2425 }
 0x65b   : > { %2599 = vadd.xlane.f32.xlu0 %v2598_v29  ;;  %v2576_v29 = vpop.permute.xlu0 %2575 }
 0x65c   : > { %2596 = vadd.xlane.f32.xlu1 %v2595_v13 }
 0x65f   : > { %v1442_v33 = vpop.permute.xlu2 %1441 }
 0x660   : > { %3090 = vmatmul.msk.f32.gmra.mxu3 %vm374_vm0, %v1442_v33 }
 0x661   : > { %v2042_v23 = vpop.permute.xlu1 %2041 }
 0x662   : > { %3126 = vmatmul.msk.f32.gmra.mxu0 %vm374_vm0, %v2042_v23 }
 0x663   : > { %2434 = vmax.xlane.f32.xlu0 %v2433_v49  ;;  %v4981_v23 = vpop.xlane.xlu0 %1828  ;;  %v2436_v49 = vsel %vm440_vm2, %v4704_v44, -inf }
 0x666   : > { %2431 = vmax.xlane.f32.xlu2 %v2430_v1  ;;  %v2604_v1 = vsel %vm374_vm0, %v2576_v29, 0.0 }
 0x66b   : > { %1837 = vmax.xlane.f32.xlu0 %v1836_v61  ;;  %v4986_v39 = vpop.permute.xlu0 %2577 }
 0x673   : > { %1870 = vadd.xlane.f32.xlu0 %v1869_v42  ;;  %v3311_v42 = vpack.i.bf16 %v3605_v6, %v3604_v52 }
 0x675   : > { %2045 = vrot.lane.b32.xlu1 %v2025_v17, %s3629_s29  ;;  %v1842_v17 = vsel %vm440_vm2, %v4453_v37, -inf }
 0x67b   : > { %2602 = vadd.xlane.f32.xlu0 %v2601_v32  ;;  %v3607_v32 = vld [vmem:[#allocation2 + $0x28] sm:$0xff] }
 0x67d   : > { %3297 = vrot.lane.b32.xlu1 %v5362_v11, %s3630_s23  ;;  %v2439_v11 = vsel %vm440_vm2, %v4735_v9, -inf }
 0x67e   : > { %1445 = vrot.lane.b32.xlu2 %v1425_v25, %s3629_s29  ;;  %v3321_v25 = vpack.i.bf16 %v3606_v35, %v3607_v32 }
 0x685   : > { %1447 = vrot.lane.b32.xlu1 %v1426_v22, %s3629_s29 }
 0x686   : > { %3292 = vrot.lane.b32.xlu2 %v5363_v48, %s3630_s23 }
 0x688   : > { %v4990_v15 = vpop.xlane.xlu0 %1831 }
 0x68c   : > { %v4974_v58 = vpop.xlane.xlu1 %2593 }
 0x68e   : > { %2047 = vrot.lane.b32.xlu2 %v2026_v21, %s3629_s29  ;;  %v3609_v21 = vld [vmem:[#allocation2 + $0x50] sm:$0xff] }
 0x68f   : > { %3302 = vrot.lane.b32.xlu0 %v5364_v26, %s3630_s23  ;;  %v3316_v31 = vpack.i.bf16 %v3609_v21, %v3608_v51  ;;  %v1846_v51 = vsub.f32 %v4383_v20, %v4896_v8 }
 0x697   : > { %3307 = vrot.lane.b32.xlu0 %v5365_v43, %s3630_s23 }
 0x698   : > { %v4971_v7 = vpop.xlane.xlu2 %2428 }
 0x69b   : > { %v4993_v61 = vpop.permute.xlu0 %2579 }
 0x69f   : > { %2049 = vrot.lane.b32.xlu0 %v2027_v0, %s3629_s29 }
 0x6a0   : > { %v1444_v13 = vpop.permute.xlu2 %1443 }
 0x6a1   : > { %3091 = vmatmul.msk.f32.gmra.mxu3 %vm374_vm0, %v1444_v13  ;;  %v3610_v13 = vld [vmem:[#allocation2 + $0x20] sm:$0xff] }
 0x6a4   : > { %v2044_v33 = vpop.permute.xlu1 %2043 }
 0x6a5   : > { %3127 = vmatmul.msk.f32.gmra.mxu0 %vm374_vm0, %v2044_v33  ;;  %v3326_v33 = vpack.i.bf16 %v3611_v18, %v3610_v13  ;;  %v1855_v13 = vmul.f32 1.442695, %v1846_v51 }
 0x6a7   : > { %1449 = vrot.lane.b32.xlu0 %v1427_v55, %s3629_s29 }
 0x6af   : > { %1840 = vmax.xlane.f32.xlu1 %v1839_v57 }
 0x6b7   : > { %2437 = vmax.xlane.f32.xlu2 %v2436_v49  ;;  %v3519_v49 = vpop.eup %3518 }
 0x6b8   : > { %v2028_v6 = vmul.f32 %v3519_v49, %v4719_v53 }
 0x6bf   : > { %2605 = vadd.xlane.f32.xlu2 %v2604_v1  ;;  %v2445_v1 = vsub.f32 %v4666_v63, %v4967_v14 }
 0x6c6   : > { %v4997_v60 = vpop.xlane.xlu0 %1834 }
 0x6c7   : > { %1843 = vmax.xlane.f32.xlu2 %v1842_v17 }
 0x6c8   : > { %3312 = vrot.lane.b32.xlu1 %v3311_v42, %s3631_s24  ;;  %v2453_v42 = vmul.f32 1.442695, %v2445_v1 }
 0x6ca   : > { %3522 = vpow2.f32 %v2453_v42 }
 0x6cb   : > { %3524 = vpow2.f32 %v1855_v13 }
 0x6ce   : > { %v5003_v2 = vpop.xlane.xlu0 %2599 }
 0x6cf   : > { %v5009_v0 = vpop.xlane.xlu1 %2596 }
 0x6d0   : > { %3322 = vrot.lane.b32.xlu1 %v3321_v25, %s3631_s24  ;;  %v3521_v25 = vpop.eup %3520 }
 0x6d1   : > { %2440 = vmax.xlane.f32.xlu0 %v2439_v11  ;;  %v1428_v53 = vmul.f32 %v3521_v25, %v4727_v47  ;;  %v5026_v40 = vpop.eup %3522  ;;  %v2607_v47 = vsel %vm374_vm0, %v4986_v39, 0.0 }
 0x6d6   : > { %v5007_v48 = vpop.xlane.xlu0 %2434 }
 0x6d9   : > { %v5005_v22 = vpop.xlane.xlu2 %2431 }
 0x6de   : > { %v5014_v55 = vpop.xlane.xlu0 %1837 }
 0x6df   : > { %3317 = vrot.lane.b32.xlu2 %v3316_v31, %s3631_s24 }
 0x6e1   : > { %v1446_v29 = vpop.permute.xlu2 %1445 }
 0x6e2   : > { %3092 = vmatmul.msk.f32.gmra.mxu3 %vm374_vm0, %v1446_v29  ;;  %v2469_v29 = vsel %vm440_vm2, %v5026_v40, 0.0 }
 0x6e5   : > { %3327 = vrot.lane.b32.xlu0 %v3326_v33, %s3631_s24 }
 0x6e6   : > { %v1871_v35 = vpop.xlane.xlu0 %1870 }
 0x6e7   : > { %v2046_v57 = vpop.permute.xlu1 %2045  ;;  %3526 = vrcp.f32 %v1871_v35 }
 0x6e8   : > { %3128 = vmatmul.msk.f32.gmra.mxu0 %vm374_vm0, %v2046_v57  ;;  %v5037_v57 = vpop.eup %3524  ;;  %3528 = vrcp.f32 %v4929_v10  ;;  %v2610_v10 = vsel %vm374_vm0, %v4993_v61, 0.0 }
 0x6e9   : > { %v3293_v52 = vpop.permute.xlu2 %3292  ;;  %v1872_v8 = vsel %vm440_vm2, %v5037_v57, 0.0  ;;  %3530 = vrcp.f32 %v4974_v58 }
 0x6ea   : > { %v3294_v16 = vunpack.i.l.bf16 %v3293_v52  ;;  %v3295_v17 = vunpack.i.h.bf16 %v3293_v52 }
 0x6ec   : > { %2178 = vmatpush.msra.mxu2 %v3294_v16  ;;  %3190 = vmatpush.msra.mxu3 %v3294_v16 }
 0x6ed   : > { %2051 = vrot.lane.b32.xlu0 %v2028_v6, %s3629_s29  ;;  %v3527_v1 = vpop.eup %3526 }
 0x6ee   : > { %2179 = vmatpush.msra.mxu2 %v3295_v17  ;;  %3191 = vmatpush.msra.mxu3 %v3295_v17  ;;  %v5031_v31 = vpop.xlane.xlu0 %2602  ;;  %v1901_v39 = vmul.f32 %v3527_v1, %v4944_v59  ;;  %v3529_v42 = vpop.eup %3528  ;;  %v2442_v59 = vsel %vm440_vm2, %v4769_v27, -inf }
 0x6ef   : > { %v3298_v32 = vpop.permute.xlu1 %3297  ;;  %v2621_v35 = vmul.f32 %v3529_v42, %v4757_v62 }
 0x6f0   : > { %v3299_v63 = vunpack.i.l.bf16 %v3298_v32  ;;  %v3300_v11 = vunpack.i.h.bf16 %v3298_v32 }
 0x6f1   : > { %v2048_v14 = vpop.permute.xlu2 %2047 }
 0x6f2   : > { %3129 = vmatmul.msk.f32.gmra.mxu0 %vm374_vm0, %v2048_v14  ;;  %2180 = vmatpush.msra.mxu2 %v3299_v63  ;;  %v3531_v14 = vpop.eup %3530 }
 0x6f3   : > { %3192 = vmatpush.msra.mxu3 %v3299_v63  ;;  %v2446_v63 = vsub.f32 %v4673_v5, %v4927_v36  ;;  %v1847_v5 = vsub.f32 %v4400_v46, %v4981_v23 }
 0x6f4   : > { %2181 = vmatpush.msra.mxu2 %v3300_v11 }
 0x6f5   : > { %3193 = vmatpush.msra.mxu3 %v3300_v11  ;;  %1451 = vrot.lane.b32.xlu0 %v1428_v53, %s3629_s29  ;;  %v2622_v11 = vmul.f32 %v3531_v14, %v4767_v19  ;;  %v1857_v19 = vmul.f32 1.442695, %v1847_v5 }
 0x6f7   : > { %v1448_v21 = vpop.permute.xlu1 %1447 }
 0x6f8   : > { %3093 = vmatmul.msk.f32.gmra.mxu3 %vm374_vm0, %v1448_v21 }
 0x6fa   : > { %2470 = vadd.xlane.f32.xlu1 %v2469_v29 }
 0x701   : > { %v3303_v18 = vpop.permute.xlu0 %3302 }
 0x702   : > { %v3304_v33 = vunpack.i.l.bf16 %v3303_v18  ;;  %2608 = vadd.xlane.f32.xlu1 %v2607_v47  ;;  %v3305_v20 = vunpack.i.h.bf16 %v3303_v18  ;;  %v2448_v47 = vsub.f32 %v4688_v41, %v5005_v22 }
 0x704   : > { %2182 = vmatpush.msra.mxu2 %v3304_v33  ;;  %3194 = vmatpush.msra.mxu3 %v3304_v33  ;;  %v2459_v46 = vmul.f32 1.442695, %v2448_v47 }
 0x706   : > { %2183 = vmatpush.msra.mxu2 %v3305_v20  ;;  %3195 = vmatpush.msra.mxu3 %v3305_v20 }
 0x708   : > { %1873 = vadd.xlane.f32.xlu2 %v1872_v8  ;;  %v1849_v8 = vsub.f32 %v4428_v38, %v4997_v60 }
 0x709   : > { %v3308_v49 = vpop.permute.xlu0 %3307 }
 0x70a   : > { %v3309_v52 = vunpack.i.l.bf16 %v3308_v49  ;;  %v3310_v16 = vunpack.i.h.bf16 %v3308_v49  ;;  %v1861_v49 = vmul.f32 1.442695, %v1849_v8 }
 0x70c   : > { %2184 = vmatpush.msra.mxu2 %v3309_v52  ;;  %3196 = vmatpush.msra.mxu3 %v3309_v52 }
 0x70e   : > { %2185 = vmatpush.msra.mxu2 %v3310_v16  ;;  %3197 = vmatpush.msra.mxu3 %v3310_v16 }
 0x70f   : > { %3132 = vmatmul.msk.f32.vlgmr.msra.gmra.mxu2 %vm440_vm2, %v1901_v39  ;;  %v1848_v39 = vsub.f32 %v4418_v4, %v4990_v15 }
 0x711   : > { %v2050_v6 = vpop.permute.xlu0 %2049  ;;  %v1859_v60 = vmul.f32 1.442695, %v1848_v39 }
 0x712   : > { %3130 = vmatmul.msk.f32.gmra.mxu0 %vm374_vm0, %v2050_v6 }
 0x719   : > { %v1450_v17 = vpop.permute.xlu0 %1449 }
 0x71a   : > { %3094 = vmatmul.msk.f32.gmra.mxu3 %vm374_vm0, %v1450_v17 }
 0x71b   : > { %2637 = vrot.lane.b32.xlu1 %v2621_v35, %s3629_s29 }
 0x71f   : > { %2443 = vmax.xlane.f32.xlu0 %v2442_v59  ;;  %v1850_v59 = vsub.f32 %v4438_v50, %v5014_v55 }
 0x720   : > { %3332 = vrot.lane.b32.xlu2 %v5364_v26, %s3631_s24  ;;  %v2455_v26 = vmul.f32 1.442695, %v2446_v63 }
 0x721   : > { %v1863_v15 = vmul.f32 1.442695, %v1850_v59 }
 0x722   : > { %v5059_v62 = vpop.xlane.xlu1 %1840  ;;  %3532 = vpow2.f32 %v2455_v26 }
 0x727   : > { %2611 = vadd.xlane.f32.xlu0 %v2610_v10 }
 0x728   : > { %3337 = vrot.lane.b32.xlu2 %v5365_v43, %s3631_s24  ;;  %v2447_v43 = vsub.f32 %v4680_v56, %v4971_v7  ;;  %v5073_v21 = vpop.eup %3532 }
 0x729   : > { %v2472_v18 = vsel %vm440_vm2, %v5073_v21, 0.0 }
 0x72a   : > { %v5056_v32 = vpop.xlane.xlu2 %2437  ;;  %v2457_v36 = vmul.f32 1.442695, %v2447_v43 }
 0x72b   : > { %v2450_v14 = vsub.f32 %v4704_v44, %v5056_v32 }
 0x72c   : > { %3534 = vpow2.f32 %v2457_v36 }
 0x72d   : > { %3536 = vpow2.f32 %v1857_v19  ;;  %v2463_v55 = vmul.f32 1.442695, %v2450_v14  ;;  %v2098_v14 = vpop.f32.mrf.mxu0 }
 0x72e   : > { %3538 = vpow2.f32 %v2459_v46 }
 0x72f   : > { %3540 = vpow2.f32 %v1861_v49 }
 0x730   : > { %3542 = vpow2.f32 %v1859_v60 }
 0x731   : > { %3544 = vrcp.f32 %v5009_v0 }
 0x732   : > { %v5061_v25 = vpop.xlane.xlu2 %2605  ;;  %v5079_v23 = vpop.eup %3534  ;;  %3546 = vpow2.f32 %v1863_v15 }
 0x733   : > { %v2475_v41 = vsel %vm440_vm2, %v5079_v23, 0.0  ;;  %v5085_v22 = vpop.eup %3536  ;;  %3548 = vrcp.f32 %v5003_v2 }
 0x734   : > { %v1875_v52 = vsel %vm440_vm2, %v5085_v22, 0.0  ;;  %v5091_v16 = vpop.eup %3538  ;;  %3550 = vpow2.f32 %v2463_v55 }
 0x735   : > { %v2478_v38 = vsel %vm440_vm2, %v5091_v16, 0.0  ;;  %v5097_v35 = vpop.eup %3540  ;;  %3552 = vrcp.f32 %v5031_v31  ;;  %v2449_v31 = vsub.f32 %v4697_v28, %v5007_v48 }
 0x736   : > { %v1881_v4 = vsel %vm440_vm2, %v5097_v35, 0.0  ;;  %v5105_v63 = vpop.eup %3542 }
 0x737   : > { %v3545_v26 = vpop.eup %3544  ;;  %v1878_v50 = vsel %vm440_vm2, %v5105_v63, 0.0 }
 0x738   : > { %v5113_v0 = vpop.eup %3546 }
 0x739   : > { %v1884_v44 = vsel %vm440_vm2, %v5113_v0, 0.0  ;;  %v3549_v32 = vpop.eup %3548 }
 0x73a   : > { %v3313_v61 = vpop.permute.xlu1 %3312  ;;  %v5066_v53 = vpop.xlane.xlu2 %1843 }
 0x73b   : > { %v3315_v51 = vunpack.i.h.bf16 %v3313_v61  ;;  %v3314_v58 = vunpack.i.l.bf16 %v3313_v61  ;;  %2639 = vrot.lane.b32.xlu0 %v2622_v11, %s3629_s29  ;;  %v2623_v61 = vmul.f32 %v3545_v26, %v4787_v30  ;;  %v5119_v43 = vpop.eup %3550 }
 0x73c   : > { %v2484_v30 = vsel %vm440_vm2, %v5119_v43, 0.0 }
 0x73d   : > { %2693 = vmatpush.msrb.mxu2 %v3315_v51  ;;  %2778 = vmatpush.msrb.mxu0 %v3314_v58  ;;  %v2624_v51 = vmul.f32 %v3549_v32, %v4824_v34  ;;  %v3553_v58 = vpop.eup %3552 }
 0x73e   : > { %v2625_v36 = vmul.f32 %v3553_v58, %v4828_v3 }
 0x742   : > { %v3323_v29 = vpop.permute.xlu1 %3322  ;;  %v3318_v13 = vpop.permute.xlu2 %3317 }
 0x743   : > { %v3320_v56 = vunpack.i.h.bf16 %v3318_v13  ;;  %v3319_v7 = vunpack.i.l.bf16 %v3318_v13  ;;  %v3325_v33 = vunpack.i.h.bf16 %v3323_v29  ;;  %v3324_v20 = vunpack.i.l.bf16 %v3323_v29 }
 0x744   : > { %v5087_v1 = vpop.xlane.xlu0 %2440 }
 0x745   : > { %2473 = vadd.xlane.f32.xlu1 %v2472_v18  ;;  %2694 = vmatpush.msrb.mxu2 %v3320_v56  ;;  %v2461_v56 = vmul.f32 1.442695, %v2449_v31  ;;  %v2451_v28 = vsub.f32 %v4735_v9, %v5087_v1  ;;  %v1852_v9 = vsub.f32 %v4453_v37, %v5066_v53 }
 0x746   : > { %2779 = vmatpush.msrb.mxu0 %v3319_v7 }
 0x747   : > { %2695 = vmatpush.msrb.mxu2 %v3325_v33  ;;  %v2465_v33 = vmul.f32 1.442695, %v2451_v28  ;;  %v1867_v39 = vmul.f32 1.442695, %v1852_v9 }
 0x748   : > { %2780 = vmatpush.msrb.mxu0 %v3324_v20 }
 0x74d   : > { %2476 = vadd.xlane.f32.xlu1 %v2475_v41 }
 0x751   : > { %1876 = vadd.xlane.f32.xlu2 %v1875_v52 }
 0x755   : > { %2479 = vadd.xlane.f32.xlu1 %v2478_v38 }
 0x757   : > { %v3328_v6 = vpop.permute.xlu0 %3327 }
 0x758   : > { %v3330_v42 = vunpack.i.h.bf16 %v3328_v6  ;;  %v3329_v17 = vunpack.i.l.bf16 %v3328_v6 }
 0x75a   : > { %2696 = vmatpush.msrb.mxu2 %v3330_v42  ;;  %2781 = vmatpush.msrb.mxu0 %v3329_v17 }
 0x75d   : > { %1882 = vadd.xlane.f32.xlu1 %v1881_v4  ;;  %v1498_v4 = vpop.f32.mrf.mxu3 }
 0x75f   : > { %v2052_v10 = vpop.permute.xlu0 %2051 }
 0x760   : > { %3131 = vmatmul.msk.f32.gmra.mxu0 %vm374_vm0, %v2052_v10 }
 0x765   : > { %1879 = vadd.xlane.f32.xlu0 %v1878_v50  ;;  %v1501_v55 = vpop.f32.mrf.mxu3 }
 0x767   : > { %v1452_v11 = vpop.permute.xlu0 %1451 }
 0x768   : > { %3095 = vmatmul.msk.f32.gmra.mxu3 %vm374_vm0, %v1452_v11  ;;  %v5366_v11 = vld [vmem:[#allocation10_spill] sm:$0xff] }
 0x769   : > { %2641 = vrot.lane.b32.xlu2 %v2623_v61, %s3629_s29  ;;  %v1591_v61 = vadd.f32 %v5366_v11, %v1501_v55 }
 0x76d   : > { %1885 = vadd.xlane.f32.xlu0 %v1884_v44  ;;  %v2471_v2 = vpop.xlane.xlu1 %2470 }
 0x775   : > { %2485 = vadd.xlane.f32.xlu0 %v2484_v30  ;;  %v2609_v29 = vpop.xlane.xlu1 %2608  ;;  %v5367_v30 = vld [vmem:[#allocation9_spill] sm:$0xff] }
 0x776   : > { %2643 = vrot.lane.b32.xlu1 %v2624_v51, %s3629_s29  ;;  %v1588_v51 = vadd.f32 %v5367_v30, %v1498_v4  ;;  %v5368_v4 = vld [vmem:[#allocation11_spill] sm:$0xff] }
 0x77b   : > { %v1874_v5 = vpop.xlane.xlu2 %1873 }
 0x77c   : > { %3554 = vrcp.f32 %v1874_v5 }
 0x77d   : > { %3556 = vrcp.f32 %v5061_v25 }
 0x77e   : > { %2645 = vrot.lane.b32.xlu1 %v2625_v36, %s3629_s29  ;;  %3558 = vrcp.f32 %v2471_v2 }
 0x77f   : > { %3560 = vrcp.f32 %v2609_v29 }
 0x780   : > { %3562 = vpow2.f32 %v2461_v56  ;;  %v1504_v56 = vpop.f32.mrf.mxu3 }
 0x781   : > { %3564 = vpow2.f32 %v2465_v33 }
 0x782   : > { %v3555_v19 = vpop.eup %3554  ;;  %3566 = vpow2.f32 %v1867_v39 }
 0x783   : > { %v1902_v34 = vmul.f32 %v3555_v19, %v5037_v57  ;;  %v3333_v13 = vpop.permute.xlu2 %3332  ;;  %v3557_v47 = vpop.eup %3556 }
 0x784   : > { %v3334_v7 = vunpack.i.l.bf16 %v3333_v13  ;;  %v3335_v3 = vunpack.i.h.bf16 %v3333_v13  ;;  %v2626_v25 = vmul.f32 %v3557_v47, %v4857_v12  ;;  %v3559_v48 = vpop.eup %3558 }
 0x785   : > { %3133 = vmatmul.msk.f32.vlgmr.msra.gmra.mxu3 %vm440_vm2, %v1902_v34  ;;  %v3561_v18 = vpop.eup %3560  ;;  %v2501_v12 = vmul.f32 %v3559_v48, %v5026_v40 }
 0x786   : > { %2782 = vmatpush.msrb.mxu0 %v3334_v7  ;;  %v5137_v8 = vpop.eup %3562  ;;  %v2627_v49 = vmul.f32 %v3561_v18, %v4880_v45  ;;  %v1851_v45 = vsub.f32 %v4445_v24, %v5059_v62 }
 0x787   : > { %v2481_v1 = vsel %vm440_vm2, %v5137_v8, 0.0  ;;  %v5148_v38 = vpop.eup %3564 }
 0x788   : > { %2783 = vmatpush.msrb.mxu0 %v3335_v3  ;;  %v2487_v40 = vsel %vm440_vm2, %v5148_v38, 0.0  ;;  %v1865_v53 = vmul.f32 1.442695, %v1851_v45  ;;  %v5155_v42 = vpop.eup %3566  ;;  %v2101_v3 = vpop.f32.mrf.mxu0 }
 0x789   : > { %2647 = vrot.lane.b32.xlu0 %v2626_v25, %s3629_s29  ;;  %v1890_v59 = vsel %vm440_vm2, %v5155_v42, 0.0  ;;  %v1507_v28 = vpop.f32.mrf.mxu3 }
 0x78b   : > { %v3338_v57 = vpop.permute.xlu2 %3337 }
 0x78c   : > { %v3339_v20 = vunpack.i.l.bf16 %v3338_v57  ;;  %v3340_v41 = vunpack.i.h.bf16 %v3338_v57 }
 0x78d   : > { %v2638_v46 = vpop.permute.xlu1 %2637 }
 0x78e   : > { %3160 = vmatmul.msk.f32.vlgmr.msrb.gmra.mxu2 %vm374_vm0, %v2638_v46  ;;  %2784 = vmatpush.msrb.mxu0 %v3339_v20 }
 0x790   : > { %2785 = vmatpush.msrb.mxu0 %v3340_v41 }
 0x791   : > { %2649 = vrot.lane.b32.xlu0 %v2627_v49, %s3629_s29  ;;  %3168 = vmatmul.msk.f32.vlgmr.msrb.gmra.mxu0 %vm440_vm2, %v2501_v12 }
 0x792   : > { %2482 = vadd.xlane.f32.xlu2 %v2481_v1  ;;  %v2444_v52 = vpop.xlane.xlu0 %2443  ;;  %v2187_v15 = vpop.f32.mrf.mxu2 }
 0x793   : > { %v2452_v37 = vsub.f32 %v4769_v27, %v2444_v52  ;;  %v2188_v50 = vadd.f32 %v2187_v15, %v2098_v14  ;;  %v1594_v15 = vadd.f32 %v5368_v4, %v1504_v56  ;;  %v5373_v56 = vld [vmem:[#allocation16_spill] sm:$0xff] }
 0x795   : > { %v2467_v6 = vmul.f32 1.442695, %v2452_v37 }
 0x79a   : > { %2488 = vadd.xlane.f32.xlu2 %v2487_v40  ;;  %v2612_v60 = vpop.xlane.xlu0 %2611 }
 0x79b   : > { %3568 = vrcp.f32 %v2612_v60 }
 0x79c   : > { %3570 = vpow2.f32 %v1865_v53 }
 0x79d   : > { %3572 = vpow2.f32 %v2467_v6 }
 0x7a1   : > { %v3569_v17 = vpop.eup %3568 }
 0x7a2   : > { %1891 = vadd.xlane.f32.xlu2 %v1890_v59  ;;  %v2628_v24 = vmul.f32 %v3569_v17, %v4914_v54  ;;  %v5160_v27 = vpop.eup %3570 }
 0x7a3   : > { %v5163_v62 = vpop.eup %3572  ;;  %v1887_v10 = vsel %vm440_vm2, %v5160_v27, 0.0 }
 0x7a4   : > { %2651 = vrot.lane.b32.xlu0 %v2628_v24, %s3629_s29  ;;  %v2490_v26 = vsel %vm440_vm2, %v5163_v62, 0.0  ;;  %s3633_s29 = smov 8  }
 0x7a8   : > { %1888 = vadd.xlane.f32.xlu1 %v1887_v10 }
 0x7aa   : > { %2491 = vadd.xlane.f32.xlu2 %v2490_v26 }
 0x7ac   : > { %2219 = vrot.lane.b32.xlu0 %v2188_v50, %s3632_s27 }
 0x7ad   : > { %v2640_v54 = vpop.permute.xlu0 %2639 }
 0x7ae   : > { %3161 = vmatmul.msk.f32.gmra.mxu2 %vm374_vm0, %v2640_v54 }
 0x7b4   : > { %1621 = vrot.lane.b32.xlu0 %v1591_v61, %s3633_s29 }
 0x7b8   : > { %v2474_v44 = vpop.xlane.xlu1 %2473 }
 0x7b9   : > { %3574 = vrcp.f32 %v2474_v44 }
 0x7bf   : > { %v3575_v32 = vpop.eup %3574 }
 0x7c0   : > { %v2477_v58 = vpop.xlane.xlu1 %2476  ;;  %v2502_v2 = vmul.f32 %v3575_v32, %v5073_v21 }
 0x7c1   : > { %3576 = vrcp.f32 %v2477_v58 }
 0x7c2   : > { %1619 = vrot.lane.b32.xlu2 %v1588_v51, %s3633_s29  ;;  %3169 = vmatmul.msk.f32.gmra.mxu0 %vm440_vm2, %v2502_v2 }
 0x7c4   : > { %v1877_v5 = vpop.xlane.xlu2 %1876 }
 0x7c5   : > { %3578 = vrcp.f32 %v1877_v5 }
 0x7c7   : > { %v3577_v36 = vpop.eup %3576 }
 0x7c8   : > { %v2480_v31 = vpop.xlane.xlu1 %2479  ;;  %v2503_v19 = vmul.f32 %v3577_v36, %v5079_v23 }
 0x7c9   : > { %3580 = vrcp.f32 %v2480_v31 }
 0x7ca   : > { %3170 = vmatmul.msk.f32.gmra.mxu0 %vm440_vm2, %v2503_v19 }
 0x7cb   : > { %v3579_v29 = vpop.eup %3578 }
 0x7cc   : > { %v2642_v34 = vpop.permute.xlu2 %2641  ;;  %v1903_v13 = vmul.f32 %v3579_v29, %v5085_v22  ;;  %v5185_v22 = vpop.f32.mrf.mxu0 }
 0x7cd   : > { %3162 = vmatmul.msk.f32.gmra.mxu2 %vm374_vm0, %v2642_v34 }
 0x7ce   : > { %3134 = vmatmul.msk.f32.gmra.mxu3 %vm440_vm2, %v1903_v13  ;;  %v5371_v13 = vld [vmem:[#allocation14_spill] sm:$0xff] }
 0x7cf   : > { %v3581_v21 = vpop.eup %3580 }
 0x7d0   : > { %v2504_v47 = vmul.f32 %v3581_v21, %v5091_v16  ;;  %v1883_v23 = vpop.xlane.xlu1 %1882  ;;  %v1510_v16 = vpop.f32.mrf.mxu3 }
 0x7d2   : > { %3171 = vmatmul.msk.f32.gmra.mxu0 %vm440_vm2, %v2504_v47 }
 0x7d4   : > { %v5189_v46 = vpop.f32.mrf.mxu0 }
 0x7d8   : > { %v1880_v7 = vpop.xlane.xlu0 %1879  ;;  %v5193_v12 = vpop.f32.mrf.mxu3 }
 0x7d9   : > { %3582 = vrcp.f32 %v1880_v7 }
 0x7da   : > { %3584 = vrcp.f32 %v1883_v23 }
 0x7dc   : > { %v5196_v9 = vpop.f32.mrf.mxu0 }
 0x7df   : > { %v3583_v25 = vpop.eup %3582 }
 0x7e0   : > { %v1904_v48 = vmul.f32 %v3583_v25, %v5105_v63  ;;  %v1886_v57 = vpop.xlane.xlu0 %1885  ;;  %v3585_v18 = vpop.eup %3584 }
 0x7e1   : > { %3586 = vrcp.f32 %v1886_v57  ;;  %v1905_v20 = vmul.f32 %v3585_v18, %v5097_v35  ;;  %v5200_v35 = vpop.f32.mrf.mxu3 }
 0x7e2   : > { %3135 = vmatmul.msk.f32.gmra.mxu3 %vm440_vm2, %v1904_v48 }
 0x7e4   : > { %v5202_v52 = vpop.f32.mrf.mxu0 }
 0x7e7   : > { %v3587_v41 = vpop.eup %3586 }
 0x7e8   : > { %v2644_v33 = vpop.permute.xlu1 %2643  ;;  %v1906_v49 = vmul.f32 %v3587_v41, %v5113_v0  ;;  %v2486_v1 = vpop.xlane.xlu0 %2485  ;;  %v2862_v41 = vld [vmem:[%s5338_s7 + $0x10] sm:$0xff] }
 0x7e9   : > { %3163 = vmatmul.msk.f32.gmra.mxu2 %vm374_vm0, %v2644_v33 }
 0x7ea   : > { %3136 = vmatmul.msk.f32.gmra.mxu3 %vm440_vm2, %v1905_v20  ;;  %v2863_v20 = vld [vmem:[%s5338_s7 + $0x18] sm:$0xff] }
 0x7eb   : > { %v1519_v45 = vpop.f32.mrf.mxu3  ;;  %2904 = vmatpush.msrb.mxu3 %v2863_v20 }
 0x7ec   : > { %v5205_v37 = vpop.f32.mrf.mxu0  ;;  %v1609_v7 = vadd.f32 %v5373_v56, %v1519_v45 }
 0x7ed   : > { %2905 = vmatpush.msrb.mxu3 %v2862_v41 }
 0x7f0   : > { %v2646_v63 = vpop.permute.xlu1 %2645 }
 0x7f1   : > { %3164 = vmatmul.msk.f32.gmra.mxu2 %vm374_vm0, %v2646_v63 }
 0x7f2   : > { %3137 = vmatmul.msk.f32.gmra.mxu3 %vm440_vm2, %v1906_v49 }
 0x7f4   : > { %v5208_v60 = vpop.f32.mrf.mxu0 }
 0x7fb   : > { %v2648_v39 = vpop.permute.xlu0 %2647 }
 0x7fc   : > { %3165 = vmatmul.msk.f32.gmra.mxu2 %vm374_vm0, %v2648_v39 }
 0x803   : > { %v2650_v40 = vpop.permute.xlu0 %2649 }
 0x804   : > { %3166 = vmatmul.msk.f32.gmra.mxu2 %vm374_vm0, %v2650_v40 }
 0x805   : > { %v2483_v0 = vpop.xlane.xlu2 %2482 }
 0x806   : > { %3588 = vrcp.f32 %v2483_v0 }
 0x807   : > { %3590 = vrcp.f32 %v2486_v1 }
 0x808   : > { %v2190_v53 = vpop.f32.mrf.mxu3 }
 0x809   : > { %v2191_v6 = vadd.f32 %v2190_v53, %v2101_v3 }
 0x80b   : > { %2221 = vrot.lane.b32.xlu0 %v2191_v6, %s3632_s27 }
 0x80c   : > { %v3589_v17 = vpop.eup %3588 }
 0x80d   : > { %v2489_v59 = vpop.xlane.xlu2 %2488  ;;  %v2505_v24 = vmul.f32 %v3589_v17, %v5137_v8  ;;  %v3591_v26 = vpop.eup %3590  ;;  %v5369_v8 = vld [vmem:[#allocation12_spill] sm:$0xff] }
 0x80e   : > { %v2787_v10 = vpop.f32.mrf.mxu0  ;;  %3592 = vrcp.f32 %v2489_v59  ;;  %v2506_v55 = vmul.f32 %v3591_v26, %v5119_v43  ;;  %v1597_v61 = vadd.f32 %v5369_v8, %v1507_v28  ;;  %v5370_v43 = vld [vmem:[#allocation13_spill] sm:$0xff] }
 0x80f   : > { %3172 = vmatmul.msk.f32.gmra.mxu0 %vm440_vm2, %v2505_v24  ;;  %v1600_v2 = vadd.f32 %v5370_v43, %v1510_v16 }
 0x811   : > { %v2698_v14 = vpop.f32.mrf.mxu2 }
 0x812   : > { %v2788_v50 = vadd.f32 %v2787_v10, %v2698_v14 }
 0x813   : > { %1623 = vrot.lane.b32.xlu0 %v1594_v15, %s3633_s29 }
 0x814   : > { %2819 = vrot.lane.b32.xlu1 %v2788_v50, %s3634_s10  ;;  %v3593_v44 = vpop.eup %3592 }
 0x815   : > { %v1892_v54 = vpop.xlane.xlu2 %1891  ;;  %v2507_v51 = vmul.f32 %v3593_v44, %v5148_v38 }
 0x816   : > { %v2652_v11 = vpop.permute.xlu0 %2651 }
 0x817   : > { %3167 = vmatmul.msk.f32.gmra.mxu2 %vm374_vm0, %v2652_v11  ;;  %3173 = vmatmul.msk.f32.gmra.mxu0 %vm440_vm2, %v2506_v55 }
 0x81b   : > { %v1889_v32 = vpop.xlane.xlu1 %1888  ;;  %1625 = vrot.lane.b32.xlu0 %v1597_v61, %s3633_s29 }
 0x81c   : > { %3594 = vrcp.f32 %v1889_v32 }
 0x81d   : > { %v2492_v30 = vpop.xlane.xlu2 %2491 }
 0x81e   : > { %3596 = vrcp.f32 %v2492_v30  ;;  %v2220_v58 = vpop.permute.xlu0 %2219 }
 0x81f   : > { %3174 = vmatmul.msk.f32.gmra.mxu0 %vm440_vm2, %v2507_v51  ;;  %3598 = vrcp.f32 %v1892_v54 }
 0x822   : > { %v3595_v5 = vpop.eup %3594 }
 0x823   : > { %1627 = vrot.lane.b32.xlu0 %v1600_v2, %s3633_s29  ;;  %v1907_v36 = vmul.f32 %v3595_v5, %v5160_v27  ;;  %v1603_v27 = vadd.f32 %v5371_v13, %v5193_v12 }
 0x824   : > { %v3597_v31 = vpop.eup %3596 }
 0x825   : > { %v1620_v19 = vpop.permute.xlu2 %1619  ;;  %3138 = vmatmul.msk.f32.gmra.mxu3 %vm440_vm2, %v1907_v36  ;;  %v2508_v29 = vmul.f32 %v3597_v31, %v5163_v62  ;;  %v3599_v34 = vpop.eup %3598  ;;  %v5372_v62 = vld [vmem:[#allocation15_spill] sm:$0xff] }
 0x826   : > { %1644 = vst.msk [vmem:[#allocation3] sm:$0xff] %vm1643_vm7, %v1620_v19  ;;  %v1622_v38 = vpop.permute.xlu0 %1621  ;;  %v1908_v21 = vmul.f32 %v3599_v34, %v5155_v42  ;;  %v1606_v47 = vadd.f32 %v5372_v62, %v5200_v35  ;;  %v2860_v35 = vld [vmem:[%s5338_s7] sm:$0xff] }
 0x827   : > { %1645 = vst.msk [vmem:[#allocation3 + $0x8] sm:$0xff] %vm1643_vm7, %v1622_v38  ;;  %3175 = vmatmul.msk.f32.gmra.mxu0 %vm440_vm2, %v2508_v29 }
 0x828   : > { %2244 = vst.msk [vmem:[#allocation3] sm:$0xff] %vm2243_vm8, %v2220_v58 }
 0x82b   : > { %1629 = vrot.lane.b32.xlu0 %v1603_v27, %s3633_s29 }
 0x82d   : > { %3139 = vmatmul.msk.f32.gmra.mxu3 %vm440_vm2, %v1908_v21 }
 0x831   : > { %v2701_v3 = vpop.f32.mrf.mxu2 }
 0x833   : > { %1631 = vrot.lane.b32.xlu0 %v1606_v47, %s3633_s29  ;;  %v3343_v47 = vld [vmem:[%s5339_s8] ss:$0 sm:$0xff] }
 0x83b   : > { %1633 = vrot.lane.b32.xlu0 %v1609_v7, %s3633_s29 }
 0x83f   : > { %v2790_v23 = vpop.f32.mrf.mxu0 }
 0x840   : > { %v2791_v25 = vadd.f32 %v2790_v23, %v2701_v3 }
 0x842   : > { %2821 = vrot.lane.b32.xlu2 %v2791_v25, %s3634_s10 }
 0x847   : > { %v2793_v28 = vpop.f32.mrf.mxu0 }
 0x850   : > { %v2704_v48 = vpop.f32.mrf.mxu2 }
 0x851   : > { %v2794_v57 = vadd.f32 %v2793_v28, %v2704_v48  ;;  %v2193_v42 = vpop.f32.mrf.mxu3 }
 0x852   : > { %v2194_v18 = vadd.f32 %v2193_v42, %v5185_v22  ;;  %v2796_v22 = vpop.f32.mrf.mxu0 }
 0x853   : > { %2823 = vrot.lane.b32.xlu1 %v2794_v57, %s3634_s10 }
 0x854   : > { %2223 = vrot.lane.b32.xlu2 %v2194_v18, %s3632_s27 }
 0x865   : > { %v2196_v16 = vpop.f32.mrf.mxu3 }
 0x866   : > { %v2197_v33 = vadd.f32 %v2196_v16, %v5189_v46  ;;  %v2861_v46 = vld [vmem:[%s5338_s7 + $0x8] sm:$0xff] }
 0x867   : > { %2906 = vmatpush.msrb.mxu3 %v2861_v46 }
 0x868   : > { %2225 = vrot.lane.b32.xlu2 %v2197_v33, %s3632_s27 }
 0x869   : > { %2907 = vmatpush.msrb.mxu3 %v2860_v35 }
 0x86c   : > { %v2707_v12 = vpop.f32.mrf.mxu2 }
 0x86d   : > { %v2797_v63 = vadd.f32 %v2796_v22, %v2707_v12  ;;  %v2199_v49 = vpop.f32.mrf.mxu3 }
 0x86e   : > { %v2200_v1 = vadd.f32 %v2199_v49, %v5196_v9 }
 0x86f   : > { %2825 = vrot.lane.b32.xlu1 %v2797_v63, %s3634_s10 }
 0x870   : > { %2227 = vrot.lane.b32.xlu2 %v2200_v1, %s3632_s27 }
 0x874   : > { %v2710_v53 = vpop.f32.mrf.mxu2 }
 0x875   : > { %v2202_v39 = vpop.f32.mrf.mxu3 }
 0x876   : > { %v2203_v45 = vadd.f32 %v2202_v39, %v5202_v52 }
 0x878   : > { %2229 = vrot.lane.b32.xlu2 %v2203_v45, %s3632_s27 }
 0x87d   : > { %v2222_v40 = vpop.permute.xlu0 %2221 }
 0x87e   : > { %2245 = vst.msk [vmem:[#allocation3 + $0x8] sm:$0xff] %vm2243_vm8, %v2222_v40 }
 0x87f   : > { %v2713_v52 = vpop.f32.mrf.mxu2 }
 0x885   : > { %v1624_v9 = vpop.permute.xlu0 %1623 }
 0x886   : > { %1646 = vst.msk [vmem:[#allocation3 + $0x10] sm:$0xff] %vm1643_vm7, %v1624_v9  ;;  %v2820_v0 = vpop.permute.xlu1 %2819 }
 0x887   : > { %2844 = vst.msk [vmem:[#allocation3] sm:$0xff] %vm2843_vm9, %v2820_v0  ;;  %v2716_v14 = vpop.f32.mrf.mxu2 }
 0x88c   : > { %v2799_v6 = vpop.f32.mrf.mxu0 }
 0x88d   : > { %v2800_v17 = vadd.f32 %v2799_v6, %v2710_v53  ;;  %v1626_v59 = vpop.permute.xlu0 %1625 }
 0x88e   : > { %1647 = vst.msk [vmem:[#allocation3 + $0x18] sm:$0xff] %vm1643_vm7, %v1626_v59  ;;  %v2852_v24 = vld [vmem:[#allocation3] sm:$0xff] }
 0x88f   : > { %2827 = vrot.lane.b32.xlu1 %v2800_v17, %s3634_s10  ;;  %3176 = vmatmul.msk.f32.vlgmr.msrb.gmra.mxu3 %vm374_vm0, %v2852_v24 }
 0x894   : > { %v2802_v4 = vpop.f32.mrf.mxu0 }
 0x895   : > { %v2803_v15 = vadd.f32 %v2802_v4, %v2713_v52  ;;  %v1628_v10 = vpop.permute.xlu0 %1627 }
 0x896   : > { %1648 = vst.msk [vmem:[#allocation3 + $0x20] sm:$0xff] %vm1643_vm7, %v1628_v10 }
 0x897   : > { %2829 = vrot.lane.b32.xlu1 %v2803_v15, %s3634_s10 }
 0x89a   : > { %v2719_v11 = vpop.f32.mrf.mxu2 }
 0x89c   : > { %v2805_v26 = vpop.f32.mrf.mxu0  ;;  %v2822_v50 = vpop.permute.xlu2 %2821 }
 0x89d   : > { %v2806_v54 = vadd.f32 %v2805_v26, %v2716_v14  ;;  %2845 = vst.msk [vmem:[#allocation3 + $0x8] sm:$0xff] %vm2843_vm9, %v2822_v50  ;;  %v1630_v55 = vpop.permute.xlu0 %1629 }
 0x89e   : > { %1649 = vst.msk [vmem:[#allocation3 + $0x28] sm:$0xff] %vm1643_vm7, %v1630_v55 }
 0x89f   : > { %2831 = vrot.lane.b32.xlu1 %v2806_v54, %s3634_s10 }
 0x8a4   : > { %v2808_v8 = vpop.f32.mrf.mxu0  ;;  %v2853_v61 = vld [vmem:[#allocation3 + $0x8] sm:$0xff] }
 0x8a5   : > { %v2809_v44 = vadd.f32 %v2808_v8, %v2719_v11  ;;  %3177 = vmatmul.msk.f32.gmra.mxu3 %vm374_vm0, %v2853_v61  ;;  %v1632_v32 = vpop.permute.xlu0 %1631 }
 0x8a6   : > { %1650 = vst.msk [vmem:[#allocation3 + $0x30] sm:$0xff] %vm1643_vm7, %v1632_v32 }
 0x8a7   : > { %2833 = vrot.lane.b32.xlu1 %v2809_v44, %s3634_s10 }
 0x8a8   : > { %v2205_v30 = vpop.f32.mrf.mxu3 }
 0x8a9   : > { %v2206_v51 = vadd.f32 %v2205_v30, %v5205_v37 }
 0x8ab   : > { %2231 = vrot.lane.b32.xlu2 %v2206_v51, %s3632_s27 }
 0x8ad   : > { %v1634_v58 = vpop.permute.xlu0 %1633 }
 0x8ae   : > { %1651 = vst.msk [vmem:[#allocation3 + $0x38] sm:$0xff] %vm1643_vm7, %v1634_v58  ;;  %v2224_v43 = vpop.permute.xlu2 %2223 }
 0x8af   : > { %2246 = vst.msk [vmem:[#allocation3 + $0x10] sm:$0xff] %vm2243_vm8, %v2224_v43 }
 0x8b0   : > { %v2208_v2 = vpop.f32.mrf.mxu3 }
 0x8b1   : > { %v2209_v5 = vadd.f32 %v2208_v2, %v5208_v60 }
 0x8b3   : > { %2233 = vrot.lane.b32.xlu2 %v2209_v5, %s3632_s27 }
 0x8c2   : > { %v2226_v36 = vpop.permute.xlu2 %2225 }
 0x8c3   : > { %2247 = vst.msk [vmem:[#allocation3 + $0x18] sm:$0xff] %vm2243_vm8, %v2226_v36 }
 0x8c5   : > { %v2824_v31 = vpop.permute.xlu1 %2823 }
 0x8c6   : > { %2846 = vst.msk [vmem:[#allocation3 + $0x10] sm:$0xff] %vm2843_vm9, %v2824_v31 }
 0x8ca   : > { %v2228_v37 = vpop.permute.xlu2 %2227 }
 0x8cb   : > { %2248 = vst.msk [vmem:[#allocation3 + $0x20] sm:$0xff] %vm2243_vm8, %v2228_v37 }
 0x8cd   : > { %v2854_v19 = vld [vmem:[#allocation3 + $0x10] sm:$0xff] }
 0x8ce   : > { %3178 = vmatmul.msk.f32.gmra.mxu3 %vm374_vm0, %v2854_v19 }
 0x8d2   : > { %v2230_v29 = vpop.permute.xlu2 %2229 }
 0x8d3   : > { %2249 = vst.msk [vmem:[#allocation3 + $0x28] sm:$0xff] %vm2243_vm8, %v2230_v29 }
 0x8e1   : > { %v2826_v38 = vpop.permute.xlu1 %2825 }
 0x8e2   : > { %2847 = vst.msk [vmem:[#allocation3 + $0x18] sm:$0xff] %vm2843_vm9, %v2826_v38 }
 0x8e9   : > { %v2855_v60 = vld [vmem:[#allocation3 + $0x18] sm:$0xff] }
 0x8ea   : > { %3179 = vmatmul.msk.f32.gmra.mxu3 %vm374_vm0, %v2855_v60 }
 0x901   : > { %v2828_v34 = vpop.permute.xlu1 %2827 }
 0x902   : > { %2848 = vst.msk [vmem:[#allocation3 + $0x20] sm:$0xff] %vm2843_vm9, %v2828_v34 }
 0x905   : > { %v2232_v13 = vpop.permute.xlu2 %2231 }
 0x906   : > { %2250 = vst.msk [vmem:[#allocation3 + $0x30] sm:$0xff] %vm2243_vm8, %v2232_v13 }
 0x909   : > { %v2830_v27 = vpop.permute.xlu1 %2829  ;;  %v2856_v21 = vld [vmem:[#allocation3 + $0x20] sm:$0xff] }
 0x90a   : > { %2849 = vst.msk [vmem:[#allocation3 + $0x28] sm:$0xff] %vm2843_vm9, %v2830_v27  ;;  %3180 = vmatmul.msk.f32.gmra.mxu3 %vm374_vm0, %v2856_v21 }
 0x90d   : > { %v2234_v62 = vpop.permute.xlu2 %2233 }
 0x90e   : > { %2251 = vst.msk [vmem:[#allocation3 + $0x38] sm:$0xff] %vm2243_vm8, %v2234_v62 }
 0x911   : > { %v2832_v56 = vpop.permute.xlu1 %2831  ;;  %v2857_v7 = vld [vmem:[#allocation3 + $0x28] sm:$0xff] }
 0x912   : > { %2850 = vst.msk [vmem:[#allocation3 + $0x30] sm:$0xff] %vm2843_vm9, %v2832_v56  ;;  %v2909_v3 = vpop.f32.mrf.mxu3  ;;  %3181 = vmatmul.msk.f32.gmra.mxu3 %vm374_vm0, %v2857_v7 }
 0x913   : > { %v2910_v23 = vadd.f32 %v3343_v47, %v2909_v3 }
 0x915   : > { %2933 = vst.msk [vmem:[%s5305_s28] sm:$0xff] %vm374_vm0, %v2910_v23 }
 0x919   : > { %v2834_v25 = vpop.permute.xlu1 %2833  ;;  %v2858_v28 = vld [vmem:[#allocation3 + $0x30] sm:$0xff] }
 0x91a   : > { %2851 = vst.msk [vmem:[#allocation3 + $0x38] sm:$0xff] %vm2843_vm9, %v2834_v25  ;;  %3182 = vmatmul.msk.f32.gmra.mxu3 %vm374_vm0, %v2858_v28 }
 0x921   : > { %v2859_v48 = vld [vmem:[#allocation3 + $0x38] sm:$0xff] }
 0x922   : > { %3183 = vmatmul.msk.f32.gmra.mxu3 %vm374_vm0, %v2859_v48 }
 0x928   : > { %v2912_v57 = vpop.f32.mrf.mxu3 }
 0x929   : > { %v2913_v42 = vadd.f32 %v3343_v47, %v2912_v57 }
 0x92b   : > { %2934 = vst.msk [vmem:[%s5305_s28 + $0x8] sm:$0xff] %vm374_vm0, %v2913_v42 }
 0x951   : > { %v2915_v18 = vpop.f32.mrf.mxu3 }
 0x952   : > { %v2916_v16 = vadd.f32 %v3343_v47, %v2915_v18 }
 0x954   : > { %2935 = vst.msk [vmem:[%s5305_s28 + $0x10] sm:$0xff] %vm374_vm0, %v2916_v16 }
 0x96d   : > { %v2918_v33 = vpop.f32.mrf.mxu3 }
 0x96e   : > { %v2919_v20 = vadd.f32 %v3343_v47, %v2918_v33 }
 0x970   : > { %2936 = vst.msk [vmem:[%s5305_s28 + $0x18] sm:$0xff] %vm374_vm0, %v2919_v20 }
 0x98d   : > { %v2921_v41 = vpop.f32.mrf.mxu3 }
 0x98e   : > { %v2922_v22 = vadd.f32 %v3343_v47, %v2921_v41 }
 0x990   : > { %2937 = vst.msk [vmem:[%s5305_s28 + $0x20] sm:$0xff] %vm374_vm0, %v2922_v22 }
 0x995   : > { %v2924_v12 = vpop.f32.mrf.mxu3 }
 0x996   : > { %v2925_v63 = vadd.f32 %v3343_v47, %v2924_v12 }
 0x998   : > { %2938 = vst.msk [vmem:[%s5305_s28 + $0x28] sm:$0xff] %vm374_vm0, %v2925_v63 }
 0x99d   : > { %v2927_v49 = vpop.f32.mrf.mxu3 }
 0x99e   : > { %v2928_v46 = vadd.f32 %v3343_v47, %v2927_v49 }
 0x9a0   : > { %2939 = vst.msk [vmem:[%s5305_s28 + $0x30] sm:$0xff] %vm374_vm0, %v2928_v46 }
 0x9a5   : > { %v2930_v1 = vpop.f32.mrf.mxu3 }
 0x9a6   : > { %v2931_v35 = vadd.f32 %v3343_v47, %v2930_v1 }
 0x9a8   : > { %2940 = vst.msk [vmem:[%s5305_s28 + $0x38] sm:$0xff] %vm374_vm0, %v2931_v35 }
 0x9a9 PF: > { %s19_s30 = sadd.s32 1, %s3618_s30  }
 0x9aa   : > { %p16_p5 = scmp.ge.s32.totalorder %s19_s30, 4  }
 0x9ac   :  { %18 = sbr.rel (!%p16_p5) target bundleno = 1 (0x1), region = 89 }

</bundles_post_ra>
